<compile_context>
chip_gen: v7x
topology: tpu7x:2x2x1
jax: 0.10.0
libtpu: 0.0.40
codegen_flags: <defaults>
</compile_context>

<pallas_src>
import math

import jax
import jax.numpy as jnp
from jax.experimental import pallas as pl
from jax.experimental.pallas import tpu as pltpu

# ----------------------------- small config ---------------------------------
B = 2                        # batch
IMG = 16                     # img_size
PATCH = 4                    # patch size
IN_CH = 3                    # input channels
D = 32                       # hidden_size
H = 4                        # num_heads
DH = D // H                  # head dim
MLP = 64                     # mlp_dim
L = 12                       # num_layers (Encoder hard-codes layer[10]/[11])
L10 = 10                     # fused prefix
GRID_P = IMG // PATCH
N_PATCH = GRID_P * GRID_P    # 16
CPP = IN_CH * PATCH * PATCH  # 48 (flattened patch)
S = N_PATCH + 1              # 17 (cls + patches)
EPS = 1e-6
MXU_DT = jnp.bfloat16        # matmul-operand dtype (f32 accumulation everywhere)
VEC_ROWS = 8                 # packed small-parameter slab rows
VEC_LANES = 128              # packed small-parameter slab lanes


# ----------------------------- in-kernel helpers ----------------------------
def _erf(x):
  # Abramowitz & Stegun 7.1.26 (max abs err ~1.5e-7 == float32 precision).
  a1, a2, a3, a4, a5 = (0.254829592, -0.284496736, 1.421413741,
                        -1.453152027, 1.061405429)
  p = 0.3275911
  s = jnp.where(x >= 0, 1.0, -1.0)
  ax = jnp.abs(x)
  t = 1.0 / (1.0 + p * ax)
  poly = ((((a5 * t + a4) * t + a3) * t + a2) * t + a1) * t
  return s * (1.0 - poly * jnp.exp(-ax * ax))


def _gelu_exact(x):
  return 0.5 * x * (1.0 + _erf(x * (1.0 / math.sqrt(2.0))))


def _layernorm(v, w, b):
  # torch.nn.LayerNorm semantics (biased variance, eps inside sqrt)
  mu = jnp.mean(v, axis=-1, keepdims=True)
  var = jnp.mean(jnp.square(v - mu), axis=-1, keepdims=True)
  return (v - mu) * jax.lax.rsqrt(var + EPS) * w + b


def _block_core(x, wattn, wmlp, vec, prob_sink):
  """One encoder Block on an (S_cur, D) f32 tile.

  wattn: (D, 4D) bf16  = [Wq | Wk | Wv | Wo]
  wmlp : (D+MLP, 2*MLP) bf16; [0:D, 0:MLP] = W1, [D:, 0:D] = W2
  vec  : (8, 128) f32 rows = ln1_w, ln1_b, bqkv, bo, ln2_w, ln2_b, b1, b2
  prob_sink(head, probs) is called with each head's (S,S) softmax right after
  it is produced (short live ranges -> no spills across the MLP).
  """
  ln1w, ln1b = vec[0:1, :D], vec[1:2, :D]
  bqkv, bo = vec[2:3, :3 * D], vec[3:4, :D]
  ln2w, ln2b = vec[4:5, :D], vec[5:6, :D]
  b1, b2 = vec[6:7, :MLP], vec[7:8, :D]

  xn = _layernorm(x, ln1w, ln1b)
  qkv = jnp.dot(xn.astype(MXU_DT), wattn[:, :3 * D],
                preferred_element_type=jnp.float32) + bqkv           # (S, 3D)
  scale = 1.0 / math.sqrt(DH)
  ctxs = []
  for hd in range(H):                                  # static head loop
    qh = qkv[:, hd * DH:(hd + 1) * DH].astype(MXU_DT)
    kh = qkv[:, D + hd * DH: D + (hd + 1) * DH].astype(MXU_DT)
    vh = qkv[:, 2 * D + hd * DH: 2 * D + (hd + 1) * DH].astype(MXU_DT)
    sc = jax.lax.dot_general(qh, kh, (((1,), (1,)), ((), ())),
                             preferred_element_type=jnp.float32) * scale
    sc = sc - jnp.max(sc, axis=-1, keepdims=True)
    e = jnp.exp(sc)
    p = e * pl.reciprocal(jnp.sum(e, axis=-1, keepdims=True), approx=True)
    prob_sink(hd, p)                                   # consume probs NOW
    ctxs.append(jnp.dot(p.astype(MXU_DT), vh,
                        preferred_element_type=jnp.float32))          # (S, DH)
  ctx = jnp.concatenate(ctxs, axis=-1)                 # (S, D) head-major concat
  ao = jnp.dot(ctx.astype(MXU_DT), wattn[:, 3 * D:],
               preferred_element_type=jnp.float32) + bo               # one K=32 dot
  x1 = ao + x                                          # residual 1
  yn = _layernorm(x1, ln2w, ln2b)
  y = jnp.dot(yn.astype(MXU_DT), wmlp[:D, :MLP],
              preferred_element_type=jnp.float32) + b1
  y = _gelu_exact(y)                                   # exact (erf) GELU
  y = jnp.dot(y.astype(MXU_DT), wmlp[D:, :D],
              preferred_element_type=jnp.float32) + b2
  return x1 + y                                        # residual 2


# ------------------- fused kernel: embeddings + layers 0..9 ------------------
def _fused10_kernel(patches_ref, convw_ref, convb_ref, cls_ref, pos_ref,
                    wattn_ref, wmlp_ref, vecs_ref,
                    hid_out_ref, chain0_out_ref, hid_sc, chain_sc):
  """grid = (batch, layer). Weight stacks are VMEM-resident (constant block
  index); activations + chained attention product stay in VMEM scratch across
  the layer axis; only the final hidden state and row 0 of the rollout
  (A9 @ ... @ A0)[cls, :] are written to HBM."""
  l = pl.program_id(1)

  @pl.when(l == 0)
  def _():
    # patch-embedding prologue (conv with kernel==stride as a matmul)
    pos = pos_ref[0]                                               # (S, D)
    emb = jnp.dot(patches_ref[0].astype(MXU_DT), convw_ref[...],
                  preferred_element_type=jnp.float32) + convb_ref[...]
    # one aligned full-tile store (cls row + patch rows + positions)
    hid_sc[...] = jnp.concatenate(
        [cls_ref[0] + pos[0:1, :], emb + pos[1:, :]], axis=0)
    # init chained attention product to identity per head
    row = jax.lax.broadcasted_iota(jnp.int32, (S, S), 0)
    col = jax.lax.broadcasted_iota(jnp.int32, (S, S), 1)
    eye = (row == col).astype(jnp.float32)
    chain_sc[...] = jnp.broadcast_to(eye, (H, S, S))

  # resident weight stacks, indexed by the layer grid position
  wattn = wattn_ref[l]
  wmlp = wmlp_ref[l]
  vec = vecs_ref[l]

  def sink(hd, p):                                     # chain = A_l @ chain
    chain_sc[hd] = jnp.dot(p, chain_sc[hd], preferred_element_type=jnp.float32)

  hid_sc[...] = _block_core(hid_sc[...], wattn, wmlp, vec, sink)

  @pl.when(l == L10 - 1)
  def _():
    hid_out_ref[0] = hid_sc[...]
    for hd in range(H):                                # only the cls row is needed
      chain0_out_ref[0, hd] = chain_sc[hd, 0:1, :]


def run_fused_layers(patches, params):
  Bb = patches.shape[0]
  wattn10 = params['wattn'][:L10]
  wmlp10 = params['wmlp'][:L10]
  vecs10 = params['vecs'][:L10]
  hidden, chain0 = pl.pallas_call(
      _fused10_kernel,
      grid=(Bb, L10),
      in_specs=[
          pl.BlockSpec((1, N_PATCH, CPP), lambda b, l: (b, 0, 0)),   # patches
          pl.BlockSpec((CPP, D), lambda b, l: (0, 0)),               # conv_w (bf16)
          pl.BlockSpec((1, D), lambda b, l: (0, 0)),                 # conv_b
          pl.BlockSpec((1, 1, D), lambda b, l: (0, 0, 0)),           # cls token
          pl.BlockSpec((1, S, D), lambda b, l: (0, 0, 0)),           # pos emb
          # full weight stacks, constant index -> fetched once, VMEM resident
          pl.BlockSpec((L10, D, 4 * D), lambda b, l: (0, 0, 0)),
          pl.BlockSpec((L10, D + MLP, 2 * MLP), lambda b, l: (0, 0, 0)),
          pl.BlockSpec((L10, VEC_ROWS, VEC_LANES), lambda b, l: (0, 0, 0)),
      ],
      out_specs=(pl.BlockSpec((1, S, D), lambda b, l: (b, 0, 0)),
                 pl.BlockSpec((1, H, 1, S), lambda b, l: (b, 0, 0, 0))),
      out_shape=(jax.ShapeDtypeStruct((Bb, S, D), jnp.float32),
                 jax.ShapeDtypeStruct((Bb, H, 1, S), jnp.float32)),
      scratch_shapes=[pltpu.VMEM((S, D), jnp.float32),
                      pltpu.VMEM((H, S, S), jnp.float32)],
      compiler_params=pltpu.CompilerParams(
          dimension_semantics=("parallel", "arbitrary")),
  )(patches, params['conv_w'], params['conv_b'], params['cls_token'],
    params['pos_emb'], wattn10, wmlp10, vecs10)
  return hidden, chain0


# --------------------- single block kernels (layers 10, 11) ------------------
def _make_block_kernel(apply_final_ln):
  def kernel(*refs):
    if apply_final_ln:
      x_ref, wattn_ref, wmlp_ref, vecs_ref, fln_ref, out_ref, attn_ref = refs
    else:
      x_ref, wattn_ref, wmlp_ref, vecs_ref, out_ref, attn_ref = refs

    def sink(hd, p):
      attn_ref[0, hd] = p                              # store probs immediately

    x_out = _block_core(x_ref[0], wattn_ref[...], wmlp_ref[...],
                        vecs_ref[...], sink)
    if apply_final_ln:                                 # fused encoder_norm epilogue
      fln = fln_ref[...]
      x_out = _layernorm(x_out, fln[0:1, :], fln[1:2, :])
    out_ref[0] = x_out
  return kernel


def run_block(x, wattn, wmlp, vecs, final_ln=None):
  Bb, Ss, Dd = x.shape
  args = [x, wattn, wmlp, vecs]
  in_specs = [
      pl.BlockSpec((1, Ss, Dd), lambda b: (b, 0, 0)),
      pl.BlockSpec((D, 4 * D), lambda b: (0, 0)),
      pl.BlockSpec((D + MLP, 2 * MLP), lambda b: (0, 0)),
      pl.BlockSpec((VEC_ROWS, VEC_LANES), lambda b: (0, 0)),
  ]
  if final_ln is not None:
    args.append(final_ln)
    in_specs.append(pl.BlockSpec((2, D), lambda b: (0, 0)))
  out, attn = pl.pallas_call(
      _make_block_kernel(final_ln is not None),
      grid=(Bb,),
      in_specs=in_specs,
      out_specs=(pl.BlockSpec((1, Ss, Dd), lambda b: (b, 0, 0)),
                 pl.BlockSpec((1, H, Ss, Ss), lambda b: (b, 0, 0, 0))),
      out_shape=(jax.ShapeDtypeStruct((Bb, Ss, Dd), jnp.float32),
                 jax.ShapeDtypeStruct((Bb, H, Ss, Ss), jnp.float32)),
      compiler_params=pltpu.CompilerParams(dimension_semantics=("parallel",)),
  )(*args)
  return out, attn


# ----------------------------- JAX glue -------------------------------------
def aqs_module(attn_row, hidden_states, threshold):
  """AQS_Module: top-k token selection, hash(sign) gating, token compaction.

  Data-dependent (top_k / compaction) -> kept as tiny XLA-fused glue.
  # TODO(synk): fold this gather (via PrefetchScalarGridSpec scalar indices)
  # into run_block to remove the intermediate HBM round trip.
  """
  Bb, Hh, K = attn_row.shape                             # attn_map[:, :, 0, 1:]
  flat = attn_row.reshape(Bb, Hh * K)
  top_values, top_indices = jax.lax.top_k(flat, K)
  col = top_indices % K
  select_inx = col + 1                                   # (B, K)
  noncls = jnp.take_along_axis(hidden_states, select_inx[:, :, None], axis=1)
  attn_scores = top_values / jnp.sum(top_values, axis=-1, keepdims=True)
  filt = jnp.sign(attn_scores - threshold)               # hash_layer forward == sign
  filt = jnp.round((filt + 1.0) / 2.0)[..., None]        # (B, K, 1) in {0, 1}
  new_noncls = (noncls * filt).astype(jnp.float16)       # matches .half()
  mask = jnp.any(new_noncls != 0, axis=-1)               # (B, K)
  # Compact non-zero tokens to the front (stable), zero-pad the rest.
  order = jnp.argsort(jnp.where(mask, 0, 1).astype(jnp.int32), axis=-1,
                      stable=True)
  compacted = jnp.take_along_axis(new_noncls, order[:, :, None], axis=1)
  compacted = jnp.where(jnp.take_along_axis(mask, order, axis=1)[:, :, None],
                        compacted, jnp.float16(0))
  # TODO(synk): PyTorch resizes to the dynamic max(#non-zero, 12) tokens; a
  # static K is kept here (identical result when all tokens survive, as with
  # the zero threshold).
  new_hidden = jnp.concatenate(
      [hidden_states[:, :1], compacted.astype(hidden_states.dtype)], axis=1)
  threshold_loss = jnp.abs(threshold - 0.001)
  return new_hidden, threshold_loss


def transformer_forward(x_img, params):
  Bb = x_img.shape[0]
  # patch extraction (conv kernel == stride) -> (B, N_PATCH, C*P*P)
  patches = x_img.reshape(Bb, IN_CH, GRID_P, PATCH, GRID_P, PATCH)
  patches = patches.transpose(0, 2, 4, 1, 3, 5).reshape(Bb, N_PATCH, CPP)

  # embeddings + layers 0..9 + rollout row 0: one fused kernel
  hidden, chain0 = run_fused_layers(patches, params)    # chain0 = (A9..A0)[:, :, 0:1, :]

  new_hidden, loss11 = aqs_module(chain0[:, :, 0, 1:], hidden,
                                  params['aqs11_threshold'])
  hidden, w10 = run_block(new_hidden, params['wattn'][10], params['wmlp'][10],
                          params['vecs'][10])
  new_hidden, loss12 = aqs_module(w10[:, :, 0, 1:], hidden,
                                  params['aqs12_threshold'])
  encoded, w11 = run_block(new_hidden, params['wattn'][11], params['wmlp'][11],
                           params['vecs'][11], final_ln=params['enc_norm'])
  return encoded, w11, loss11 + loss12


# ----------------------------- parameters -----------------------------------
def init_params(key):
  p = {}
  kconv, key = jax.random.split(key)
  sd = 0.05
  p['conv_w'] = (sd * jax.random.normal(kconv, (CPP, D), jnp.float32)
                 ).astype(MXU_DT)
  p['conv_b'] = jnp.zeros((1, D), jnp.float32)
  p['cls_token'] = jnp.zeros((1, 1, D), jnp.float32)      # zeros as in module init
  p['pos_emb'] = jnp.zeros((1, S, D), jnp.float32)        # zeros as in module init

  wattn_layers, wmlp_layers, vec_layers = [], [], []
  for _ in range(L):
    key, k1, k2, k3, k4, k5, k6 = jax.random.split(key, 7)
    wq = sd * jax.random.normal(k1, (D, D), jnp.float32)
    wk = sd * jax.random.normal(k2, (D, D), jnp.float32)
    wv = sd * jax.random.normal(k3, (D, D), jnp.float32)
    wo = sd * jax.random.normal(k4, (D, D), jnp.float32)
    w1 = sd * jax.random.normal(k5, (D, MLP), jnp.float32)
    w2 = sd * jax.random.normal(k6, (MLP, D), jnp.float32)
    # matrix slab 1: [Wq | Wk | Wv | Wo] -> (D, 4D) == exactly one 128-lane tile
    wattn_layers.append(jnp.concatenate([wq, wk, wv, wo], axis=1))
    # matrix slab 2: W1 on rows 0:D, W2 on rows D:D+MLP, lanes padded to 128
    wmlp = jnp.zeros((D + MLP, 2 * MLP), jnp.float32)
    wmlp = wmlp.at[:D, :MLP].set(w1)
    wmlp = wmlp.at[D:, :D].set(w2)
    wmlp_layers.append(wmlp)
    # vector slab: one row per small parameter, all at lane offset 0
    # rows = ln1_w, ln1_b, bqkv, bo, ln2_w, ln2_b, b1, b2
    vec = jnp.zeros((VEC_ROWS, VEC_LANES), jnp.float32)
    vec = vec.at[0, :D].set(jnp.ones((D,), jnp.float32))   # ln1_w
    vec = vec.at[4, :D].set(jnp.ones((D,), jnp.float32))   # ln2_w
    vec_layers.append(vec)                                 # biases init to zero

  p['wattn'] = jnp.stack(wattn_layers, axis=0).astype(MXU_DT)   # (L, D, 4D)
  p['wmlp'] = jnp.stack(wmlp_layers, axis=0).astype(MXU_DT)     # (L, D+MLP, 128)
  p['vecs'] = jnp.stack(vec_layers, axis=0)                     # (L, 8, 128) f32
  p['enc_norm'] = jnp.stack([jnp.ones((D,), jnp.float32),
                             jnp.zeros((D,), jnp.float32)], axis=0)  # (2, D)
  p['aqs11_threshold'] = jnp.float32(0.0)                 # nn.Parameter(tensor(0.0))
  p['aqs12_threshold'] = jnp.float32(0.0)
  return p


if __name__ == "__main__":
  key = jax.random.PRNGKey(0)
  kx, kp = jax.random.split(key)
  x = jax.random.normal(kx, (B, IN_CH, IMG, IMG), jnp.float32)   # NCHW like PyTorch
  params = init_params(kp)
  fwd = jax.jit(transformer_forward)
  encoded, attn_weights, total_threshold_loss = fwd(x, params)
  jax.block_until_ready((encoded, attn_weights, total_threshold_loss))
  assert encoded.shape == (B, S, D)
  assert attn_weights.shape == (B, H, S, S)
  print("KERNEL_OK")
</pallas_src>

<mosaic_0001>
module attributes {stable_mosaic.version = 11 : i64} {
  func.func @_fused10_kernel(%arg0: i32, %arg1: i32, %arg2: memref<1x16x48xf32, #tpu.memory_space<vmem>>, %arg3: memref<48x32xbf16, #tpu.memory_space<vmem>>, %arg4: memref<1x32xf32, #tpu.memory_space<vmem>>, %arg5: memref<1x1x32xf32, #tpu.memory_space<vmem>>, %arg6: memref<1x17x32xf32, #tpu.memory_space<vmem>>, %arg7: memref<10x32x128xbf16, #tpu.memory_space<vmem>>, %arg8: memref<10x96x128xbf16, #tpu.memory_space<vmem>>, %arg9: memref<10x8x128xf32, #tpu.memory_space<vmem>>, %arg10: memref<1x17x32xf32, #tpu.memory_space<vmem>>, %arg11: memref<1x4x1x17xf32, #tpu.memory_space<vmem>>, %arg12: memref<17x32xf32, #tpu.memory_space<vmem>>, %arg13: memref<4x17x17xf32, #tpu.memory_space<vmem>>) attributes {dimension_semantics = [#tpu.dimension_semantics<parallel>, #tpu.dimension_semantics<arbitrary>], iteration_bounds = array<i64: 2, 10>, scalar_prefetch = 0 : i64, scratch_operands = 2 : i64, tpu.core_type = #tpu.core_type<tc>, window_params = [{transform_indices = @transform_0, window_bounds = array<i64: 1, 16, 48>}, {pipeline_mode = #tpu.pipeline_mode<synchronous>, transform_indices = @transform_1, window_bounds = array<i64: 48, 32>}, {pipeline_mode = #tpu.pipeline_mode<synchronous>, transform_indices = @transform_2, window_bounds = array<i64: 1, 32>}, {pipeline_mode = #tpu.pipeline_mode<synchronous>, transform_indices = @transform_3, window_bounds = array<i64: 1, 1, 32>}, {pipeline_mode = #tpu.pipeline_mode<synchronous>, transform_indices = @transform_4, window_bounds = array<i64: 1, 17, 32>}, {pipeline_mode = #tpu.pipeline_mode<synchronous>, transform_indices = @transform_5, window_bounds = array<i64: 10, 32, 128>}, {pipeline_mode = #tpu.pipeline_mode<synchronous>, transform_indices = @transform_6, window_bounds = array<i64: 10, 96, 128>}, {pipeline_mode = #tpu.pipeline_mode<synchronous>, transform_indices = @transform_7, window_bounds = array<i64: 10, 8, 128>}, {transform_indices = @transform_8, window_bounds = array<i64: 1, 17, 32>}, {transform_indices = @transform_9, window_bounds = array<i64: 1, 4, 1, 17>}]} {
    %c0_i32 = arith.constant 0 : i32
    %0 = arith.cmpi eq, %arg1, %c0_i32 : i32
    %1 = arith.extui %0 : i1 to i32
    %c0_i32_0 = arith.constant 0 : i32
    %2 = arith.cmpi ne, %1, %c0_i32_0 : i32
    scf.if %2 {
      %c0_85 = arith.constant 0 : index
      %c0_86 = arith.constant 0 : index
      %c0_87 = arith.constant 0 : index
      %241 = vector.load %arg6[%c0_85, %c0_86, %c0_87] : memref<1x17x32xf32, #tpu.memory_space<vmem>>, vector<1x17x32xf32>
      %242 = vector.shape_cast %241 : vector<1x17x32xf32> to vector<17x32xf32>
      %c0_88 = arith.constant 0 : index
      %c0_89 = arith.constant 0 : index
      %c0_90 = arith.constant 0 : index
      %243 = vector.load %arg2[%c0_88, %c0_89, %c0_90] : memref<1x16x48xf32, #tpu.memory_space<vmem>>, vector<1x16x48xf32>
      %244 = vector.shape_cast %243 : vector<1x16x48xf32> to vector<16x48xf32>
      %245 = arith.truncf %244 : vector<16x48xf32> to vector<16x48xbf16>
      %c0_91 = arith.constant 0 : index
      %c0_92 = arith.constant 0 : index
      %246 = vector.load %arg3[%c0_91, %c0_92] : memref<48x32xbf16, #tpu.memory_space<vmem>>, vector<48x32xbf16>
      %cst_93 = arith.constant dense<0.000000e+00> : vector<16x32xf32>
      %247 = tpu.matmul %245, %246, %cst_93 {dimension_numbers = #tpu.dot_dimension_numbers<[1], [0], [0], [1], [0, 0, 1, 1], [], []>} : vector<16x48xbf16>, vector<48x32xbf16>, vector<16x32xf32> -> vector<16x32xf32>
      %c0_94 = arith.constant 0 : index
      %c0_95 = arith.constant 0 : index
      %248 = vector.load %arg4[%c0_94, %c0_95] : memref<1x32xf32, #tpu.memory_space<vmem>>, vector<1x32xf32>
      %249 = vector.broadcast %248 : vector<1x32xf32> to vector<16x32xf32>
      %250 = arith.addf %247, %249 : vector<16x32xf32>
      %c0_96 = arith.constant 0 : index
      %c0_97 = arith.constant 0 : index
      %c0_98 = arith.constant 0 : index
      %251 = vector.load %arg5[%c0_96, %c0_97, %c0_98] : memref<1x1x32xf32, #tpu.memory_space<vmem>>, vector<1x1x32xf32>
      %252 = vector.shape_cast %251 : vector<1x1x32xf32> to vector<1x32xf32>
      %253 = vector.extract_strided_slice %242 {offsets = [0, 0], sizes = [1, 32], strides = [1, 1]} : vector<17x32xf32> to vector<1x32xf32>
      %254 = arith.addf %252, %253 : vector<1x32xf32>
      %255 = vector.extract_strided_slice %242 {offsets = [1, 0], sizes = [16, 32], strides = [1, 1]} : vector<17x32xf32> to vector<16x32xf32>
      %256 = arith.addf %250, %255 : vector<16x32xf32>
      %257 = tpu.concatenate %254, %256 in 0 : vector<1x32xf32>, vector<16x32xf32> -> vector<17x32xf32>
      %c0_99 = arith.constant 0 : index
      %c0_100 = arith.constant 0 : index
      %258 = vector.load %arg12[%c0_99, %c0_100] : memref<17x32xf32, #tpu.memory_space<vmem>>, vector<17x32xf32>
      tpu.vector_store %arg12[%c0_99, %c0_100], %257 {strides = array<i32>} : memref<17x32xf32, #tpu.memory_space<vmem>>, vector<17x32xf32>,
      %259 = tpu.iota {dimensions = array<i32: 0>} : vector<17x17xi32>
      %260 = tpu.iota {dimensions = array<i32: 1>} : vector<17x17xi32>
      %261 = arith.cmpi eq, %259, %260 : vector<17x17xi32>
      %262 = arith.extui %261 : vector<17x17xi1> to vector<17x17xi32>
      %263 = arith.sitofp %262 : vector<17x17xi32> to vector<17x17xf32>
      %264 = vector.shape_cast %263 : vector<17x17xf32> to vector<1x17x17xf32>
      %265 = vector.broadcast %264 : vector<1x17x17xf32> to vector<4x17x17xf32>
      %c0_101 = arith.constant 0 : index
      %c0_102 = arith.constant 0 : index
      %c0_103 = arith.constant 0 : index
      %266 = vector.load %arg13[%c0_101, %c0_102, %c0_103] : memref<4x17x17xf32, #tpu.memory_space<vmem>>, vector<4x17x17xf32>
      tpu.vector_store %arg13[%c0_101, %c0_102, %c0_103], %265 {strides = array<i32>} : memref<4x17x17xf32, #tpu.memory_space<vmem>>, vector<4x17x17xf32>,
    } else {
    }
    %3 = arith.index_cast %arg1 : i32 to index
    %c0 = arith.constant 0 : index
    %c0_1 = arith.constant 0 : index
    %4 = vector.load %arg7[%3, %c0, %c0_1] : memref<10x32x128xbf16, #tpu.memory_space<vmem>>, vector<1x32x128xbf16>
    %5 = vector.shape_cast %4 : vector<1x32x128xbf16> to vector<32x128xbf16>
    %6 = arith.index_cast %arg1 : i32 to index
    %c0_2 = arith.constant 0 : index
    %c0_3 = arith.constant 0 : index
    %7 = vector.load %arg8[%6, %c0_2, %c0_3] : memref<10x96x128xbf16, #tpu.memory_space<vmem>>, vector<1x96x128xbf16>
    %8 = vector.shape_cast %7 : vector<1x96x128xbf16> to vector<96x128xbf16>
    %9 = arith.index_cast %arg1 : i32 to index
    %c0_4 = arith.constant 0 : index
    %c0_5 = arith.constant 0 : index
    %10 = vector.load %arg9[%9, %c0_4, %c0_5] : memref<10x8x128xf32, #tpu.memory_space<vmem>>, vector<1x8x128xf32>
    %11 = vector.shape_cast %10 : vector<1x8x128xf32> to vector<8x128xf32>
    %c0_6 = arith.constant 0 : index
    %c0_7 = arith.constant 0 : index
    %12 = vector.load %arg12[%c0_6, %c0_7] : memref<17x32xf32, #tpu.memory_space<vmem>>, vector<17x32xf32>
    %13 = vector.extract_strided_slice %11 {offsets = [0, 0], sizes = [1, 32], strides = [1, 1]} : vector<8x128xf32> to vector<1x32xf32>
    %14 = vector.extract_strided_slice %11 {offsets = [1, 0], sizes = [1, 32], strides = [1, 1]} : vector<8x128xf32> to vector<1x32xf32>
    %15 = vector.extract_strided_slice %11 {offsets = [2, 0], sizes = [1, 96], strides = [1, 1]} : vector<8x128xf32> to vector<1x96xf32>
    %16 = vector.extract_strided_slice %11 {offsets = [3, 0], sizes = [1, 32], strides = [1, 1]} : vector<8x128xf32> to vector<1x32xf32>
    %17 = vector.extract_strided_slice %11 {offsets = [4, 0], sizes = [1, 32], strides = [1, 1]} : vector<8x128xf32> to vector<1x32xf32>
    %18 = vector.extract_strided_slice %11 {offsets = [5, 0], sizes = [1, 32], strides = [1, 1]} : vector<8x128xf32> to vector<1x32xf32>
    %19 = vector.extract_strided_slice %11 {offsets = [6, 0], sizes = [1, 64], strides = [1, 1]} : vector<8x128xf32> to vector<1x64xf32>
    %20 = vector.extract_strided_slice %11 {offsets = [7, 0], sizes = [1, 32], strides = [1, 1]} : vector<8x128xf32> to vector<1x32xf32>
    %cst = arith.constant dense<0.000000e+00> : vector<17xf32>
    %21 = vector.multi_reduction <add>, %12, %cst [1] : vector<17x32xf32> to vector<17xf32>
    %22 = vector.shape_cast %21 : vector<17xf32> to vector<17x1xf32>
    %cst_8 = arith.constant 3.200000e+01 : f32
    %23 = vector.broadcast %cst_8 : f32 to vector<17x1xf32>
    %24 = arith.divf %22, %23 : vector<17x1xf32>
    %25 = vector.broadcast %24 : vector<17x1xf32> to vector<17x32xf32>
    %26 = arith.subf %12, %25 : vector<17x32xf32>
    %27 = arith.mulf %26, %26 : vector<17x32xf32>
    %cst_9 = arith.constant dense<0.000000e+00> : vector<17xf32>
    %28 = vector.multi_reduction <add>, %27, %cst_9 [1] : vector<17x32xf32> to vector<17xf32>
    %29 = vector.shape_cast %28 : vector<17xf32> to vector<17x1xf32>
    %cst_10 = arith.constant 3.200000e+01 : f32
    %30 = vector.broadcast %cst_10 : f32 to vector<17x1xf32>
    %31 = arith.divf %29, %30 : vector<17x1xf32>
    %32 = vector.broadcast %24 : vector<17x1xf32> to vector<17x32xf32>
    %33 = arith.subf %12, %32 : vector<17x32xf32>
    %cst_11 = arith.constant 9.99999997E-7 : f32
    %34 = vector.broadcast %cst_11 : f32 to vector<17x1xf32>
    %35 = arith.addf %31, %34 : vector<17x1xf32>
    %36 = math.rsqrt %35 : vector<17x1xf32>
    %37 = vector.broadcast %36 : vector<17x1xf32> to vector<17x32xf32>
    %38 = arith.mulf %33, %37 : vector<17x32xf32>
    %39 = vector.broadcast %13 : vector<1x32xf32> to vector<17x32xf32>
    %40 = arith.mulf %38, %39 : vector<17x32xf32>
    %41 = vector.broadcast %14 : vector<1x32xf32> to vector<17x32xf32>
    %42 = arith.addf %40, %41 : vector<17x32xf32>
    %43 = arith.truncf %42 : vector<17x32xf32> to vector<17x32xbf16>
    %44 = vector.extract_strided_slice %5 {offsets = [0, 0], sizes = [32, 96], strides = [1, 1]} : vector<32x128xbf16> to vector<32x96xbf16>
    %cst_12 = arith.constant dense<0.000000e+00> : vector<17x96xf32>
    %45 = tpu.matmul %43, %44, %cst_12 {dimension_numbers = #tpu.dot_dimension_numbers<[1], [0], [0], [1], [0, 0, 1, 1], [], []>} : vector<17x32xbf16>, vector<32x96xbf16>, vector<17x96xf32> -> vector<17x96xf32>
    %46 = vector.broadcast %15 : vector<1x96xf32> to vector<17x96xf32>
    %47 = arith.addf %45, %46 : vector<17x96xf32>
    %48 = vector.extract_strided_slice %47 {offsets = [0, 0], sizes = [17, 8], strides = [1, 1]} : vector<17x96xf32> to vector<17x8xf32>
    %49 = arith.truncf %48 : vector<17x8xf32> to vector<17x8xbf16>
    %50 = vector.extract_strided_slice %47 {offsets = [0, 32], sizes = [17, 8], strides = [1, 1]} : vector<17x96xf32> to vector<17x8xf32>
    %51 = arith.truncf %50 : vector<17x8xf32> to vector<17x8xbf16>
    %52 = vector.extract_strided_slice %47 {offsets = [0, 64], sizes = [17, 8], strides = [1, 1]} : vector<17x96xf32> to vector<17x8xf32>
    %53 = arith.truncf %52 : vector<17x8xf32> to vector<17x8xbf16>
    %cst_13 = arith.constant dense<0.000000e+00> : vector<17x17xf32>
    %54 = tpu.matmul %49, %51, %cst_13 {dimension_numbers = #tpu.dot_dimension_numbers<[1], [1], [0], [0], [0, 0, 1, 0], [], []>} : vector<17x8xbf16>, vector<17x8xbf16>, vector<17x17xf32> -> vector<17x17xf32>
    %cst_14 = arith.constant 0.353553385 : f32
    %55 = vector.broadcast %cst_14 : f32 to vector<17x17xf32>
    %56 = arith.mulf %54, %55 : vector<17x17xf32>
    %cst_15 = arith.constant dense<0xFF800000> : vector<17xf32>
    %57 = vector.multi_reduction <maximumf>, %56, %cst_15 [1] : vector<17x17xf32> to vector<17xf32>
    %58 = vector.shape_cast %57 : vector<17xf32> to vector<17x1xf32>
    %59 = vector.broadcast %58 : vector<17x1xf32> to vector<17x17xf32>
    %60 = arith.subf %56, %59 : vector<17x17xf32>
    %61 = math.exp %60 : vector<17x17xf32>
    %cst_16 = arith.constant dense<0.000000e+00> : vector<17xf32>
    %62 = vector.multi_reduction <add>, %61, %cst_16 [1] : vector<17x17xf32> to vector<17xf32>
    %63 = vector.shape_cast %62 : vector<17xf32> to vector<17x1xf32>
    %64 = tpu.reciprocal %63 {approx = true} : vector<17x1xf32> -> vector<17x1xf32>
    %65 = vector.broadcast %64 : vector<17x1xf32> to vector<17x17xf32>
    %66 = arith.mulf %61, %65 : vector<17x17xf32>
    %c0_17 = arith.constant 0 : index
    %c0_18 = arith.constant 0 : index
    %c0_19 = arith.constant 0 : index
    %67 = vector.load %arg13[%c0_17, %c0_18, %c0_19] : memref<4x17x17xf32, #tpu.memory_space<vmem>>, vector<1x17x17xf32>
    %68 = vector.shape_cast %67 : vector<1x17x17xf32> to vector<17x17xf32>
    %cst_20 = arith.constant dense<0.000000e+00> : vector<17x17xf32>
    %69 = tpu.matmul %66, %68, %cst_20 {dimension_numbers = #tpu.dot_dimension_numbers<[1], [0], [0], [1], [0, 0, 1, 1], [], []>} : vector<17x17xf32>, vector<17x17xf32>, vector<17x17xf32> -> vector<17x17xf32>
    %c0_21 = arith.constant 0 : index
    %c0_22 = arith.constant 0 : index
    %c0_23 = arith.constant 0 : index
    %70 = vector.load %arg13[%c0_21, %c0_22, %c0_23] : memref<4x17x17xf32, #tpu.memory_space<vmem>>, vector<1x17x17xf32>
    %71 = vector.shape_cast %70 : vector<1x17x17xf32> to vector<17x17xf32>
    %72 = vector.shape_cast %69 : vector<17x17xf32> to vector<1x17x17xf32>
    tpu.vector_store %arg13[%c0_21, %c0_22, %c0_23], %72 {strides = array<i32>} : memref<4x17x17xf32, #tpu.memory_space<vmem>>, vector<1x17x17xf32>,
    %73 = arith.truncf %66 : vector<17x17xf32> to vector<17x17xbf16>
    %cst_24 = arith.constant dense<0.000000e+00> : vector<17x8xf32>
    %74 = tpu.matmul %73, %53, %cst_24 {dimension_numbers = #tpu.dot_dimension_numbers<[1], [0], [0], [1], [0, 0, 1, 1], [], []>} : vector<17x17xbf16>, vector<17x8xbf16>, vector<17x8xf32> -> vector<17x8xf32>
    %75 = vector.extract_strided_slice %47 {offsets = [0, 8], sizes = [17, 8], strides = [1, 1]} : vector<17x96xf32> to vector<17x8xf32>
    %76 = arith.truncf %75 : vector<17x8xf32> to vector<17x8xbf16>
    %77 = vector.extract_strided_slice %47 {offsets = [0, 40], sizes = [17, 8], strides = [1, 1]} : vector<17x96xf32> to vector<17x8xf32>
    %78 = arith.truncf %77 : vector<17x8xf32> to vector<17x8xbf16>
    %79 = vector.extract_strided_slice %47 {offsets = [0, 72], sizes = [17, 8], strides = [1, 1]} : vector<17x96xf32> to vector<17x8xf32>
    %80 = arith.truncf %79 : vector<17x8xf32> to vector<17x8xbf16>
    %cst_25 = arith.constant dense<0.000000e+00> : vector<17x17xf32>
    %81 = tpu.matmul %76, %78, %cst_25 {dimension_numbers = #tpu.dot_dimension_numbers<[1], [1], [0], [0], [0, 0, 1, 0], [], []>} : vector<17x8xbf16>, vector<17x8xbf16>, vector<17x17xf32> -> vector<17x17xf32>
    %cst_26 = arith.constant 0.353553385 : f32
    %82 = vector.broadcast %cst_26 : f32 to vector<17x17xf32>
    %83 = arith.mulf %81, %82 : vector<17x17xf32>
    %cst_27 = arith.constant dense<0xFF800000> : vector<17xf32>
    %84 = vector.multi_reduction <maximumf>, %83, %cst_27 [1] : vector<17x17xf32> to vector<17xf32>
    %85 = vector.shape_cast %84 : vector<17xf32> to vector<17x1xf32>
    %86 = vector.broadcast %85 : vector<17x1xf32> to vector<17x17xf32>
    %87 = arith.subf %83, %86 : vector<17x17xf32>
    %88 = math.exp %87 : vector<17x17xf32>
    %cst_28 = arith.constant dense<0.000000e+00> : vector<17xf32>
    %89 = vector.multi_reduction <add>, %88, %cst_28 [1] : vector<17x17xf32> to vector<17xf32>
    %90 = vector.shape_cast %89 : vector<17xf32> to vector<17x1xf32>
    %91 = tpu.reciprocal %90 {approx = true} : vector<17x1xf32> -> vector<17x1xf32>
    %92 = vector.broadcast %91 : vector<17x1xf32> to vector<17x17xf32>
    %93 = arith.mulf %88, %92 : vector<17x17xf32>
    %c1 = arith.constant 1 : index
    %c0_29 = arith.constant 0 : index
    %c0_30 = arith.constant 0 : index
    %94 = vector.load %arg13[%c1, %c0_29, %c0_30] : memref<4x17x17xf32, #tpu.memory_space<vmem>>, vector<1x17x17xf32>
    %95 = vector.shape_cast %94 : vector<1x17x17xf32> to vector<17x17xf32>
    %cst_31 = arith.constant dense<0.000000e+00> : vector<17x17xf32>
    %96 = tpu.matmul %93, %95, %cst_31 {dimension_numbers = #tpu.dot_dimension_numbers<[1], [0], [0], [1], [0, 0, 1, 1], [], []>} : vector<17x17xf32>, vector<17x17xf32>, vector<17x17xf32> -> vector<17x17xf32>
    %c1_32 = arith.constant 1 : index
    %c0_33 = arith.constant 0 : index
    %c0_34 = arith.constant 0 : index
    %97 = vector.load %arg13[%c1_32, %c0_33, %c0_34] : memref<4x17x17xf32, #tpu.memory_space<vmem>>, vector<1x17x17xf32>
    %98 = vector.shape_cast %97 : vector<1x17x17xf32> to vector<17x17xf32>
    %99 = vector.shape_cast %96 : vector<17x17xf32> to vector<1x17x17xf32>
    tpu.vector_store %arg13[%c1_32, %c0_33, %c0_34], %99 {strides = array<i32>} : memref<4x17x17xf32, #tpu.memory_space<vmem>>, vector<1x17x17xf32>,
    %100 = arith.truncf %93 : vector<17x17xf32> to vector<17x17xbf16>
    %cst_35 = arith.constant dense<0.000000e+00> : vector<17x8xf32>
    %101 = tpu.matmul %100, %80, %cst_35 {dimension_numbers = #tpu.dot_dimension_numbers<[1], [0], [0], [1], [0, 0, 1, 1], [], []>} : vector<17x17xbf16>, vector<17x8xbf16>, vector<17x8xf32> -> vector<17x8xf32>
    %102 = vector.extract_strided_slice %47 {offsets = [0, 16], sizes = [17, 8], strides = [1, 1]} : vector<17x96xf32> to vector<17x8xf32>
    %103 = arith.truncf %102 : vector<17x8xf32> to vector<17x8xbf16>
    %104 = vector.extract_strided_slice %47 {offsets = [0, 48], sizes = [17, 8], strides = [1, 1]} : vector<17x96xf32> to vector<17x8xf32>
    %105 = arith.truncf %104 : vector<17x8xf32> to vector<17x8xbf16>
    %106 = vector.extract_strided_slice %47 {offsets = [0, 80], sizes = [17, 8], strides = [1, 1]} : vector<17x96xf32> to vector<17x8xf32>
    %107 = arith.truncf %106 : vector<17x8xf32> to vector<17x8xbf16>
    %cst_36 = arith.constant dense<0.000000e+00> : vector<17x17xf32>
    %108 = tpu.matmul %103, %105, %cst_36 {dimension_numbers = #tpu.dot_dimension_numbers<[1], [1], [0], [0], [0, 0, 1, 0], [], []>} : vector<17x8xbf16>, vector<17x8xbf16>, vector<17x17xf32> -> vector<17x17xf32>
    %cst_37 = arith.constant 0.353553385 : f32
    %109 = vector.broadcast %cst_37 : f32 to vector<17x17xf32>
    %110 = arith.mulf %108, %109 : vector<17x17xf32>
    %cst_38 = arith.constant dense<0xFF800000> : vector<17xf32>
    %111 = vector.multi_reduction <maximumf>, %110, %cst_38 [1] : vector<17x17xf32> to vector<17xf32>
    %112 = vector.shape_cast %111 : vector<17xf32> to vector<17x1xf32>
    %113 = vector.broadcast %112 : vector<17x1xf32> to vector<17x17xf32>
    %114 = arith.subf %110, %113 : vector<17x17xf32>
    %115 = math.exp %114 : vector<17x17xf32>
    %cst_39 = arith.constant dense<0.000000e+00> : vector<17xf32>
    %116 = vector.multi_reduction <add>, %115, %cst_39 [1] : vector<17x17xf32> to vector<17xf32>
    %117 = vector.shape_cast %116 : vector<17xf32> to vector<17x1xf32>
    %118 = tpu.reciprocal %117 {approx = true} : vector<17x1xf32> -> vector<17x1xf32>
    %119 = vector.broadcast %118 : vector<17x1xf32> to vector<17x17xf32>
    %120 = arith.mulf %115, %119 : vector<17x17xf32>
    %c2 = arith.constant 2 : index
    %c0_40 = arith.constant 0 : index
    %c0_41 = arith.constant 0 : index
    %121 = vector.load %arg13[%c2, %c0_40, %c0_41] : memref<4x17x17xf32, #tpu.memory_space<vmem>>, vector<1x17x17xf32>
    %122 = vector.shape_cast %121 : vector<1x17x17xf32> to vector<17x17xf32>
    %cst_42 = arith.constant dense<0.000000e+00> : vector<17x17xf32>
    %123 = tpu.matmul %120, %122, %cst_42 {dimension_numbers = #tpu.dot_dimension_numbers<[1], [0], [0], [1], [0, 0, 1, 1], [], []>} : vector<17x17xf32>, vector<17x17xf32>, vector<17x17xf32> -> vector<17x17xf32>
    %c2_43 = arith.constant 2 : index
    %c0_44 = arith.constant 0 : index
    %c0_45 = arith.constant 0 : index
    %124 = vector.load %arg13[%c2_43, %c0_44, %c0_45] : memref<4x17x17xf32, #tpu.memory_space<vmem>>, vector<1x17x17xf32>
    %125 = vector.shape_cast %124 : vector<1x17x17xf32> to vector<17x17xf32>
    %126 = vector.shape_cast %123 : vector<17x17xf32> to vector<1x17x17xf32>
    tpu.vector_store %arg13[%c2_43, %c0_44, %c0_45], %126 {strides = array<i32>} : memref<4x17x17xf32, #tpu.memory_space<vmem>>, vector<1x17x17xf32>,
    %127 = arith.truncf %120 : vector<17x17xf32> to vector<17x17xbf16>
    %cst_46 = arith.constant dense<0.000000e+00> : vector<17x8xf32>
    %128 = tpu.matmul %127, %107, %cst_46 {dimension_numbers = #tpu.dot_dimension_numbers<[1], [0], [0], [1], [0, 0, 1, 1], [], []>} : vector<17x17xbf16>, vector<17x8xbf16>, vector<17x8xf32> -> vector<17x8xf32>
    %129 = vector.extract_strided_slice %47 {offsets = [0, 24], sizes = [17, 8], strides = [1, 1]} : vector<17x96xf32> to vector<17x8xf32>
    %130 = arith.truncf %129 : vector<17x8xf32> to vector<17x8xbf16>
    %131 = vector.extract_strided_slice %47 {offsets = [0, 56], sizes = [17, 8], strides = [1, 1]} : vector<17x96xf32> to vector<17x8xf32>
    %132 = arith.truncf %131 : vector<17x8xf32> to vector<17x8xbf16>
    %133 = vector.extract_strided_slice %47 {offsets = [0, 88], sizes = [17, 8], strides = [1, 1]} : vector<17x96xf32> to vector<17x8xf32>
    %134 = arith.truncf %133 : vector<17x8xf32> to vector<17x8xbf16>
    %cst_47 = arith.constant dense<0.000000e+00> : vector<17x17xf32>
    %135 = tpu.matmul %130, %132, %cst_47 {dimension_numbers = #tpu.dot_dimension_numbers<[1], [1], [0], [0], [0, 0, 1, 0], [], []>} : vector<17x8xbf16>, vector<17x8xbf16>, vector<17x17xf32> -> vector<17x17xf32>
    %cst_48 = arith.constant 0.353553385 : f32
    %136 = vector.broadcast %cst_48 : f32 to vector<17x17xf32>
    %137 = arith.mulf %135, %136 : vector<17x17xf32>
    %cst_49 = arith.constant dense<0xFF800000> : vector<17xf32>
    %138 = vector.multi_reduction <maximumf>, %137, %cst_49 [1] : vector<17x17xf32> to vector<17xf32>
    %139 = vector.shape_cast %138 : vector<17xf32> to vector<17x1xf32>
    %140 = vector.broadcast %139 : vector<17x1xf32> to vector<17x17xf32>
    %141 = arith.subf %137, %140 : vector<17x17xf32>
    %142 = math.exp %141 : vector<17x17xf32>
    %cst_50 = arith.constant dense<0.000000e+00> : vector<17xf32>
    %143 = vector.multi_reduction <add>, %142, %cst_50 [1] : vector<17x17xf32> to vector<17xf32>
    %144 = vector.shape_cast %143 : vector<17xf32> to vector<17x1xf32>
    %145 = tpu.reciprocal %144 {approx = true} : vector<17x1xf32> -> vector<17x1xf32>
    %146 = vector.broadcast %145 : vector<17x1xf32> to vector<17x17xf32>
    %147 = arith.mulf %142, %146 : vector<17x17xf32>
    %c3 = arith.constant 3 : index
    %c0_51 = arith.constant 0 : index
    %c0_52 = arith.constant 0 : index
    %148 = vector.load %arg13[%c3, %c0_51, %c0_52] : memref<4x17x17xf32, #tpu.memory_space<vmem>>, vector<1x17x17xf32>
    %149 = vector.shape_cast %148 : vector<1x17x17xf32> to vector<17x17xf32>
    %cst_53 = arith.constant dense<0.000000e+00> : vector<17x17xf32>
    %150 = tpu.matmul %147, %149, %cst_53 {dimension_numbers = #tpu.dot_dimension_numbers<[1], [0], [0], [1], [0, 0, 1, 1], [], []>} : vector<17x17xf32>, vector<17x17xf32>, vector<17x17xf32> -> vector<17x17xf32>
    %c3_54 = arith.constant 3 : index
    %c0_55 = arith.constant 0 : index
    %c0_56 = arith.constant 0 : index
    %151 = vector.load %arg13[%c3_54, %c0_55, %c0_56] : memref<4x17x17xf32, #tpu.memory_space<vmem>>, vector<1x17x17xf32>
    %152 = vector.shape_cast %151 : vector<1x17x17xf32> to vector<17x17xf32>
    %153 = vector.shape_cast %150 : vector<17x17xf32> to vector<1x17x17xf32>
    tpu.vector_store %arg13[%c3_54, %c0_55, %c0_56], %153 {strides = array<i32>} : memref<4x17x17xf32, #tpu.memory_space<vmem>>, vector<1x17x17xf32>,
    %154 = arith.truncf %147 : vector<17x17xf32> to vector<17x17xbf16>
    %cst_57 = arith.constant dense<0.000000e+00> : vector<17x8xf32>
    %155 = tpu.matmul %154, %134, %cst_57 {dimension_numbers = #tpu.dot_dimension_numbers<[1], [0], [0], [1], [0, 0, 1, 1], [], []>} : vector<17x17xbf16>, vector<17x8xbf16>, vector<17x8xf32> -> vector<17x8xf32>
    %156 = tpu.concatenate %74, %101, %128, %155 in 1 : vector<17x8xf32>, vector<17x8xf32>, vector<17x8xf32>, vector<17x8xf32> -> vector<17x32xf32>
    %157 = arith.truncf %156 : vector<17x32xf32> to vector<17x32xbf16>
    %158 = vector.extract_strided_slice %5 {offsets = [0, 96], sizes = [32, 32], strides = [1, 1]} : vector<32x128xbf16> to vector<32x32xbf16>
    %cst_58 = arith.constant dense<0.000000e+00> : vector<17x32xf32>
    %159 = tpu.matmul %157, %158, %cst_58 {dimension_numbers = #tpu.dot_dimension_numbers<[1], [0], [0], [1], [0, 0, 1, 1], [], []>} : vector<17x32xbf16>, vector<32x32xbf16>, vector<17x32xf32> -> vector<17x32xf32>
    %160 = vector.broadcast %16 : vector<1x32xf32> to vector<17x32xf32>
    %161 = arith.addf %159, %160 : vector<17x32xf32>
    %162 = arith.addf %161, %12 : vector<17x32xf32>
    %cst_59 = arith.constant dense<0.000000e+00> : vector<17xf32>
    %163 = vector.multi_reduction <add>, %162, %cst_59 [1] : vector<17x32xf32> to vector<17xf32>
    %164 = vector.shape_cast %163 : vector<17xf32> to vector<17x1xf32>
    %cst_60 = arith.constant 3.200000e+01 : f32
    %165 = vector.broadcast %cst_60 : f32 to vector<17x1xf32>
    %166 = arith.divf %164, %165 : vector<17x1xf32>
    %167 = vector.broadcast %166 : vector<17x1xf32> to vector<17x32xf32>
    %168 = arith.subf %162, %167 : vector<17x32xf32>
    %169 = arith.mulf %168, %168 : vector<17x32xf32>
    %cst_61 = arith.constant dense<0.000000e+00> : vector<17xf32>
    %170 = vector.multi_reduction <add>, %169, %cst_61 [1] : vector<17x32xf32> to vector<17xf32>
    %171 = vector.shape_cast %170 : vector<17xf32> to vector<17x1xf32>
    %cst_62 = arith.constant 3.200000e+01 : f32
    %172 = vector.broadcast %cst_62 : f32 to vector<17x1xf32>
    %173 = arith.divf %171, %172 : vector<17x1xf32>
    %174 = vector.broadcast %166 : vector<17x1xf32> to vector<17x32xf32>
    %175 = arith.subf %162, %174 : vector<17x32xf32>
    %cst_63 = arith.constant 9.99999997E-7 : f32
    %176 = vector.broadcast %cst_63 : f32 to vector<17x1xf32>
    %177 = arith.addf %173, %176 : vector<17x1xf32>
    %178 = math.rsqrt %177 : vector<17x1xf32>
    %179 = vector.broadcast %178 : vector<17x1xf32> to vector<17x32xf32>
    %180 = arith.mulf %175, %179 : vector<17x32xf32>
    %181 = vector.broadcast %17 : vector<1x32xf32> to vector<17x32xf32>
    %182 = arith.mulf %180, %181 : vector<17x32xf32>
    %183 = vector.broadcast %18 : vector<1x32xf32> to vector<17x32xf32>
    %184 = arith.addf %182, %183 : vector<17x32xf32>
    %185 = arith.truncf %184 : vector<17x32xf32> to vector<17x32xbf16>
    %186 = vector.extract_strided_slice %8 {offsets = [0, 0], sizes = [32, 64], strides = [1, 1]} : vector<96x128xbf16> to vector<32x64xbf16>
    %cst_64 = arith.constant dense<0.000000e+00> : vector<17x64xf32>
    %187 = tpu.matmul %185, %186, %cst_64 {dimension_numbers = #tpu.dot_dimension_numbers<[1], [0], [0], [1], [0, 0, 1, 1], [], []>} : vector<17x32xbf16>, vector<32x64xbf16>, vector<17x64xf32> -> vector<17x64xf32>
    %188 = vector.broadcast %19 : vector<1x64xf32> to vector<17x64xf32>
    %189 = arith.addf %187, %188 : vector<17x64xf32>
    %cst_65 = arith.constant 5.000000e-01 : f32
    %190 = vector.broadcast %cst_65 : f32 to vector<17x64xf32>
    %191 = arith.mulf %190, %189 : vector<17x64xf32>
    %cst_66 = arith.constant 0.707106769 : f32
    %192 = vector.broadcast %cst_66 : f32 to vector<17x64xf32>
    %193 = arith.mulf %189, %192 : vector<17x64xf32>
    %cst_67 = arith.constant 0.000000e+00 : f32
    %194 = vector.broadcast %cst_67 : f32 to vector<17x64xf32>
    %195 = arith.cmpf oge, %193, %194 : vector<17x64xf32>
    %cst_68 = arith.constant 1.000000e+00 : f32
    %cst_69 = arith.constant -1.000000e+00 : f32
    %196 = vector.broadcast %cst_68 : f32 to vector<17x64xf32>
    %197 = vector.broadcast %cst_69 : f32 to vector<17x64xf32>
    %198 = arith.select %195, %196, %197 : vector<17x64xi1>, vector<17x64xf32>
    %199 = math.absf %193 : vector<17x64xf32>
    %cst_70 = arith.constant 0.327591091 : f32
    %200 = vector.broadcast %cst_70 : f32 to vector<17x64xf32>
    %201 = arith.mulf %200, %199 : vector<17x64xf32>
    %cst_71 = arith.constant 1.000000e+00 : f32
    %202 = vector.broadcast %cst_71 : f32 to vector<17x64xf32>
    %203 = arith.addf %202, %201 : vector<17x64xf32>
    %cst_72 = arith.constant 1.000000e+00 : f32
    %204 = vector.broadcast %cst_72 : f32 to vector<17x64xf32>
    %205 = arith.divf %204, %203 : vector<17x64xf32>
    %cst_73 = arith.constant 1.06140542 : f32
    %206 = vector.broadcast %cst_73 : f32 to vector<17x64xf32>
    %207 = arith.mulf %206, %205 : vector<17x64xf32>
    %cst_74 = arith.constant -1.45315206 : f32
    %208 = vector.broadcast %cst_74 : f32 to vector<17x64xf32>
    %209 = arith.addf %207, %208 : vector<17x64xf32>
    %210 = arith.mulf %209, %205 : vector<17x64xf32>
    %cst_75 = arith.constant 1.42141378 : f32
    %211 = vector.broadcast %cst_75 : f32 to vector<17x64xf32>
    %212 = arith.addf %210, %211 : vector<17x64xf32>
    %213 = arith.mulf %212, %205 : vector<17x64xf32>
    %cst_76 = arith.constant -0.284496725 : f32
    %214 = vector.broadcast %cst_76 : f32 to vector<17x64xf32>
    %215 = arith.addf %213, %214 : vector<17x64xf32>
    %216 = arith.mulf %215, %205 : vector<17x64xf32>
    %cst_77 = arith.constant 0.254829586 : f32
    %217 = vector.broadcast %cst_77 : f32 to vector<17x64xf32>
    %218 = arith.addf %216, %217 : vector<17x64xf32>
    %219 = arith.mulf %218, %205 : vector<17x64xf32>
    %cst_78 = arith.constant 0.000000e+00 : f32
    %220 = vector.broadcast %cst_78 : f32 to vector<17x64xf32>
    %221 = arith.subf %220, %199 : vector<17x64xf32>
    %222 = arith.mulf %221, %199 : vector<17x64xf32>
    %223 = math.exp %222 : vector<17x64xf32>
    %224 = arith.mulf %219, %223 : vector<17x64xf32>
    %cst_79 = arith.constant 1.000000e+00 : f32
    %225 = vector.broadcast %cst_79 : f32 to vector<17x64xf32>
    %226 = arith.subf %225, %224 : vector<17x64xf32>
    %227 = arith.mulf %198, %226 : vector<17x64xf32>
    %cst_80 = arith.constant 1.000000e+00 : f32
    %228 = vector.broadcast %cst_80 : f32 to vector<17x64xf32>
    %229 = arith.addf %228, %227 : vector<17x64xf32>
    %230 = arith.mulf %191, %229 : vector<17x64xf32>
    %231 = arith.truncf %230 : vector<17x64xf32> to vector<17x64xbf16>
    %232 = vector.extract_strided_slice %8 {offsets = [32, 0], sizes = [64, 32], strides = [1, 1]} : vector<96x128xbf16> to vector<64x32xbf16>
    %cst_81 = arith.constant dense<0.000000e+00> : vector<17x32xf32>
    %233 = tpu.matmul %231, %232, %cst_81 {dimension_numbers = #tpu.dot_dimension_numbers<[1], [0], [0], [1], [0, 0, 1, 1], [], []>} : vector<17x64xbf16>, vector<64x32xbf16>, vector<17x32xf32> -> vector<17x32xf32>
    %234 = vector.broadcast %20 : vector<1x32xf32> to vector<17x32xf32>
    %235 = arith.addf %233, %234 : vector<17x32xf32>
    %236 = arith.addf %162, %235 : vector<17x32xf32>
    %c0_82 = arith.constant 0 : index
    %c0_83 = arith.constant 0 : index
    %237 = vector.load %arg12[%c0_82, %c0_83] : memref<17x32xf32, #tpu.memory_space<vmem>>, vector<17x32xf32>
    tpu.vector_store %arg12[%c0_82, %c0_83], %236 {strides = array<i32>} : memref<17x32xf32, #tpu.memory_space<vmem>>, vector<17x32xf32>,
    %c9_i32 = arith.constant 9 : i32
    %238 = arith.cmpi eq, %arg1, %c9_i32 : i32
    %239 = arith.extui %238 : i1 to i32
    %c0_i32_84 = arith.constant 0 : i32
    %240 = arith.cmpi ne, %239, %c0_i32_84 : i32
    scf.if %240 {
      %c0_85 = arith.constant 0 : index
      %c0_86 = arith.constant 0 : index
      %241 = vector.load %arg12[%c0_85, %c0_86] : memref<17x32xf32, #tpu.memory_space<vmem>>, vector<17x32xf32>
      %c0_87 = arith.constant 0 : index
      %c0_88 = arith.constant 0 : index
      %c0_89 = arith.constant 0 : index
      %242 = vector.load %arg10[%c0_87, %c0_88, %c0_89] : memref<1x17x32xf32, #tpu.memory_space<vmem>>, vector<1x17x32xf32>
      %243 = vector.shape_cast %242 : vector<1x17x32xf32> to vector<17x32xf32>
      %244 = vector.shape_cast %241 : vector<17x32xf32> to vector<1x17x32xf32>
      tpu.vector_store %arg10[%c0_87, %c0_88, %c0_89], %244 {strides = array<i32>} : memref<1x17x32xf32, #tpu.memory_space<vmem>>, vector<1x17x32xf32>,
      %c0_90 = arith.constant 0 : index
      %c0_91 = arith.constant 0 : index
      %c0_92 = arith.constant 0 : index
      %245 = vector.load %arg13[%c0_90, %c0_91, %c0_92] : memref<4x17x17xf32, #tpu.memory_space<vmem>>, vector<1x1x17xf32>
      %246 = vector.shape_cast %245 : vector<1x1x17xf32> to vector<1x17xf32>
      %c0_93 = arith.constant 0 : index
      %c0_94 = arith.constant 0 : index
      %c0_95 = arith.constant 0 : index
      %c0_96 = arith.constant 0 : index
      %247 = vector.load %arg11[%c0_93, %c0_94, %c0_95, %c0_96] : memref<1x4x1x17xf32, #tpu.memory_space<vmem>>, vector<1x1x1x17xf32>
      %248 = vector.shape_cast %247 : vector<1x1x1x17xf32> to vector<1x17xf32>
      %249 = vector.shape_cast %246 : vector<1x17xf32> to vector<1x1x1x17xf32>
      tpu.vector_store %arg11[%c0_93, %c0_94, %c0_95, %c0_96], %249 {strides = array<i32>} : memref<1x4x1x17xf32, #tpu.memory_space<vmem>>, vector<1x1x1x17xf32>,
      %c1_97 = arith.constant 1 : index
      %c0_98 = arith.constant 0 : index
      %c0_99 = arith.constant 0 : index
      %250 = vector.load %arg13[%c1_97, %c0_98, %c0_99] : memref<4x17x17xf32, #tpu.memory_space<vmem>>, vector<1x1x17xf32>
      %251 = vector.shape_cast %250 : vector<1x1x17xf32> to vector<1x17xf32>
      %c0_100 = arith.constant 0 : index
      %c1_101 = arith.constant 1 : index
      %c0_102 = arith.constant 0 : index
      %c0_103 = arith.constant 0 : index
      %252 = vector.load %arg11[%c0_100, %c1_101, %c0_102, %c0_103] : memref<1x4x1x17xf32, #tpu.memory_space<vmem>>, vector<1x1x1x17xf32>
      %253 = vector.shape_cast %252 : vector<1x1x1x17xf32> to vector<1x17xf32>
      %254 = vector.shape_cast %251 : vector<1x17xf32> to vector<1x1x1x17xf32>
      tpu.vector_store %arg11[%c0_100, %c1_101, %c0_102, %c0_103], %254 {strides = array<i32>} : memref<1x4x1x17xf32, #tpu.memory_space<vmem>>, vector<1x1x1x17xf32>,
      %c2_104 = arith.constant 2 : index
      %c0_105 = arith.constant 0 : index
      %c0_106 = arith.constant 0 : index
      %255 = vector.load %arg13[%c2_104, %c0_105, %c0_106] : memref<4x17x17xf32, #tpu.memory_space<vmem>>, vector<1x1x17xf32>
      %256 = vector.shape_cast %255 : vector<1x1x17xf32> to vector<1x17xf32>
      %c0_107 = arith.constant 0 : index
      %c2_108 = arith.constant 2 : index
      %c0_109 = arith.constant 0 : index
      %c0_110 = arith.constant 0 : index
      %257 = vector.load %arg11[%c0_107, %c2_108, %c0_109, %c0_110] : memref<1x4x1x17xf32, #tpu.memory_space<vmem>>, vector<1x1x1x17xf32>
      %258 = vector.shape_cast %257 : vector<1x1x1x17xf32> to vector<1x17xf32>
      %259 = vector.shape_cast %256 : vector<1x17xf32> to vector<1x1x1x17xf32>
      tpu.vector_store %arg11[%c0_107, %c2_108, %c0_109, %c0_110], %259 {strides = array<i32>} : memref<1x4x1x17xf32, #tpu.memory_space<vmem>>, vector<1x1x1x17xf32>,
      %c3_111 = arith.constant 3 : index
      %c0_112 = arith.constant 0 : index
      %c0_113 = arith.constant 0 : index
      %260 = vector.load %arg13[%c3_111, %c0_112, %c0_113] : memref<4x17x17xf32, #tpu.memory_space<vmem>>, vector<1x1x17xf32>
      %261 = vector.shape_cast %260 : vector<1x1x17xf32> to vector<1x17xf32>
      %c0_114 = arith.constant 0 : index
      %c3_115 = arith.constant 3 : index
      %c0_116 = arith.constant 0 : index
      %c0_117 = arith.constant 0 : index
      %262 = vector.load %arg11[%c0_114, %c3_115, %c0_116, %c0_117] : memref<1x4x1x17xf32, #tpu.memory_space<vmem>>, vector<1x1x1x17xf32>
      %263 = vector.shape_cast %262 : vector<1x1x1x17xf32> to vector<1x17xf32>
      %264 = vector.shape_cast %261 : vector<1x17xf32> to vector<1x1x1x17xf32>
      tpu.vector_store %arg11[%c0_114, %c3_115, %c0_116, %c0_117], %264 {strides = array<i32>} : memref<1x4x1x17xf32, #tpu.memory_space<vmem>>, vector<1x1x1x17xf32>,
    } else {
    }
    return
  }
  func.func @transform_0(%arg0: i32, %arg1: i32) -> (i32, i32, i32) {
    %c0_i32 = arith.constant 0 : i32
    %c0_i32_0 = arith.constant 0 : i32
    %c0_i32_1 = arith.constant 0 : i32
    return %arg0, %c0_i32, %c0_i32_0 : i32, i32, i32
  }
  func.func @transform_1(%arg0: i32, %arg1: i32) -> (i32, i32) {
    %c0_i32 = arith.constant 0 : i32
    %c0_i32_0 = arith.constant 0 : i32
    %c0_i32_1 = arith.constant 0 : i32
    return %c0_i32, %c0_i32_0 : i32, i32
  }
  func.func @transform_2(%arg0: i32, %arg1: i32) -> (i32, i32) {
    %c0_i32 = arith.constant 0 : i32
    %c0_i32_0 = arith.constant 0 : i32
    %c0_i32_1 = arith.constant 0 : i32
    return %c0_i32, %c0_i32_0 : i32, i32
  }
  func.func @transform_3(%arg0: i32, %arg1: i32) -> (i32, i32, i32) {
    %c0_i32 = arith.constant 0 : i32
    %c0_i32_0 = arith.constant 0 : i32
    %c0_i32_1 = arith.constant 0 : i32
    %c0_i32_2 = arith.constant 0 : i32
    return %c0_i32, %c0_i32_0, %c0_i32_1 : i32, i32, i32
  }
  func.func @transform_4(%arg0: i32, %arg1: i32) -> (i32, i32, i32) {
    %c0_i32 = arith.constant 0 : i32
    %c0_i32_0 = arith.constant 0 : i32
    %c0_i32_1 = arith.constant 0 : i32
    %c0_i32_2 = arith.constant 0 : i32
    return %c0_i32, %c0_i32_0, %c0_i32_1 : i32, i32, i32
  }
  func.func @transform_5(%arg0: i32, %arg1: i32) -> (i32, i32, i32) {
    %c0_i32 = arith.constant 0 : i32
    %c0_i32_0 = arith.constant 0 : i32
    %c0_i32_1 = arith.constant 0 : i32
    %c0_i32_2 = arith.constant 0 : i32
    return %c0_i32, %c0_i32_0, %c0_i32_1 : i32, i32, i32
  }
  func.func @transform_6(%arg0: i32, %arg1: i32) -> (i32, i32, i32) {
    %c0_i32 = arith.constant 0 : i32
    %c0_i32_0 = arith.constant 0 : i32
    %c0_i32_1 = arith.constant 0 : i32
    %c0_i32_2 = arith.constant 0 : i32
    return %c0_i32, %c0_i32_0, %c0_i32_1 : i32, i32, i32
  }
  func.func @transform_7(%arg0: i32, %arg1: i32) -> (i32, i32, i32) {
    %c0_i32 = arith.constant 0 : i32
    %c0_i32_0 = arith.constant 0 : i32
    %c0_i32_1 = arith.constant 0 : i32
    %c0_i32_2 = arith.constant 0 : i32
    return %c0_i32, %c0_i32_0, %c0_i32_1 : i32, i32, i32
  }
  func.func @transform_8(%arg0: i32, %arg1: i32) -> (i32, i32, i32) {
    %c0_i32 = arith.constant 0 : i32
    %c0_i32_0 = arith.constant 0 : i32
    %c0_i32_1 = arith.constant 0 : i32
    return %arg0, %c0_i32, %c0_i32_0 : i32, i32, i32
  }
  func.func @transform_9(%arg0: i32, %arg1: i32) -> (i32, i32, i32, i32) {
    %c0_i32 = arith.constant 0 : i32
    %c0_i32_0 = arith.constant 0 : i32
    %c0_i32_1 = arith.constant 0 : i32
    %c0_i32_2 = arith.constant 0 : i32
    return %arg0, %c0_i32, %c0_i32_0, %c0_i32_1 : i32, i32, i32, i32
  }
}

module attributes {stable_mosaic.version = 11 : i64} {
  func.func @kernel(%arg0: i32, %arg1: memref<1x17x32xf32, #tpu.memory_space<vmem>>, %arg2: memref<32x128xbf16, #tpu.memory_space<vmem>>, %arg3: memref<96x128xbf16, #tpu.memory_space<vmem>>, %arg4: memref<8x128xf32, #tpu.memory_space<vmem>>, %arg5: memref<1x17x32xf32, #tpu.memory_space<vmem>>, %arg6: memref<1x4x17x17xf32, #tpu.memory_space<vmem>>) attributes {dimension_semantics = [#tpu.dimension_semantics<parallel>], iteration_bounds = array<i64: 2>, scalar_prefetch = 0 : i64, scratch_operands = 0 : i64, tpu.core_type = #tpu.core_type<tc>, window_params = [{transform_indices = @transform_0, window_bounds = array<i64: 1, 17, 32>}, {pipeline_mode = #tpu.pipeline_mode<synchronous>, transform_indices = @transform_1, window_bounds = array<i64: 32, 128>}, {pipeline_mode = #tpu.pipeline_mode<synchronous>, transform_indices = @transform_2, window_bounds = array<i64: 96, 128>}, {pipeline_mode = #tpu.pipeline_mode<synchronous>, transform_indices = @transform_3, window_bounds = array<i64: 8, 128>}, {transform_indices = @transform_4, window_bounds = array<i64: 1, 17, 32>}, {transform_indices = @transform_5, window_bounds = array<i64: 1, 4, 17, 17>}]} {
    %c0 = arith.constant 0 : index
    %c0_0 = arith.constant 0 : index
    %c0_1 = arith.constant 0 : index
    %0 = vector.load %arg1[%c0, %c0_0, %c0_1] : memref<1x17x32xf32, #tpu.memory_space<vmem>>, vector<1x17x32xf32>
    %1 = vector.shape_cast %0 : vector<1x17x32xf32> to vector<17x32xf32>
    %c0_2 = arith.constant 0 : index
    %c0_3 = arith.constant 0 : index
    %2 = vector.load %arg2[%c0_2, %c0_3] : memref<32x128xbf16, #tpu.memory_space<vmem>>, vector<32x128xbf16>
    %c0_4 = arith.constant 0 : index
    %c0_5 = arith.constant 0 : index
    %3 = vector.load %arg3[%c0_4, %c0_5] : memref<96x128xbf16, #tpu.memory_space<vmem>>, vector<96x128xbf16>
    %c0_6 = arith.constant 0 : index
    %c0_7 = arith.constant 0 : index
    %4 = vector.load %arg4[%c0_6, %c0_7] : memref<8x128xf32, #tpu.memory_space<vmem>>, vector<8x128xf32>
    %5 = vector.extract_strided_slice %4 {offsets = [0, 0], sizes = [1, 32], strides = [1, 1]} : vector<8x128xf32> to vector<1x32xf32>
    %6 = vector.extract_strided_slice %4 {offsets = [1, 0], sizes = [1, 32], strides = [1, 1]} : vector<8x128xf32> to vector<1x32xf32>
    %7 = vector.extract_strided_slice %4 {offsets = [2, 0], sizes = [1, 96], strides = [1, 1]} : vector<8x128xf32> to vector<1x96xf32>
    %8 = vector.extract_strided_slice %4 {offsets = [3, 0], sizes = [1, 32], strides = [1, 1]} : vector<8x128xf32> to vector<1x32xf32>
    %9 = vector.extract_strided_slice %4 {offsets = [4, 0], sizes = [1, 32], strides = [1, 1]} : vector<8x128xf32> to vector<1x32xf32>
    %10 = vector.extract_strided_slice %4 {offsets = [5, 0], sizes = [1, 32], strides = [1, 1]} : vector<8x128xf32> to vector<1x32xf32>
    %11 = vector.extract_strided_slice %4 {offsets = [6, 0], sizes = [1, 64], strides = [1, 1]} : vector<8x128xf32> to vector<1x64xf32>
    %12 = vector.extract_strided_slice %4 {offsets = [7, 0], sizes = [1, 32], strides = [1, 1]} : vector<8x128xf32> to vector<1x32xf32>
    %cst = arith.constant dense<0.000000e+00> : vector<17xf32>
    %13 = vector.multi_reduction <add>, %1, %cst [1] : vector<17x32xf32> to vector<17xf32>
    %14 = vector.shape_cast %13 : vector<17xf32> to vector<17x1xf32>
    %cst_8 = arith.constant 3.200000e+01 : f32
    %15 = vector.broadcast %cst_8 : f32 to vector<17x1xf32>
    %16 = arith.divf %14, %15 : vector<17x1xf32>
    %17 = vector.broadcast %16 : vector<17x1xf32> to vector<17x32xf32>
    %18 = arith.subf %1, %17 : vector<17x32xf32>
    %19 = arith.mulf %18, %18 : vector<17x32xf32>
    %cst_9 = arith.constant dense<0.000000e+00> : vector<17xf32>
    %20 = vector.multi_reduction <add>, %19, %cst_9 [1] : vector<17x32xf32> to vector<17xf32>
    %21 = vector.shape_cast %20 : vector<17xf32> to vector<17x1xf32>
    %cst_10 = arith.constant 3.200000e+01 : f32
    %22 = vector.broadcast %cst_10 : f32 to vector<17x1xf32>
    %23 = arith.divf %21, %22 : vector<17x1xf32>
    %24 = vector.broadcast %16 : vector<17x1xf32> to vector<17x32xf32>
    %25 = arith.subf %1, %24 : vector<17x32xf32>
    %cst_11 = arith.constant 9.99999997E-7 : f32
    %26 = vector.broadcast %cst_11 : f32 to vector<17x1xf32>
    %27 = arith.addf %23, %26 : vector<17x1xf32>
    %28 = math.rsqrt %27 : vector<17x1xf32>
    %29 = vector.broadcast %28 : vector<17x1xf32> to vector<17x32xf32>
    %30 = arith.mulf %25, %29 : vector<17x32xf32>
    %31 = vector.broadcast %5 : vector<1x32xf32> to vector<17x32xf32>
    %32 = arith.mulf %30, %31 : vector<17x32xf32>
    %33 = vector.broadcast %6 : vector<1x32xf32> to vector<17x32xf32>
    %34 = arith.addf %32, %33 : vector<17x32xf32>
    %35 = arith.truncf %34 : vector<17x32xf32> to vector<17x32xbf16>
    %36 = vector.extract_strided_slice %2 {offsets = [0, 0], sizes = [32, 96], strides = [1, 1]} : vector<32x128xbf16> to vector<32x96xbf16>
    %cst_12 = arith.constant dense<0.000000e+00> : vector<17x96xf32>
    %37 = tpu.matmul %35, %36, %cst_12 {dimension_numbers = #tpu.dot_dimension_numbers<[1], [0], [0], [1], [0, 0, 1, 1], [], []>} : vector<17x32xbf16>, vector<32x96xbf16>, vector<17x96xf32> -> vector<17x96xf32>
    %38 = vector.broadcast %7 : vector<1x96xf32> to vector<17x96xf32>
    %39 = arith.addf %37, %38 : vector<17x96xf32>
    %40 = vector.extract_strided_slice %39 {offsets = [0, 0], sizes = [17, 8], strides = [1, 1]} : vector<17x96xf32> to vector<17x8xf32>
    %41 = arith.truncf %40 : vector<17x8xf32> to vector<17x8xbf16>
    %42 = vector.extract_strided_slice %39 {offsets = [0, 32], sizes = [17, 8], strides = [1, 1]} : vector<17x96xf32> to vector<17x8xf32>
    %43 = arith.truncf %42 : vector<17x8xf32> to vector<17x8xbf16>
    %44 = vector.extract_strided_slice %39 {offsets = [0, 64], sizes = [17, 8], strides = [1, 1]} : vector<17x96xf32> to vector<17x8xf32>
    %45 = arith.truncf %44 : vector<17x8xf32> to vector<17x8xbf16>
    %cst_13 = arith.constant dense<0.000000e+00> : vector<17x17xf32>
    %46 = tpu.matmul %41, %43, %cst_13 {dimension_numbers = #tpu.dot_dimension_numbers<[1], [1], [0], [0], [0, 0, 1, 0], [], []>} : vector<17x8xbf16>, vector<17x8xbf16>, vector<17x17xf32> -> vector<17x17xf32>
    %cst_14 = arith.constant 0.353553385 : f32
    %47 = vector.broadcast %cst_14 : f32 to vector<17x17xf32>
    %48 = arith.mulf %46, %47 : vector<17x17xf32>
    %cst_15 = arith.constant dense<0xFF800000> : vector<17xf32>
    %49 = vector.multi_reduction <maximumf>, %48, %cst_15 [1] : vector<17x17xf32> to vector<17xf32>
    %50 = vector.shape_cast %49 : vector<17xf32> to vector<17x1xf32>
    %51 = vector.broadcast %50 : vector<17x1xf32> to vector<17x17xf32>
    %52 = arith.subf %48, %51 : vector<17x17xf32>
    %53 = math.exp %52 : vector<17x17xf32>
    %cst_16 = arith.constant dense<0.000000e+00> : vector<17xf32>
    %54 = vector.multi_reduction <add>, %53, %cst_16 [1] : vector<17x17xf32> to vector<17xf32>
    %55 = vector.shape_cast %54 : vector<17xf32> to vector<17x1xf32>
    %56 = tpu.reciprocal %55 {approx = true} : vector<17x1xf32> -> vector<17x1xf32>
    %57 = vector.broadcast %56 : vector<17x1xf32> to vector<17x17xf32>
    %58 = arith.mulf %53, %57 : vector<17x17xf32>
    %c0_17 = arith.constant 0 : index
    %c0_18 = arith.constant 0 : index
    %c0_19 = arith.constant 0 : index
    %c0_20 = arith.constant 0 : index
    %59 = vector.load %arg6[%c0_17, %c0_18, %c0_19, %c0_20] : memref<1x4x17x17xf32, #tpu.memory_space<vmem>>, vector<1x1x17x17xf32>
    %60 = vector.shape_cast %59 : vector<1x1x17x17xf32> to vector<17x17xf32>
    %61 = vector.shape_cast %58 : vector<17x17xf32> to vector<1x1x17x17xf32>
    tpu.vector_store %arg6[%c0_17, %c0_18, %c0_19, %c0_20], %61 {strides = array<i32>} : memref<1x4x17x17xf32, #tpu.memory_space<vmem>>, vector<1x1x17x17xf32>,
    %62 = arith.truncf %58 : vector<17x17xf32> to vector<17x17xbf16>
    %cst_21 = arith.constant dense<0.000000e+00> : vector<17x8xf32>
    %63 = tpu.matmul %62, %45, %cst_21 {dimension_numbers = #tpu.dot_dimension_numbers<[1], [0], [0], [1], [0, 0, 1, 1], [], []>} : vector<17x17xbf16>, vector<17x8xbf16>, vector<17x8xf32> -> vector<17x8xf32>
    %64 = vector.extract_strided_slice %39 {offsets = [0, 8], sizes = [17, 8], strides = [1, 1]} : vector<17x96xf32> to vector<17x8xf32>
    %65 = arith.truncf %64 : vector<17x8xf32> to vector<17x8xbf16>
    %66 = vector.extract_strided_slice %39 {offsets = [0, 40], sizes = [17, 8], strides = [1, 1]} : vector<17x96xf32> to vector<17x8xf32>
    %67 = arith.truncf %66 : vector<17x8xf32> to vector<17x8xbf16>
    %68 = vector.extract_strided_slice %39 {offsets = [0, 72], sizes = [17, 8], strides = [1, 1]} : vector<17x96xf32> to vector<17x8xf32>
    %69 = arith.truncf %68 : vector<17x8xf32> to vector<17x8xbf16>
    %cst_22 = arith.constant dense<0.000000e+00> : vector<17x17xf32>
    %70 = tpu.matmul %65, %67, %cst_22 {dimension_numbers = #tpu.dot_dimension_numbers<[1], [1], [0], [0], [0, 0, 1, 0], [], []>} : vector<17x8xbf16>, vector<17x8xbf16>, vector<17x17xf32> -> vector<17x17xf32>
    %cst_23 = arith.constant 0.353553385 : f32
    %71 = vector.broadcast %cst_23 : f32 to vector<17x17xf32>
    %72 = arith.mulf %70, %71 : vector<17x17xf32>
    %cst_24 = arith.constant dense<0xFF800000> : vector<17xf32>
    %73 = vector.multi_reduction <maximumf>, %72, %cst_24 [1] : vector<17x17xf32> to vector<17xf32>
    %74 = vector.shape_cast %73 : vector<17xf32> to vector<17x1xf32>
    %75 = vector.broadcast %74 : vector<17x1xf32> to vector<17x17xf32>
    %76 = arith.subf %72, %75 : vector<17x17xf32>
    %77 = math.exp %76 : vector<17x17xf32>
    %cst_25 = arith.constant dense<0.000000e+00> : vector<17xf32>
    %78 = vector.multi_reduction <add>, %77, %cst_25 [1] : vector<17x17xf32> to vector<17xf32>
    %79 = vector.shape_cast %78 : vector<17xf32> to vector<17x1xf32>
    %80 = tpu.reciprocal %79 {approx = true} : vector<17x1xf32> -> vector<17x1xf32>
    %81 = vector.broadcast %80 : vector<17x1xf32> to vector<17x17xf32>
    %82 = arith.mulf %77, %81 : vector<17x17xf32>
    %c0_26 = arith.constant 0 : index
    %c1 = arith.constant 1 : index
    %c0_27 = arith.constant 0 : index
    %c0_28 = arith.constant 0 : index
    %83 = vector.load %arg6[%c0_26, %c1, %c0_27, %c0_28] : memref<1x4x17x17xf32, #tpu.memory_space<vmem>>, vector<1x1x17x17xf32>
    %84 = vector.shape_cast %83 : vector<1x1x17x17xf32> to vector<17x17xf32>
    %85 = vector.shape_cast %82 : vector<17x17xf32> to vector<1x1x17x17xf32>
    tpu.vector_store %arg6[%c0_26, %c1, %c0_27, %c0_28], %85 {strides = array<i32>} : memref<1x4x17x17xf32, #tpu.memory_space<vmem>>, vector<1x1x17x17xf32>,
    %86 = arith.truncf %82 : vector<17x17xf32> to vector<17x17xbf16>
    %cst_29 = arith.constant dense<0.000000e+00> : vector<17x8xf32>
    %87 = tpu.matmul %86, %69, %cst_29 {dimension_numbers = #tpu.dot_dimension_numbers<[1], [0], [0], [1], [0, 0, 1, 1], [], []>} : vector<17x17xbf16>, vector<17x8xbf16>, vector<17x8xf32> -> vector<17x8xf32>
    %88 = vector.extract_strided_slice %39 {offsets = [0, 16], sizes = [17, 8], strides = [1, 1]} : vector<17x96xf32> to vector<17x8xf32>
    %89 = arith.truncf %88 : vector<17x8xf32> to vector<17x8xbf16>
    %90 = vector.extract_strided_slice %39 {offsets = [0, 48], sizes = [17, 8], strides = [1, 1]} : vector<17x96xf32> to vector<17x8xf32>
    %91 = arith.truncf %90 : vector<17x8xf32> to vector<17x8xbf16>
    %92 = vector.extract_strided_slice %39 {offsets = [0, 80], sizes = [17, 8], strides = [1, 1]} : vector<17x96xf32> to vector<17x8xf32>
    %93 = arith.truncf %92 : vector<17x8xf32> to vector<17x8xbf16>
    %cst_30 = arith.constant dense<0.000000e+00> : vector<17x17xf32>
    %94 = tpu.matmul %89, %91, %cst_30 {dimension_numbers = #tpu.dot_dimension_numbers<[1], [1], [0], [0], [0, 0, 1, 0], [], []>} : vector<17x8xbf16>, vector<17x8xbf16>, vector<17x17xf32> -> vector<17x17xf32>
    %cst_31 = arith.constant 0.353553385 : f32
    %95 = vector.broadcast %cst_31 : f32 to vector<17x17xf32>
    %96 = arith.mulf %94, %95 : vector<17x17xf32>
    %cst_32 = arith.constant dense<0xFF800000> : vector<17xf32>
    %97 = vector.multi_reduction <maximumf>, %96, %cst_32 [1] : vector<17x17xf32> to vector<17xf32>
    %98 = vector.shape_cast %97 : vector<17xf32> to vector<17x1xf32>
    %99 = vector.broadcast %98 : vector<17x1xf32> to vector<17x17xf32>
    %100 = arith.subf %96, %99 : vector<17x17xf32>
    %101 = math.exp %100 : vector<17x17xf32>
    %cst_33 = arith.constant dense<0.000000e+00> : vector<17xf32>
    %102 = vector.multi_reduction <add>, %101, %cst_33 [1] : vector<17x17xf32> to vector<17xf32>
    %103 = vector.shape_cast %102 : vector<17xf32> to vector<17x1xf32>
    %104 = tpu.reciprocal %103 {approx = true} : vector<17x1xf32> -> vector<17x1xf32>
    %105 = vector.broadcast %104 : vector<17x1xf32> to vector<17x17xf32>
    %106 = arith.mulf %101, %105 : vector<17x17xf32>
    %c0_34 = arith.constant 0 : index
    %c2 = arith.constant 2 : index
    %c0_35 = arith.constant 0 : index
    %c0_36 = arith.constant 0 : index
    %107 = vector.load %arg6[%c0_34, %c2, %c0_35, %c0_36] : memref<1x4x17x17xf32, #tpu.memory_space<vmem>>, vector<1x1x17x17xf32>
    %108 = vector.shape_cast %107 : vector<1x1x17x17xf32> to vector<17x17xf32>
    %109 = vector.shape_cast %106 : vector<17x17xf32> to vector<1x1x17x17xf32>
    tpu.vector_store %arg6[%c0_34, %c2, %c0_35, %c0_36], %109 {strides = array<i32>} : memref<1x4x17x17xf32, #tpu.memory_space<vmem>>, vector<1x1x17x17xf32>,
    %110 = arith.truncf %106 : vector<17x17xf32> to vector<17x17xbf16>
    %cst_37 = arith.constant dense<0.000000e+00> : vector<17x8xf32>
    %111 = tpu.matmul %110, %93, %cst_37 {dimension_numbers = #tpu.dot_dimension_numbers<[1], [0], [0], [1], [0, 0, 1, 1], [], []>} : vector<17x17xbf16>, vector<17x8xbf16>, vector<17x8xf32> -> vector<17x8xf32>
    %112 = vector.extract_strided_slice %39 {offsets = [0, 24], sizes = [17, 8], strides = [1, 1]} : vector<17x96xf32> to vector<17x8xf32>
    %113 = arith.truncf %112 : vector<17x8xf32> to vector<17x8xbf16>
    %114 = vector.extract_strided_slice %39 {offsets = [0, 56], sizes = [17, 8], strides = [1, 1]} : vector<17x96xf32> to vector<17x8xf32>
    %115 = arith.truncf %114 : vector<17x8xf32> to vector<17x8xbf16>
    %116 = vector.extract_strided_slice %39 {offsets = [0, 88], sizes = [17, 8], strides = [1, 1]} : vector<17x96xf32> to vector<17x8xf32>
    %117 = arith.truncf %116 : vector<17x8xf32> to vector<17x8xbf16>
    %cst_38 = arith.constant dense<0.000000e+00> : vector<17x17xf32>
    %118 = tpu.matmul %113, %115, %cst_38 {dimension_numbers = #tpu.dot_dimension_numbers<[1], [1], [0], [0], [0, 0, 1, 0], [], []>} : vector<17x8xbf16>, vector<17x8xbf16>, vector<17x17xf32> -> vector<17x17xf32>
    %cst_39 = arith.constant 0.353553385 : f32
    %119 = vector.broadcast %cst_39 : f32 to vector<17x17xf32>
    %120 = arith.mulf %118, %119 : vector<17x17xf32>
    %cst_40 = arith.constant dense<0xFF800000> : vector<17xf32>
    %121 = vector.multi_reduction <maximumf>, %120, %cst_40 [1] : vector<17x17xf32> to vector<17xf32>
    %122 = vector.shape_cast %121 : vector<17xf32> to vector<17x1xf32>
    %123 = vector.broadcast %122 : vector<17x1xf32> to vector<17x17xf32>
    %124 = arith.subf %120, %123 : vector<17x17xf32>
    %125 = math.exp %124 : vector<17x17xf32>
    %cst_41 = arith.constant dense<0.000000e+00> : vector<17xf32>
    %126 = vector.multi_reduction <add>, %125, %cst_41 [1] : vector<17x17xf32> to vector<17xf32>
    %127 = vector.shape_cast %126 : vector<17xf32> to vector<17x1xf32>
    %128 = tpu.reciprocal %127 {approx = true} : vector<17x1xf32> -> vector<17x1xf32>
    %129 = vector.broadcast %128 : vector<17x1xf32> to vector<17x17xf32>
    %130 = arith.mulf %125, %129 : vector<17x17xf32>
    %c0_42 = arith.constant 0 : index
    %c3 = arith.constant 3 : index
    %c0_43 = arith.constant 0 : index
    %c0_44 = arith.constant 0 : index
    %131 = vector.load %arg6[%c0_42, %c3, %c0_43, %c0_44] : memref<1x4x17x17xf32, #tpu.memory_space<vmem>>, vector<1x1x17x17xf32>
    %132 = vector.shape_cast %131 : vector<1x1x17x17xf32> to vector<17x17xf32>
    %133 = vector.shape_cast %130 : vector<17x17xf32> to vector<1x1x17x17xf32>
    tpu.vector_store %arg6[%c0_42, %c3, %c0_43, %c0_44], %133 {strides = array<i32>} : memref<1x4x17x17xf32, #tpu.memory_space<vmem>>, vector<1x1x17x17xf32>,
    %134 = arith.truncf %130 : vector<17x17xf32> to vector<17x17xbf16>
    %cst_45 = arith.constant dense<0.000000e+00> : vector<17x8xf32>
    %135 = tpu.matmul %134, %117, %cst_45 {dimension_numbers = #tpu.dot_dimension_numbers<[1], [0], [0], [1], [0, 0, 1, 1], [], []>} : vector<17x17xbf16>, vector<17x8xbf16>, vector<17x8xf32> -> vector<17x8xf32>
    %136 = tpu.concatenate %63, %87, %111, %135 in 1 : vector<17x8xf32>, vector<17x8xf32>, vector<17x8xf32>, vector<17x8xf32> -> vector<17x32xf32>
    %137 = arith.truncf %136 : vector<17x32xf32> to vector<17x32xbf16>
    %138 = vector.extract_strided_slice %2 {offsets = [0, 96], sizes = [32, 32], strides = [1, 1]} : vector<32x128xbf16> to vector<32x32xbf16>
    %cst_46 = arith.constant dense<0.000000e+00> : vector<17x32xf32>
    %139 = tpu.matmul %137, %138, %cst_46 {dimension_numbers = #tpu.dot_dimension_numbers<[1], [0], [0], [1], [0, 0, 1, 1], [], []>} : vector<17x32xbf16>, vector<32x32xbf16>, vector<17x32xf32> -> vector<17x32xf32>
    %140 = vector.broadcast %8 : vector<1x32xf32> to vector<17x32xf32>
    %141 = arith.addf %139, %140 : vector<17x32xf32>
    %142 = arith.addf %141, %1 : vector<17x32xf32>
    %cst_47 = arith.constant dense<0.000000e+00> : vector<17xf32>
    %143 = vector.multi_reduction <add>, %142, %cst_47 [1] : vector<17x32xf32> to vector<17xf32>
    %144 = vector.shape_cast %143 : vector<17xf32> to vector<17x1xf32>
    %cst_48 = arith.constant 3.200000e+01 : f32
    %145 = vector.broadcast %cst_48 : f32 to vector<17x1xf32>
    %146 = arith.divf %144, %145 : vector<17x1xf32>
    %147 = vector.broadcast %146 : vector<17x1xf32> to vector<17x32xf32>
    %148 = arith.subf %142, %147 : vector<17x32xf32>
    %149 = arith.mulf %148, %148 : vector<17x32xf32>
    %cst_49 = arith.constant dense<0.000000e+00> : vector<17xf32>
    %150 = vector.multi_reduction <add>, %149, %cst_49 [1] : vector<17x32xf32> to vector<17xf32>
    %151 = vector.shape_cast %150 : vector<17xf32> to vector<17x1xf32>
    %cst_50 = arith.constant 3.200000e+01 : f32
    %152 = vector.broadcast %cst_50 : f32 to vector<17x1xf32>
    %153 = arith.divf %151, %152 : vector<17x1xf32>
    %154 = vector.broadcast %146 : vector<17x1xf32> to vector<17x32xf32>
    %155 = arith.subf %142, %154 : vector<17x32xf32>
    %cst_51 = arith.constant 9.99999997E-7 : f32
    %156 = vector.broadcast %cst_51 : f32 to vector<17x1xf32>
    %157 = arith.addf %153, %156 : vector<17x1xf32>
    %158 = math.rsqrt %157 : vector<17x1xf32>
    %159 = vector.broadcast %158 : vector<17x1xf32> to vector<17x32xf32>
    %160 = arith.mulf %155, %159 : vector<17x32xf32>
    %161 = vector.broadcast %9 : vector<1x32xf32> to vector<17x32xf32>
    %162 = arith.mulf %160, %161 : vector<17x32xf32>
    %163 = vector.broadcast %10 : vector<1x32xf32> to vector<17x32xf32>
    %164 = arith.addf %162, %163 : vector<17x32xf32>
    %165 = arith.truncf %164 : vector<17x32xf32> to vector<17x32xbf16>
    %166 = vector.extract_strided_slice %3 {offsets = [0, 0], sizes = [32, 64], strides = [1, 1]} : vector<96x128xbf16> to vector<32x64xbf16>
    %cst_52 = arith.constant dense<0.000000e+00> : vector<17x64xf32>
    %167 = tpu.matmul %165, %166, %cst_52 {dimension_numbers = #tpu.dot_dimension_numbers<[1], [0], [0], [1], [0, 0, 1, 1], [], []>} : vector<17x32xbf16>, vector<32x64xbf16>, vector<17x64xf32> -> vector<17x64xf32>
    %168 = vector.broadcast %11 : vector<1x64xf32> to vector<17x64xf32>
    %169 = arith.addf %167, %168 : vector<17x64xf32>
    %cst_53 = arith.constant 5.000000e-01 : f32
    %170 = vector.broadcast %cst_53 : f32 to vector<17x64xf32>
    %171 = arith.mulf %170, %169 : vector<17x64xf32>
    %cst_54 = arith.constant 0.707106769 : f32
    %172 = vector.broadcast %cst_54 : f32 to vector<17x64xf32>
    %173 = arith.mulf %169, %172 : vector<17x64xf32>
    %cst_55 = arith.constant 0.000000e+00 : f32
    %174 = vector.broadcast %cst_55 : f32 to vector<17x64xf32>
    %175 = arith.cmpf oge, %173, %174 : vector<17x64xf32>
    %cst_56 = arith.constant 1.000000e+00 : f32
    %cst_57 = arith.constant -1.000000e+00 : f32
    %176 = vector.broadcast %cst_56 : f32 to vector<17x64xf32>
    %177 = vector.broadcast %cst_57 : f32 to vector<17x64xf32>
    %178 = arith.select %175, %176, %177 : vector<17x64xi1>, vector<17x64xf32>
    %179 = math.absf %173 : vector<17x64xf32>
    %cst_58 = arith.constant 0.327591091 : f32
    %180 = vector.broadcast %cst_58 : f32 to vector<17x64xf32>
    %181 = arith.mulf %180, %179 : vector<17x64xf32>
    %cst_59 = arith.constant 1.000000e+00 : f32
    %182 = vector.broadcast %cst_59 : f32 to vector<17x64xf32>
    %183 = arith.addf %182, %181 : vector<17x64xf32>
    %cst_60 = arith.constant 1.000000e+00 : f32
    %184 = vector.broadcast %cst_60 : f32 to vector<17x64xf32>
    %185 = arith.divf %184, %183 : vector<17x64xf32>
    %cst_61 = arith.constant 1.06140542 : f32
    %186 = vector.broadcast %cst_61 : f32 to vector<17x64xf32>
    %187 = arith.mulf %186, %185 : vector<17x64xf32>
    %cst_62 = arith.constant -1.45315206 : f32
    %188 = vector.broadcast %cst_62 : f32 to vector<17x64xf32>
    %189 = arith.addf %187, %188 : vector<17x64xf32>
    %190 = arith.mulf %189, %185 : vector<17x64xf32>
    %cst_63 = arith.constant 1.42141378 : f32
    %191 = vector.broadcast %cst_63 : f32 to vector<17x64xf32>
    %192 = arith.addf %190, %191 : vector<17x64xf32>
    %193 = arith.mulf %192, %185 : vector<17x64xf32>
    %cst_64 = arith.constant -0.284496725 : f32
    %194 = vector.broadcast %cst_64 : f32 to vector<17x64xf32>
    %195 = arith.addf %193, %194 : vector<17x64xf32>
    %196 = arith.mulf %195, %185 : vector<17x64xf32>
    %cst_65 = arith.constant 0.254829586 : f32
    %197 = vector.broadcast %cst_65 : f32 to vector<17x64xf32>
    %198 = arith.addf %196, %197 : vector<17x64xf32>
    %199 = arith.mulf %198, %185 : vector<17x64xf32>
    %cst_66 = arith.constant 0.000000e+00 : f32
    %200 = vector.broadcast %cst_66 : f32 to vector<17x64xf32>
    %201 = arith.subf %200, %179 : vector<17x64xf32>
    %202 = arith.mulf %201, %179 : vector<17x64xf32>
    %203 = math.exp %202 : vector<17x64xf32>
    %204 = arith.mulf %199, %203 : vector<17x64xf32>
    %cst_67 = arith.constant 1.000000e+00 : f32
    %205 = vector.broadcast %cst_67 : f32 to vector<17x64xf32>
    %206 = arith.subf %205, %204 : vector<17x64xf32>
    %207 = arith.mulf %178, %206 : vector<17x64xf32>
    %cst_68 = arith.constant 1.000000e+00 : f32
    %208 = vector.broadcast %cst_68 : f32 to vector<17x64xf32>
    %209 = arith.addf %208, %207 : vector<17x64xf32>
    %210 = arith.mulf %171, %209 : vector<17x64xf32>
    %211 = arith.truncf %210 : vector<17x64xf32> to vector<17x64xbf16>
    %212 = vector.extract_strided_slice %3 {offsets = [32, 0], sizes = [64, 32], strides = [1, 1]} : vector<96x128xbf16> to vector<64x32xbf16>
    %cst_69 = arith.constant dense<0.000000e+00> : vector<17x32xf32>
    %213 = tpu.matmul %211, %212, %cst_69 {dimension_numbers = #tpu.dot_dimension_numbers<[1], [0], [0], [1], [0, 0, 1, 1], [], []>} : vector<17x64xbf16>, vector<64x32xbf16>, vector<17x32xf32> -> vector<17x32xf32>
    %214 = vector.broadcast %12 : vector<1x32xf32> to vector<17x32xf32>
    %215 = arith.addf %213, %214 : vector<17x32xf32>
    %216 = arith.addf %142, %215 : vector<17x32xf32>
    %c0_70 = arith.constant 0 : index
    %c0_71 = arith.constant 0 : index
    %c0_72 = arith.constant 0 : index
    %217 = vector.load %arg5[%c0_70, %c0_71, %c0_72] : memref<1x17x32xf32, #tpu.memory_space<vmem>>, vector<1x17x32xf32>
    %218 = vector.shape_cast %217 : vector<1x17x32xf32> to vector<17x32xf32>
    %219 = vector.shape_cast %216 : vector<17x32xf32> to vector<1x17x32xf32>
    tpu.vector_store %arg5[%c0_70, %c0_71, %c0_72], %219 {strides = array<i32>} : memref<1x17x32xf32, #tpu.memory_space<vmem>>, vector<1x17x32xf32>,
    return
  }
  func.func @transform_0(%arg0: i32) -> (i32, i32, i32) {
    %c0_i32 = arith.constant 0 : i32
    %c0_i32_0 = arith.constant 0 : i32
    %c0_i32_1 = arith.constant 0 : i32
    return %arg0, %c0_i32, %c0_i32_0 : i32, i32, i32
  }
  func.func @transform_1(%arg0: i32) -> (i32, i32) {
    %c0_i32 = arith.constant 0 : i32
    %c0_i32_0 = arith.constant 0 : i32
    %c0_i32_1 = arith.constant 0 : i32
    return %c0_i32, %c0_i32_0 : i32, i32
  }
  func.func @transform_2(%arg0: i32) -> (i32, i32) {
    %c0_i32 = arith.constant 0 : i32
    %c0_i32_0 = arith.constant 0 : i32
    %c0_i32_1 = arith.constant 0 : i32
    return %c0_i32, %c0_i32_0 : i32, i32
  }
  func.func @transform_3(%arg0: i32) -> (i32, i32) {
    %c0_i32 = arith.constant 0 : i32
    %c0_i32_0 = arith.constant 0 : i32
    %c0_i32_1 = arith.constant 0 : i32
    return %c0_i32, %c0_i32_0 : i32, i32
  }
  func.func @transform_4(%arg0: i32) -> (i32, i32, i32) {
    %c0_i32 = arith.constant 0 : i32
    %c0_i32_0 = arith.constant 0 : i32
    %c0_i32_1 = arith.constant 0 : i32
    return %arg0, %c0_i32, %c0_i32_0 : i32, i32, i32
  }
  func.func @transform_5(%arg0: i32) -> (i32, i32, i32, i32) {
    %c0_i32 = arith.constant 0 : i32
    %c0_i32_0 = arith.constant 0 : i32
    %c0_i32_1 = arith.constant 0 : i32
    %c0_i32_2 = arith.constant 0 : i32
    return %arg0, %c0_i32, %c0_i32_0, %c0_i32_1 : i32, i32, i32, i32
  }
}

module attributes {stable_mosaic.version = 11 : i64} {
  func.func @kernel(%arg0: i32, %arg1: memref<1x17x32xf32, #tpu.memory_space<vmem>>, %arg2: memref<32x128xbf16, #tpu.memory_space<vmem>>, %arg3: memref<96x128xbf16, #tpu.memory_space<vmem>>, %arg4: memref<8x128xf32, #tpu.memory_space<vmem>>, %arg5: memref<2x32xf32, #tpu.memory_space<vmem>>, %arg6: memref<1x17x32xf32, #tpu.memory_space<vmem>>, %arg7: memref<1x4x17x17xf32, #tpu.memory_space<vmem>>) attributes {dimension_semantics = [#tpu.dimension_semantics<parallel>], iteration_bounds = array<i64: 2>, scalar_prefetch = 0 : i64, scratch_operands = 0 : i64, tpu.core_type = #tpu.core_type<tc>, window_params = [{transform_indices = @transform_0, window_bounds = array<i64: 1, 17, 32>}, {pipeline_mode = #tpu.pipeline_mode<synchronous>, transform_indices = @transform_1, window_bounds = array<i64: 32, 128>}, {pipeline_mode = #tpu.pipeline_mode<synchronous>, transform_indices = @transform_2, window_bounds = array<i64: 96, 128>}, {pipeline_mode = #tpu.pipeline_mode<synchronous>, transform_indices = @transform_3, window_bounds = array<i64: 8, 128>}, {pipeline_mode = #tpu.pipeline_mode<synchronous>, transform_indices = @transform_4, window_bounds = array<i64: 2, 32>}, {transform_indices = @transform_5, window_bounds = array<i64: 1, 17, 32>}, {transform_indices = @transform_6, window_bounds = array<i64: 1, 4, 17, 17>}]} {
    %c0 = arith.constant 0 : index
    %c0_0 = arith.constant 0 : index
    %c0_1 = arith.constant 0 : index
    %0 = vector.load %arg1[%c0, %c0_0, %c0_1] : memref<1x17x32xf32, #tpu.memory_space<vmem>>, vector<1x17x32xf32>
    %1 = vector.shape_cast %0 : vector<1x17x32xf32> to vector<17x32xf32>
    %c0_2 = arith.constant 0 : index
    %c0_3 = arith.constant 0 : index
    %2 = vector.load %arg2[%c0_2, %c0_3] : memref<32x128xbf16, #tpu.memory_space<vmem>>, vector<32x128xbf16>
    %c0_4 = arith.constant 0 : index
    %c0_5 = arith.constant 0 : index
    %3 = vector.load %arg3[%c0_4, %c0_5] : memref<96x128xbf16, #tpu.memory_space<vmem>>, vector<96x128xbf16>
    %c0_6 = arith.constant 0 : index
    %c0_7 = arith.constant 0 : index
    %4 = vector.load %arg4[%c0_6, %c0_7] : memref<8x128xf32, #tpu.memory_space<vmem>>, vector<8x128xf32>
    %5 = vector.extract_strided_slice %4 {offsets = [0, 0], sizes = [1, 32], strides = [1, 1]} : vector<8x128xf32> to vector<1x32xf32>
    %6 = vector.extract_strided_slice %4 {offsets = [1, 0], sizes = [1, 32], strides = [1, 1]} : vector<8x128xf32> to vector<1x32xf32>
    %7 = vector.extract_strided_slice %4 {offsets = [2, 0], sizes = [1, 96], strides = [1, 1]} : vector<8x128xf32> to vector<1x96xf32>
    %8 = vector.extract_strided_slice %4 {offsets = [3, 0], sizes = [1, 32], strides = [1, 1]} : vector<8x128xf32> to vector<1x32xf32>
    %9 = vector.extract_strided_slice %4 {offsets = [4, 0], sizes = [1, 32], strides = [1, 1]} : vector<8x128xf32> to vector<1x32xf32>
    %10 = vector.extract_strided_slice %4 {offsets = [5, 0], sizes = [1, 32], strides = [1, 1]} : vector<8x128xf32> to vector<1x32xf32>
    %11 = vector.extract_strided_slice %4 {offsets = [6, 0], sizes = [1, 64], strides = [1, 1]} : vector<8x128xf32> to vector<1x64xf32>
    %12 = vector.extract_strided_slice %4 {offsets = [7, 0], sizes = [1, 32], strides = [1, 1]} : vector<8x128xf32> to vector<1x32xf32>
    %cst = arith.constant dense<0.000000e+00> : vector<17xf32>
    %13 = vector.multi_reduction <add>, %1, %cst [1] : vector<17x32xf32> to vector<17xf32>
    %14 = vector.shape_cast %13 : vector<17xf32> to vector<17x1xf32>
    %cst_8 = arith.constant 3.200000e+01 : f32
    %15 = vector.broadcast %cst_8 : f32 to vector<17x1xf32>
    %16 = arith.divf %14, %15 : vector<17x1xf32>
    %17 = vector.broadcast %16 : vector<17x1xf32> to vector<17x32xf32>
    %18 = arith.subf %1, %17 : vector<17x32xf32>
    %19 = arith.mulf %18, %18 : vector<17x32xf32>
    %cst_9 = arith.constant dense<0.000000e+00> : vector<17xf32>
    %20 = vector.multi_reduction <add>, %19, %cst_9 [1] : vector<17x32xf32> to vector<17xf32>
    %21 = vector.shape_cast %20 : vector<17xf32> to vector<17x1xf32>
    %cst_10 = arith.constant 3.200000e+01 : f32
    %22 = vector.broadcast %cst_10 : f32 to vector<17x1xf32>
    %23 = arith.divf %21, %22 : vector<17x1xf32>
    %24 = vector.broadcast %16 : vector<17x1xf32> to vector<17x32xf32>
    %25 = arith.subf %1, %24 : vector<17x32xf32>
    %cst_11 = arith.constant 9.99999997E-7 : f32
    %26 = vector.broadcast %cst_11 : f32 to vector<17x1xf32>
    %27 = arith.addf %23, %26 : vector<17x1xf32>
    %28 = math.rsqrt %27 : vector<17x1xf32>
    %29 = vector.broadcast %28 : vector<17x1xf32> to vector<17x32xf32>
    %30 = arith.mulf %25, %29 : vector<17x32xf32>
    %31 = vector.broadcast %5 : vector<1x32xf32> to vector<17x32xf32>
    %32 = arith.mulf %30, %31 : vector<17x32xf32>
    %33 = vector.broadcast %6 : vector<1x32xf32> to vector<17x32xf32>
    %34 = arith.addf %32, %33 : vector<17x32xf32>
    %35 = arith.truncf %34 : vector<17x32xf32> to vector<17x32xbf16>
    %36 = vector.extract_strided_slice %2 {offsets = [0, 0], sizes = [32, 96], strides = [1, 1]} : vector<32x128xbf16> to vector<32x96xbf16>
    %cst_12 = arith.constant dense<0.000000e+00> : vector<17x96xf32>
    %37 = tpu.matmul %35, %36, %cst_12 {dimension_numbers = #tpu.dot_dimension_numbers<[1], [0], [0], [1], [0, 0, 1, 1], [], []>} : vector<17x32xbf16>, vector<32x96xbf16>, vector<17x96xf32> -> vector<17x96xf32>
    %38 = vector.broadcast %7 : vector<1x96xf32> to vector<17x96xf32>
    %39 = arith.addf %37, %38 : vector<17x96xf32>
    %40 = vector.extract_strided_slice %39 {offsets = [0, 0], sizes = [17, 8], strides = [1, 1]} : vector<17x96xf32> to vector<17x8xf32>
    %41 = arith.truncf %40 : vector<17x8xf32> to vector<17x8xbf16>
    %42 = vector.extract_strided_slice %39 {offsets = [0, 32], sizes = [17, 8], strides = [1, 1]} : vector<17x96xf32> to vector<17x8xf32>
    %43 = arith.truncf %42 : vector<17x8xf32> to vector<17x8xbf16>
    %44 = vector.extract_strided_slice %39 {offsets = [0, 64], sizes = [17, 8], strides = [1, 1]} : vector<17x96xf32> to vector<17x8xf32>
    %45 = arith.truncf %44 : vector<17x8xf32> to vector<17x8xbf16>
    %cst_13 = arith.constant dense<0.000000e+00> : vector<17x17xf32>
    %46 = tpu.matmul %41, %43, %cst_13 {dimension_numbers = #tpu.dot_dimension_numbers<[1], [1], [0], [0], [0, 0, 1, 0], [], []>} : vector<17x8xbf16>, vector<17x8xbf16>, vector<17x17xf32> -> vector<17x17xf32>
    %cst_14 = arith.constant 0.353553385 : f32
    %47 = vector.broadcast %cst_14 : f32 to vector<17x17xf32>
    %48 = arith.mulf %46, %47 : vector<17x17xf32>
    %cst_15 = arith.constant dense<0xFF800000> : vector<17xf32>
    %49 = vector.multi_reduction <maximumf>, %48, %cst_15 [1] : vector<17x17xf32> to vector<17xf32>
    %50 = vector.shape_cast %49 : vector<17xf32> to vector<17x1xf32>
    %51 = vector.broadcast %50 : vector<17x1xf32> to vector<17x17xf32>
    %52 = arith.subf %48, %51 : vector<17x17xf32>
    %53 = math.exp %52 : vector<17x17xf32>
    %cst_16 = arith.constant dense<0.000000e+00> : vector<17xf32>
    %54 = vector.multi_reduction <add>, %53, %cst_16 [1] : vector<17x17xf32> to vector<17xf32>
    %55 = vector.shape_cast %54 : vector<17xf32> to vector<17x1xf32>
    %56 = tpu.reciprocal %55 {approx = true} : vector<17x1xf32> -> vector<17x1xf32>
    %57 = vector.broadcast %56 : vector<17x1xf32> to vector<17x17xf32>
    %58 = arith.mulf %53, %57 : vector<17x17xf32>
    %c0_17 = arith.constant 0 : index
    %c0_18 = arith.constant 0 : index
    %c0_19 = arith.constant 0 : index
    %c0_20 = arith.constant 0 : index
    %59 = vector.load %arg7[%c0_17, %c0_18, %c0_19, %c0_20] : memref<1x4x17x17xf32, #tpu.memory_space<vmem>>, vector<1x1x17x17xf32>
    %60 = vector.shape_cast %59 : vector<1x1x17x17xf32> to vector<17x17xf32>
    %61 = vector.shape_cast %58 : vector<17x17xf32> to vector<1x1x17x17xf32>
    tpu.vector_store %arg7[%c0_17, %c0_18, %c0_19, %c0_20], %61 {strides = array<i32>} : memref<1x4x17x17xf32, #tpu.memory_space<vmem>>, vector<1x1x17x17xf32>,
    %62 = arith.truncf %58 : vector<17x17xf32> to vector<17x17xbf16>
    %cst_21 = arith.constant dense<0.000000e+00> : vector<17x8xf32>
    %63 = tpu.matmul %62, %45, %cst_21 {dimension_numbers = #tpu.dot_dimension_numbers<[1], [0], [0], [1], [0, 0, 1, 1], [], []>} : vector<17x17xbf16>, vector<17x8xbf16>, vector<17x8xf32> -> vector<17x8xf32>
    %64 = vector.extract_strided_slice %39 {offsets = [0, 8], sizes = [17, 8], strides = [1, 1]} : vector<17x96xf32> to vector<17x8xf32>
    %65 = arith.truncf %64 : vector<17x8xf32> to vector<17x8xbf16>
    %66 = vector.extract_strided_slice %39 {offsets = [0, 40], sizes = [17, 8], strides = [1, 1]} : vector<17x96xf32> to vector<17x8xf32>
    %67 = arith.truncf %66 : vector<17x8xf32> to vector<17x8xbf16>
    %68 = vector.extract_strided_slice %39 {offsets = [0, 72], sizes = [17, 8], strides = [1, 1]} : vector<17x96xf32> to vector<17x8xf32>
    %69 = arith.truncf %68 : vector<17x8xf32> to vector<17x8xbf16>
    %cst_22 = arith.constant dense<0.000000e+00> : vector<17x17xf32>
    %70 = tpu.matmul %65, %67, %cst_22 {dimension_numbers = #tpu.dot_dimension_numbers<[1], [1], [0], [0], [0, 0, 1, 0], [], []>} : vector<17x8xbf16>, vector<17x8xbf16>, vector<17x17xf32> -> vector<17x17xf32>
    %cst_23 = arith.constant 0.353553385 : f32
    %71 = vector.broadcast %cst_23 : f32 to vector<17x17xf32>
    %72 = arith.mulf %70, %71 : vector<17x17xf32>
    %cst_24 = arith.constant dense<0xFF800000> : vector<17xf32>
    %73 = vector.multi_reduction <maximumf>, %72, %cst_24 [1] : vector<17x17xf32> to vector<17xf32>
    %74 = vector.shape_cast %73 : vector<17xf32> to vector<17x1xf32>
    %75 = vector.broadcast %74 : vector<17x1xf32> to vector<17x17xf32>
    %76 = arith.subf %72, %75 : vector<17x17xf32>
    %77 = math.exp %76 : vector<17x17xf32>
    %cst_25 = arith.constant dense<0.000000e+00> : vector<17xf32>
    %78 = vector.multi_reduction <add>, %77, %cst_25 [1] : vector<17x17xf32> to vector<17xf32>
    %79 = vector.shape_cast %78 : vector<17xf32> to vector<17x1xf32>
    %80 = tpu.reciprocal %79 {approx = true} : vector<17x1xf32> -> vector<17x1xf32>
    %81 = vector.broadcast %80 : vector<17x1xf32> to vector<17x17xf32>
    %82 = arith.mulf %77, %81 : vector<17x17xf32>
    %c0_26 = arith.constant 0 : index
    %c1 = arith.constant 1 : index
    %c0_27 = arith.constant 0 : index
    %c0_28 = arith.constant 0 : index
    %83 = vector.load %arg7[%c0_26, %c1, %c0_27, %c0_28] : memref<1x4x17x17xf32, #tpu.memory_space<vmem>>, vector<1x1x17x17xf32>
    %84 = vector.shape_cast %83 : vector<1x1x17x17xf32> to vector<17x17xf32>
    %85 = vector.shape_cast %82 : vector<17x17xf32> to vector<1x1x17x17xf32>
    tpu.vector_store %arg7[%c0_26, %c1, %c0_27, %c0_28], %85 {strides = array<i32>} : memref<1x4x17x17xf32, #tpu.memory_space<vmem>>, vector<1x1x17x17xf32>,
    %86 = arith.truncf %82 : vector<17x17xf32> to vector<17x17xbf16>
    %cst_29 = arith.constant dense<0.000000e+00> : vector<17x8xf32>
    %87 = tpu.matmul %86, %69, %cst_29 {dimension_numbers = #tpu.dot_dimension_numbers<[1], [0], [0], [1], [0, 0, 1, 1], [], []>} : vector<17x17xbf16>, vector<17x8xbf16>, vector<17x8xf32> -> vector<17x8xf32>
    %88 = vector.extract_strided_slice %39 {offsets = [0, 16], sizes = [17, 8], strides = [1, 1]} : vector<17x96xf32> to vector<17x8xf32>
    %89 = arith.truncf %88 : vector<17x8xf32> to vector<17x8xbf16>
    %90 = vector.extract_strided_slice %39 {offsets = [0, 48], sizes = [17, 8], strides = [1, 1]} : vector<17x96xf32> to vector<17x8xf32>
    %91 = arith.truncf %90 : vector<17x8xf32> to vector<17x8xbf16>
    %92 = vector.extract_strided_slice %39 {offsets = [0, 80], sizes = [17, 8], strides = [1, 1]} : vector<17x96xf32> to vector<17x8xf32>
    %93 = arith.truncf %92 : vector<17x8xf32> to vector<17x8xbf16>
    %cst_30 = arith.constant dense<0.000000e+00> : vector<17x17xf32>
    %94 = tpu.matmul %89, %91, %cst_30 {dimension_numbers = #tpu.dot_dimension_numbers<[1], [1], [0], [0], [0, 0, 1, 0], [], []>} : vector<17x8xbf16>, vector<17x8xbf16>, vector<17x17xf32> -> vector<17x17xf32>
    %cst_31 = arith.constant 0.353553385 : f32
    %95 = vector.broadcast %cst_31 : f32 to vector<17x17xf32>
    %96 = arith.mulf %94, %95 : vector<17x17xf32>
    %cst_32 = arith.constant dense<0xFF800000> : vector<17xf32>
    %97 = vector.multi_reduction <maximumf>, %96, %cst_32 [1] : vector<17x17xf32> to vector<17xf32>
    %98 = vector.shape_cast %97 : vector<17xf32> to vector<17x1xf32>
    %99 = vector.broadcast %98 : vector<17x1xf32> to vector<17x17xf32>
    %100 = arith.subf %96, %99 : vector<17x17xf32>
    %101 = math.exp %100 : vector<17x17xf32>
    %cst_33 = arith.constant dense<0.000000e+00> : vector<17xf32>
    %102 = vector.multi_reduction <add>, %101, %cst_33 [1] : vector<17x17xf32> to vector<17xf32>
    %103 = vector.shape_cast %102 : vector<17xf32> to vector<17x1xf32>
    %104 = tpu.reciprocal %103 {approx = true} : vector<17x1xf32> -> vector<17x1xf32>
    %105 = vector.broadcast %104 : vector<17x1xf32> to vector<17x17xf32>
    %106 = arith.mulf %101, %105 : vector<17x17xf32>
    %c0_34 = arith.constant 0 : index
    %c2 = arith.constant 2 : index
    %c0_35 = arith.constant 0 : index
    %c0_36 = arith.constant 0 : index
    %107 = vector.load %arg7[%c0_34, %c2, %c0_35, %c0_36] : memref<1x4x17x17xf32, #tpu.memory_space<vmem>>, vector<1x1x17x17xf32>
    %108 = vector.shape_cast %107 : vector<1x1x17x17xf32> to vector<17x17xf32>
    %109 = vector.shape_cast %106 : vector<17x17xf32> to vector<1x1x17x17xf32>
    tpu.vector_store %arg7[%c0_34, %c2, %c0_35, %c0_36], %109 {strides = array<i32>} : memref<1x4x17x17xf32, #tpu.memory_space<vmem>>, vector<1x1x17x17xf32>,
    %110 = arith.truncf %106 : vector<17x17xf32> to vector<17x17xbf16>
    %cst_37 = arith.constant dense<0.000000e+00> : vector<17x8xf32>
    %111 = tpu.matmul %110, %93, %cst_37 {dimension_numbers = #tpu.dot_dimension_numbers<[1], [0], [0], [1], [0, 0, 1, 1], [], []>} : vector<17x17xbf16>, vector<17x8xbf16>, vector<17x8xf32> -> vector<17x8xf32>
    %112 = vector.extract_strided_slice %39 {offsets = [0, 24], sizes = [17, 8], strides = [1, 1]} : vector<17x96xf32> to vector<17x8xf32>
    %113 = arith.truncf %112 : vector<17x8xf32> to vector<17x8xbf16>
    %114 = vector.extract_strided_slice %39 {offsets = [0, 56], sizes = [17, 8], strides = [1, 1]} : vector<17x96xf32> to vector<17x8xf32>
    %115 = arith.truncf %114 : vector<17x8xf32> to vector<17x8xbf16>
    %116 = vector.extract_strided_slice %39 {offsets = [0, 88], sizes = [17, 8], strides = [1, 1]} : vector<17x96xf32> to vector<17x8xf32>
    %117 = arith.truncf %116 : vector<17x8xf32> to vector<17x8xbf16>
    %cst_38 = arith.constant dense<0.000000e+00> : vector<17x17xf32>
    %118 = tpu.matmul %113, %115, %cst_38 {dimension_numbers = #tpu.dot_dimension_numbers<[1], [1], [0], [0], [0, 0, 1, 0], [], []>} : vector<17x8xbf16>, vector<17x8xbf16>, vector<17x17xf32> -> vector<17x17xf32>
    %cst_39 = arith.constant 0.353553385 : f32
    %119 = vector.broadcast %cst_39 : f32 to vector<17x17xf32>
    %120 = arith.mulf %118, %119 : vector<17x17xf32>
    %cst_40 = arith.constant dense<0xFF800000> : vector<17xf32>
    %121 = vector.multi_reduction <maximumf>, %120, %cst_40 [1] : vector<17x17xf32> to vector<17xf32>
    %122 = vector.shape_cast %121 : vector<17xf32> to vector<17x1xf32>
    %123 = vector.broadcast %122 : vector<17x1xf32> to vector<17x17xf32>
    %124 = arith.subf %120, %123 : vector<17x17xf32>
    %125 = math.exp %124 : vector<17x17xf32>
    %cst_41 = arith.constant dense<0.000000e+00> : vector<17xf32>
    %126 = vector.multi_reduction <add>, %125, %cst_41 [1] : vector<17x17xf32> to vector<17xf32>
    %127 = vector.shape_cast %126 : vector<17xf32> to vector<17x1xf32>
    %128 = tpu.reciprocal %127 {approx = true} : vector<17x1xf32> -> vector<17x1xf32>
    %129 = vector.broadcast %128 : vector<17x1xf32> to vector<17x17xf32>
    %130 = arith.mulf %125, %129 : vector<17x17xf32>
    %c0_42 = arith.constant 0 : index
    %c3 = arith.constant 3 : index
    %c0_43 = arith.constant 0 : index
    %c0_44 = arith.constant 0 : index
    %131 = vector.load %arg7[%c0_42, %c3, %c0_43, %c0_44] : memref<1x4x17x17xf32, #tpu.memory_space<vmem>>, vector<1x1x17x17xf32>
    %132 = vector.shape_cast %131 : vector<1x1x17x17xf32> to vector<17x17xf32>
    %133 = vector.shape_cast %130 : vector<17x17xf32> to vector<1x1x17x17xf32>
    tpu.vector_store %arg7[%c0_42, %c3, %c0_43, %c0_44], %133 {strides = array<i32>} : memref<1x4x17x17xf32, #tpu.memory_space<vmem>>, vector<1x1x17x17xf32>,
    %134 = arith.truncf %130 : vector<17x17xf32> to vector<17x17xbf16>
    %cst_45 = arith.constant dense<0.000000e+00> : vector<17x8xf32>
    %135 = tpu.matmul %134, %117, %cst_45 {dimension_numbers = #tpu.dot_dimension_numbers<[1], [0], [0], [1], [0, 0, 1, 1], [], []>} : vector<17x17xbf16>, vector<17x8xbf16>, vector<17x8xf32> -> vector<17x8xf32>
    %136 = tpu.concatenate %63, %87, %111, %135 in 1 : vector<17x8xf32>, vector<17x8xf32>, vector<17x8xf32>, vector<17x8xf32> -> vector<17x32xf32>
    %137 = arith.truncf %136 : vector<17x32xf32> to vector<17x32xbf16>
    %138 = vector.extract_strided_slice %2 {offsets = [0, 96], sizes = [32, 32], strides = [1, 1]} : vector<32x128xbf16> to vector<32x32xbf16>
    %cst_46 = arith.constant dense<0.000000e+00> : vector<17x32xf32>
    %139 = tpu.matmul %137, %138, %cst_46 {dimension_numbers = #tpu.dot_dimension_numbers<[1], [0], [0], [1], [0, 0, 1, 1], [], []>} : vector<17x32xbf16>, vector<32x32xbf16>, vector<17x32xf32> -> vector<17x32xf32>
    %140 = vector.broadcast %8 : vector<1x32xf32> to vector<17x32xf32>
    %141 = arith.addf %139, %140 : vector<17x32xf32>
    %142 = arith.addf %141, %1 : vector<17x32xf32>
    %cst_47 = arith.constant dense<0.000000e+00> : vector<17xf32>
    %143 = vector.multi_reduction <add>, %142, %cst_47 [1] : vector<17x32xf32> to vector<17xf32>
    %144 = vector.shape_cast %143 : vector<17xf32> to vector<17x1xf32>
    %cst_48 = arith.constant 3.200000e+01 : f32
    %145 = vector.broadcast %cst_48 : f32 to vector<17x1xf32>
    %146 = arith.divf %144, %145 : vector<17x1xf32>
    %147 = vector.broadcast %146 : vector<17x1xf32> to vector<17x32xf32>
    %148 = arith.subf %142, %147 : vector<17x32xf32>
    %149 = arith.mulf %148, %148 : vector<17x32xf32>
    %cst_49 = arith.constant dense<0.000000e+00> : vector<17xf32>
    %150 = vector.multi_reduction <add>, %149, %cst_49 [1] : vector<17x32xf32> to vector<17xf32>
    %151 = vector.shape_cast %150 : vector<17xf32> to vector<17x1xf32>
    %cst_50 = arith.constant 3.200000e+01 : f32
    %152 = vector.broadcast %cst_50 : f32 to vector<17x1xf32>
    %153 = arith.divf %151, %152 : vector<17x1xf32>
    %154 = vector.broadcast %146 : vector<17x1xf32> to vector<17x32xf32>
    %155 = arith.subf %142, %154 : vector<17x32xf32>
    %cst_51 = arith.constant 9.99999997E-7 : f32
    %156 = vector.broadcast %cst_51 : f32 to vector<17x1xf32>
    %157 = arith.addf %153, %156 : vector<17x1xf32>
    %158 = math.rsqrt %157 : vector<17x1xf32>
    %159 = vector.broadcast %158 : vector<17x1xf32> to vector<17x32xf32>
    %160 = arith.mulf %155, %159 : vector<17x32xf32>
    %161 = vector.broadcast %9 : vector<1x32xf32> to vector<17x32xf32>
    %162 = arith.mulf %160, %161 : vector<17x32xf32>
    %163 = vector.broadcast %10 : vector<1x32xf32> to vector<17x32xf32>
    %164 = arith.addf %162, %163 : vector<17x32xf32>
    %165 = arith.truncf %164 : vector<17x32xf32> to vector<17x32xbf16>
    %166 = vector.extract_strided_slice %3 {offsets = [0, 0], sizes = [32, 64], strides = [1, 1]} : vector<96x128xbf16> to vector<32x64xbf16>
    %cst_52 = arith.constant dense<0.000000e+00> : vector<17x64xf32>
    %167 = tpu.matmul %165, %166, %cst_52 {dimension_numbers = #tpu.dot_dimension_numbers<[1], [0], [0], [1], [0, 0, 1, 1], [], []>} : vector<17x32xbf16>, vector<32x64xbf16>, vector<17x64xf32> -> vector<17x64xf32>
    %168 = vector.broadcast %11 : vector<1x64xf32> to vector<17x64xf32>
    %169 = arith.addf %167, %168 : vector<17x64xf32>
    %cst_53 = arith.constant 5.000000e-01 : f32
    %170 = vector.broadcast %cst_53 : f32 to vector<17x64xf32>
    %171 = arith.mulf %170, %169 : vector<17x64xf32>
    %cst_54 = arith.constant 0.707106769 : f32
    %172 = vector.broadcast %cst_54 : f32 to vector<17x64xf32>
    %173 = arith.mulf %169, %172 : vector<17x64xf32>
    %cst_55 = arith.constant 0.000000e+00 : f32
    %174 = vector.broadcast %cst_55 : f32 to vector<17x64xf32>
    %175 = arith.cmpf oge, %173, %174 : vector<17x64xf32>
    %cst_56 = arith.constant 1.000000e+00 : f32
    %cst_57 = arith.constant -1.000000e+00 : f32
    %176 = vector.broadcast %cst_56 : f32 to vector<17x64xf32>
    %177 = vector.broadcast %cst_57 : f32 to vector<17x64xf32>
    %178 = arith.select %175, %176, %177 : vector<17x64xi1>, vector<17x64xf32>
    %179 = math.absf %173 : vector<17x64xf32>
    %cst_58 = arith.constant 0.327591091 : f32
    %180 = vector.broadcast %cst_58 : f32 to vector<17x64xf32>
    %181 = arith.mulf %180, %179 : vector<17x64xf32>
    %cst_59 = arith.constant 1.000000e+00 : f32
    %182 = vector.broadcast %cst_59 : f32 to vector<17x64xf32>
    %183 = arith.addf %182, %181 : vector<17x64xf32>
    %cst_60 = arith.constant 1.000000e+00 : f32
    %184 = vector.broadcast %cst_60 : f32 to vector<17x64xf32>
    %185 = arith.divf %184, %183 : vector<17x64xf32>
    %cst_61 = arith.constant 1.06140542 : f32
    %186 = vector.broadcast %cst_61 : f32 to vector<17x64xf32>
    %187 = arith.mulf %186, %185 : vector<17x64xf32>
    %cst_62 = arith.constant -1.45315206 : f32
    %188 = vector.broadcast %cst_62 : f32 to vector<17x64xf32>
    %189 = arith.addf %187, %188 : vector<17x64xf32>
    %190 = arith.mulf %189, %185 : vector<17x64xf32>
    %cst_63 = arith.constant 1.42141378 : f32
    %191 = vector.broadcast %cst_63 : f32 to vector<17x64xf32>
    %192 = arith.addf %190, %191 : vector<17x64xf32>
    %193 = arith.mulf %192, %185 : vector<17x64xf32>
    %cst_64 = arith.constant -0.284496725 : f32
    %194 = vector.broadcast %cst_64 : f32 to vector<17x64xf32>
    %195 = arith.addf %193, %194 : vector<17x64xf32>
    %196 = arith.mulf %195, %185 : vector<17x64xf32>
    %cst_65 = arith.constant 0.254829586 : f32
    %197 = vector.broadcast %cst_65 : f32 to vector<17x64xf32>
    %198 = arith.addf %196, %197 : vector<17x64xf32>
    %199 = arith.mulf %198, %185 : vector<17x64xf32>
    %cst_66 = arith.constant 0.000000e+00 : f32
    %200 = vector.broadcast %cst_66 : f32 to vector<17x64xf32>
    %201 = arith.subf %200, %179 : vector<17x64xf32>
    %202 = arith.mulf %201, %179 : vector<17x64xf32>
    %203 = math.exp %202 : vector<17x64xf32>
    %204 = arith.mulf %199, %203 : vector<17x64xf32>
    %cst_67 = arith.constant 1.000000e+00 : f32
    %205 = vector.broadcast %cst_67 : f32 to vector<17x64xf32>
    %206 = arith.subf %205, %204 : vector<17x64xf32>
    %207 = arith.mulf %178, %206 : vector<17x64xf32>
    %cst_68 = arith.constant 1.000000e+00 : f32
    %208 = vector.broadcast %cst_68 : f32 to vector<17x64xf32>
    %209 = arith.addf %208, %207 : vector<17x64xf32>
    %210 = arith.mulf %171, %209 : vector<17x64xf32>
    %211 = arith.truncf %210 : vector<17x64xf32> to vector<17x64xbf16>
    %212 = vector.extract_strided_slice %3 {offsets = [32, 0], sizes = [64, 32], strides = [1, 1]} : vector<96x128xbf16> to vector<64x32xbf16>
    %cst_69 = arith.constant dense<0.000000e+00> : vector<17x32xf32>
    %213 = tpu.matmul %211, %212, %cst_69 {dimension_numbers = #tpu.dot_dimension_numbers<[1], [0], [0], [1], [0, 0, 1, 1], [], []>} : vector<17x64xbf16>, vector<64x32xbf16>, vector<17x32xf32> -> vector<17x32xf32>
    %214 = vector.broadcast %12 : vector<1x32xf32> to vector<17x32xf32>
    %215 = arith.addf %213, %214 : vector<17x32xf32>
    %216 = arith.addf %142, %215 : vector<17x32xf32>
    %c0_70 = arith.constant 0 : index
    %c0_71 = arith.constant 0 : index
    %217 = vector.load %arg5[%c0_70, %c0_71] : memref<2x32xf32, #tpu.memory_space<vmem>>, vector<2x32xf32>
    %218 = vector.extract_strided_slice %217 {offsets = [0, 0], sizes = [1, 32], strides = [1, 1]} : vector<2x32xf32> to vector<1x32xf32>
    %219 = vector.extract_strided_slice %217 {offsets = [1, 0], sizes = [1, 32], strides = [1, 1]} : vector<2x32xf32> to vector<1x32xf32>
    %cst_72 = arith.constant dense<0.000000e+00> : vector<17xf32>
    %220 = vector.multi_reduction <add>, %216, %cst_72 [1] : vector<17x32xf32> to vector<17xf32>
    %221 = vector.shape_cast %220 : vector<17xf32> to vector<17x1xf32>
    %cst_73 = arith.constant 3.200000e+01 : f32
    %222 = vector.broadcast %cst_73 : f32 to vector<17x1xf32>
    %223 = arith.divf %221, %222 : vector<17x1xf32>
    %224 = vector.broadcast %223 : vector<17x1xf32> to vector<17x32xf32>
    %225 = arith.subf %216, %224 : vector<17x32xf32>
    %226 = arith.mulf %225, %225 : vector<17x32xf32>
    %cst_74 = arith.constant dense<0.000000e+00> : vector<17xf32>
    %227 = vector.multi_reduction <add>, %226, %cst_74 [1] : vector<17x32xf32> to vector<17xf32>
    %228 = vector.shape_cast %227 : vector<17xf32> to vector<17x1xf32>
    %cst_75 = arith.constant 3.200000e+01 : f32
    %229 = vector.broadcast %cst_75 : f32 to vector<17x1xf32>
    %230 = arith.divf %228, %229 : vector<17x1xf32>
    %231 = vector.broadcast %223 : vector<17x1xf32> to vector<17x32xf32>
    %232 = arith.subf %216, %231 : vector<17x32xf32>
    %cst_76 = arith.constant 9.99999997E-7 : f32
    %233 = vector.broadcast %cst_76 : f32 to vector<17x1xf32>
    %234 = arith.addf %230, %233 : vector<17x1xf32>
    %235 = math.rsqrt %234 : vector<17x1xf32>
    %236 = vector.broadcast %235 : vector<17x1xf32> to vector<17x32xf32>
    %237 = arith.mulf %232, %236 : vector<17x32xf32>
    %238 = vector.broadcast %218 : vector<1x32xf32> to vector<17x32xf32>
    %239 = arith.mulf %237, %238 : vector<17x32xf32>
    %240 = vector.broadcast %219 : vector<1x32xf32> to vector<17x32xf32>
    %241 = arith.addf %239, %240 : vector<17x32xf32>
    %c0_77 = arith.constant 0 : index
    %c0_78 = arith.constant 0 : index
    %c0_79 = arith.constant 0 : index
    %242 = vector.load %arg6[%c0_77, %c0_78, %c0_79] : memref<1x17x32xf32, #tpu.memory_space<vmem>>, vector<1x17x32xf32>
    %243 = vector.shape_cast %242 : vector<1x17x32xf32> to vector<17x32xf32>
    %244 = vector.shape_cast %241 : vector<17x32xf32> to vector<1x17x32xf32>
    tpu.vector_store %arg6[%c0_77, %c0_78, %c0_79], %244 {strides = array<i32>} : memref<1x17x32xf32, #tpu.memory_space<vmem>>, vector<1x17x32xf32>,
    return
  }
  func.func @transform_0(%arg0: i32) -> (i32, i32, i32) {
    %c0_i32 = arith.constant 0 : i32
    %c0_i32_0 = arith.constant 0 : i32
    %c0_i32_1 = arith.constant 0 : i32
    return %arg0, %c0_i32, %c0_i32_0 : i32, i32, i32
  }
  func.func @transform_1(%arg0: i32) -> (i32, i32) {
    %c0_i32 = arith.constant 0 : i32
    %c0_i32_0 = arith.constant 0 : i32
    %c0_i32_1 = arith.constant 0 : i32
    return %c0_i32, %c0_i32_0 : i32, i32
  }
  func.func @transform_2(%arg0: i32) -> (i32, i32) {
    %c0_i32 = arith.constant 0 : i32
    %c0_i32_0 = arith.constant 0 : i32
    %c0_i32_1 = arith.constant 0 : i32
    return %c0_i32, %c0_i32_0 : i32, i32
  }
  func.func @transform_3(%arg0: i32) -> (i32, i32) {
    %c0_i32 = arith.constant 0 : i32
    %c0_i32_0 = arith.constant 0 : i32
    %c0_i32_1 = arith.constant 0 : i32
    return %c0_i32, %c0_i32_0 : i32, i32
  }
  func.func @transform_4(%arg0: i32) -> (i32, i32) {
    %c0_i32 = arith.constant 0 : i32
    %c0_i32_0 = arith.constant 0 : i32
    %c0_i32_1 = arith.constant 0 : i32
    return %c0_i32, %c0_i32_0 : i32, i32
  }
  func.func @transform_5(%arg0: i32) -> (i32, i32, i32) {
    %c0_i32 = arith.constant 0 : i32
    %c0_i32_0 = arith.constant 0 : i32
    %c0_i32_1 = arith.constant 0 : i32
    return %arg0, %c0_i32, %c0_i32_0 : i32, i32, i32
  }
  func.func @transform_6(%arg0: i32) -> (i32, i32, i32, i32) {
    %c0_i32 = arith.constant 0 : i32
    %c0_i32_0 = arith.constant 0 : i32
    %c0_i32_1 = arith.constant 0 : i32
    %c0_i32_2 = arith.constant 0 : i32
    return %arg0, %c0_i32, %c0_i32_0, %c0_i32_1 : i32, i32, i32, i32
  }
}

</mosaic_0001>

<bundles_post_ra>
// kernel: transformer_forward.3
= control target key start
LH: loop header
LB: loop body
LE: loop exit
PB: predicated region body
PF: predicated region fallthrough
CT: control target
= control target key end

     0   :  { %s2896_s30 = smov 0   ;;  %s2898_s10 = smov 0   ;;  %s3309_s0 = inlined_call_operand.vmem [shape: f32[2,16,48], index: 0, kind: input, shape index: {}]   ;;  %s3310_s1 = inlined_call_operand.vmem [shape: bf16[48,32], index: 1, kind: input, shape index: {}]   ;;  %s3311_s2 = inlined_call_operand.vmem [shape: f32[1,32], index: 2, kind: input, shape index: {}]   ;;  %s3312_s3 = inlined_call_operand.vmem [shape: f32[1,1,32], index: 3, kind: input, shape index: {}]   ;;  %s3313_s4 = inlined_call_operand.vmem [shape: f32[1,17,32], index: 4, kind: input, shape index: {}]   ;;  %s3314_s5 = inlined_call_operand.vmem [shape: bf16[10,32,128], index: 5, kind: input, shape index: {}]   ;;  %s3315_s6 = inlined_call_operand.vmem [shape: bf16[10,96,128], index: 6, kind: input, shape index: {}]   ;;  %s3316_s7 = inlined_call_operand.vmem [shape: f32[10,8,128], index: 7, kind: input, shape index: {}]   ;;  %s3317_s8 = inlined_call_operand.vmem [shape: f32[2,17,32], index: 8, kind: output, shape index: {0}]   ;;  %s3318_s9 = inlined_call_operand.vmem [shape: f32[2,4,1,17], index: 9, kind: output, shape index: {1}]  }
   0x1   :  { %s2900_s11 = smov 0   ;;  %s2902_s12 = smov 0  }
   0x2   :  { %s2904_s13 = smov 0  }
   0x3 LB: > { %s29_s14 = sadd.s32 1, %s2814_s11  ;;  %s32_s15 = sadd.s32 1, %s2818_s12  ;;  %s2822_s13 = sphi %s2904_s13, %s20_s13   ;;  %s2818_s12 = sphi %s2902_s12, %s3322_s12   ;;  %s2814_s11 = sphi %s2900_s11, %s3321_s11   ;;  %s2810_s10 = sphi %s2898_s10, %s3320_s10   ;;  %s2806_s30 = sphi %s2896_s30, %s3319_s30  }
   0x4   : > { %p30_p0 = scmp.ge.s32.totalorder %s29_s14, 10  ;;  %p2272_p1 = scmp.ge.s32.totalorder %s2822_s13, 1 }
   0x5   : > { %p302_p2 = scmp.lt.s32.totalorder %s2822_s13, 21 }
   0x6   : > { %s3324_s14 = smov (%p30_p0, %s29_s14), 0  ;;  %s3326_s15 = smov (!%p30_p0, %s32_s15), %s2818_s12 }
   0x7   : > { %p303_p3 = pnand %p2272_p1, %p302_p2  ;;  %p34_p4 = scmp.ge.s32.totalorder %s3326_s15, 2 }
   0x8   : > { %p342_p5 = scmp.lt.s32.totalorder (!%p303_p3), %s2810_s10, 1  ;;  %p2277_p6 = scmp.ne.s32.totalorder (!%p303_p3), %s2806_s30, 0 }
   0x9   : > { %s3328_s15 = smov (%p34_p4, %s3326_s15), 0  ;;  %306 = sbr.rel (%p303_p3) target bundleno = 4537 (0x11b9), region = 52 }
  0x10   : > { %s3330_s10 = smov (!%p342_p5, %s2810_s10), 1  ;;  %360 = sbr.rel (%p2277_p6) target bundleno = 252 (0xfc), region = 56 }
  0x11   : > { %s2344_s16 = sshll.u32 %s3330_s10, 4  ;;  %s2619_s17 = smul.u32 24, %s3330_s10  ;;  %v473_v0 = vlaneseq (!%p2277_p6)  ;;  %v2682_v1 = vld [vmem:[%s3310_s1] sm:$0xff] (!%p2277_p6)   ;;  %v2824_v2 = vmov (!%p2277_p6), 0.0   ;;  %v2683_v5 = vld [vmem:[%s3310_s1 + $0x8] sm:$0xff] (!%p2277_p6)   ;;  %vm488_vm0 = vcmask (!%p2277_p6), 138240  }
  0x12   : > { %s2931_s20 = scalar_lea.vmem %s3309_s0, %s2344_s16  ;;  %s2276_s21 = sshll.u32 %s3330_s10, 2  ;;  %2425 = vmatprep.subr.bf16.mxu0 (!%p2277_p6), %v2824_v2  ;;  %vm2825_vm2 = vmmov (!%p2277_p6), 0   ;;  %vm491_vm3 = vcmask (!%p2277_p6), 131072   ;;  %v2684_v9 = vld [vmem:[%s3310_s1 + $0x10] sm:$0xff] (!%p2277_p6)   ;;  %vm398_vm6 = vcmask (!%p2277_p6), 392192   ;;  %v361_v15 = vld [vmem:[%s3313_s4] sm:$0xff] (!%p2277_p6) }
  0x13   : > { %s2936_s24 = scalar_lea.vmem %s3317_s8, %s2619_s17  ;;  %s2941_s27 = scalar_lea.vmem %s3318_s9, %s2276_s21  ;;  %v474_v3 = vshrl.u32 (!%p2277_p6), %v473_v0, 7  ;;  %v478_v4 = vand.u32 (!%p2277_p6), 127, %v473_v0  ;;  %2426 = vmatpush3.bf16.msra.mxu0 (!%p2277_p6), %v2682_v1  ;;  %2431 = vmatprep.mubr.msk.bf16.mxu0 (!%p2277_p6), %vm2825_vm2, %v2824_v2  ;;  %v364_v10 = vld [vmem:[%s2931_s20] sm:$0xff] (!%p2277_p6)  ;;  %v365_v11 = vld [vmem:[%s2931_s20 + $0x8] sm:$0xff] (!%p2277_p6)  ;;  %v363_v17 = vld [vmem:[%s3313_s4 + $0x10] sm:$0x1] (!%p2277_p6) }
  0x14   : > { %2427 = vmatprep.subr.bf16.mxu0 (!%p2277_p6), %v2824_v2  ;;  %v366_v14 = vpack.c.bf16 (!%p2277_p6), %v365_v11, %v364_v10  ;;  %v362_v16 = vld [vmem:[%s3313_s4 + $0x8] sm:$0xff] (!%p2277_p6)  ;;  %v449_v18 = vrot.slane (!%p2277_p6), %v361_v15, 1  ;;  %vm448_vm7 = vcmask (!%p2277_p6), 1046528   ;;  %v2278_v20 = vld [vmem:[%s3311_s2] ss:$0 sm:$0xff] (!%p2277_p6)  ;;  %v452_v21 = vrot.slane (!%p2277_p6), %v363_v17, 1 }
  0x15   : > { %v475_v6 = vadd.s32 (!%p2277_p6), 8, %v474_v3  ;;  %v476_v7 = vadd.s32 (!%p2277_p6), 16, %v474_v3  ;;  %vm479_vm1 = vcmp.eq.s32.totalorder (!%p2277_p6), %v474_v3, %v478_v4  ;;  %v450_v19 = vrot.slane (!%p2277_p6), %v362_v16, 1  ;;  %v443_v23 = vld [vmem:[%s3312_s3] sm:$0x1] (!%p2277_p6) }
  0x16   : > { %v2283_v8 = vsel (!%p2277_p6), %vm479_vm1, 1.0, %v2824_v2  ;;  %v444_v29 = vadd.f32 (!%p2277_p6), %v443_v23, %v361_v15  ;;  %vm460_vm8 = vcmask (!%p2277_p6), 1040384   ;;  %vm468_vm9 = vcmask (!%p2277_p6), 261120  }
  0x17   : > { %vm480_vm4 = vcmp.eq.s32.totalorder %v475_v6, %v478_v4  ;;  %vm481_vm5 = vcmp.eq.s32.totalorder %v476_v7, %v478_v4  ;;  %489 = vst.msk [vmem:[#allocation3] sm:$0xff] %vm488_vm0, %v2283_v8  ;;  %493 = vst.msk [vmem:[#allocation3 + $0x18] sm:$0xff] %vm488_vm0, %v2283_v8  ;;  %2428 = vmatpush3.bf16.msra.mxu0 %v2683_v5  ;;  %v451_v24 = vsel %vm448_vm7, %v449_v18, %v450_v19  ;;  %vm471_vm10 = vcmask 253952  }
  0x18   : > { %496 = vst.msk [vmem:[#allocation3 + $0x30] sm:$0xff] %vm488_vm0, %v2283_v8  ;;  %499 = vst.msk [vmem:[#allocation3 + $0x48] sm:$0xff] %vm488_vm0, %v2283_v8  ;;  %v2284_v12 = vsel %vm480_vm4, 1.0, %v2824_v2  ;;  %v2285_v13 = vsel %vm481_vm5, 1.0, %v2824_v2  ;;  %2429 = vmatprep.subr.bf16.mxu0 %v2824_v2  ;;  %v453_v28 = vsel %vm448_vm7, %v450_v19, %v452_v21 }
  0x19   : > { %490 = vst.msk [vmem:[#allocation3 + $0x8] sm:$0xff] %vm488_vm0, %v2284_v12  ;;  %494 = vst.msk [vmem:[#allocation3 + $0x20] sm:$0xff] %vm488_vm0, %v2284_v12 }
  0x1a   : > { %492 = vst.msk [vmem:[#allocation3 + $0x10] sm:$0x1] %vm491_vm3, %v2285_v13  ;;  %495 = vst.msk [vmem:[#allocation3 + $0x28] sm:$0x1] %vm491_vm3, %v2285_v13 }
  0x1b   : > { %497 = vst.msk [vmem:[#allocation3 + $0x38] sm:$0xff] %vm488_vm0, %v2284_v12  ;;  %500 = vst.msk [vmem:[#allocation3 + $0x50] sm:$0xff] %vm488_vm0, %v2284_v12  ;;  %2430 = vmatpush3.bf16.msra.mxu0 %v2684_v9 }
  0x1c   : > { %498 = vst.msk [vmem:[#allocation3 + $0x40] sm:$0x1] %vm491_vm3, %v2285_v13  ;;  %501 = vst.msk [vmem:[#allocation3 + $0x58] sm:$0x1] %vm491_vm3, %v2285_v13 }
  0x1e   : > { %2432 = vmatmul.mubr.msk.bf16.vlgmr.msra.gmra.mrb[0].mxu0 %vm398_vm6, %v366_v14 }
  0xf1   : > { %v436_v22 = vpop.f32.mrb[0].mxu0 }
  0xf2   : > { %v437_v25 = vadd.f32 %v2278_v20, %v436_v22  ;;  %v2433_v26 = vpop.f32.mrb[1].mxu0 }
  0xf3   : > { %v439_v27 = vpop.f32.mrb[2].mxu0 }
  0xf4   : > { %v456_v30 = vadd.f32 %v451_v24, %v437_v25  ;;  %v440_v31 = vadd.f32 %v2278_v20, %v439_v27  ;;  %v2434_v32 = vpop.f32.mrb[3].mxu0 }
  0xf6   : > { %v461_v33 = vrot.slane %v456_v30, 7  ;;  %v457_v34 = vadd.f32 %v453_v28, %v440_v31 }
  0xf8   : > { %v467_v35 = vsel %vm460_vm8, %v444_v29, %v461_v33  ;;  %v462_v36 = vrot.slane %v457_v34, 7 }
  0xf9   : > { %469 = vst.msk [vmem:[#allocation2] sm:$0xff] %vm468_vm9, %v467_v35 }
  0xfa   : > { %v463_v37 = vsel %vm460_vm8, %v461_v33, %v462_v36  ;;  %472 = vst.msk [vmem:[#allocation2 + $0x10] sm:$0x1] %vm471_vm10, %v462_v36 }
  0xfb   : > { %470 = vst.msk [vmem:[#allocation2 + $0x8] sm:$0xff] %vm468_vm9, %v463_v37 }
  0xfc PF: > { %vm530_vm11 = vcmask 261120   ;;  %vm537_vm12 = vcmask 253952   ;;  %s2345_s16 = sshll.u32 %s2806_s30, 4  ;;  %v572_v4 = vlaneseq  ;;  %s2289_s20 = sshll.u32 %s2806_s30, 3  ;;  %vm666_vm13 = vcmask 64512  }
  0xfd   : > { %s504_s19 = scalar_lea.vmem %s3314_s5, %s2345_s16  ;;  %s3006_s23 = scalar_lea.vmem %s3316_s7, %s2289_s20  ;;  %vm730_vm14 = vcmask 138240   ;;  %vm737_vm15 = vcmask 131072   ;;  %vm777_vm0 = vcmask 1040384   ;;  %vm2831_vm1 = vmmov 0  }
  0xfe   : > { %v2992_v59 = vld [vmem:[%s504_s19] sm:$0xff]   ;;  %v2994_v60 = vld [vmem:[%s504_s19 + $0x8] sm:$0xff]   ;;  %v3001_v7 = vshrl.u32 %v572_v4, 7  ;;  %s2826_s25 = smov 96   ;;  %s2829_s26 = smov 88   ;;  %vm1774_vm2 = vcmask 195584  }
  0xff   : > { %2435 = vmatprep.subr.bf16.mxu0 %v2992_v59  ;;  %v3010_v9 = vld [vmem:[%s3006_s23] sm:$0xff]  ;;  %s2830_s28 = smov 120   ;;  %s2832_s29 = smov 64   ;;  %vm1770_vm3 = vcmask 130048   ;;  %vm2083_vm7 = vcmask 523264  }
 0x100   : > { %v527_v38 = vld [vmem:[#allocation2] sm:$0xff]  ;;  %2436 = vmatpush3.bf16.msra.mxu0 %v2992_v59  ;;  %v574_v8 = vsub.s32 0, %v3001_v7  ;;  %v581_v13 = vsub.s32 1, %v3001_v7  ;;  %v590_v27 = vsub.s32 2, %v3001_v7  ;;  %s2834_s10 = smov 80   ;;  %s2835_s16 = smov 112  }
 0x101   : > { %v529_v39 = vld [vmem:[#allocation2 + $0x10] sm:$0x1]  ;;  %v531_v41 = vsel %vm530_vm11, %v527_v38, 0.0  ;;  %2437 = vmatprep.subr.bf16.mxu0 %v2994_v60  ;;  %s2836_s17 = smov 56   ;;  %s2837_s18 = smov 72  }
 0x102   : > { %v528_v40 = vld [vmem:[#allocation2 + $0x8] sm:$0xff]  ;;  %v538_v42 = vsel %vm537_vm12, %v529_v39, 0.0  ;;  %532 = vadd.xlane.f32.xlu0 %v531_v41  ;;  %v575_v12 = vrot.slane %v3010_v9, %v574_v8  ;;  %v582_v19 = vrot.slane %v3010_v9, %v581_v13  ;;  %v591_v28 = vrot.slane %v3010_v9, %v590_v27  ;;  %s2838_s19 = smov 104   ;;  %s2839_s20 = smov 48  }
 0x103   : > { %539 = vadd.xlane.f32.xlu1 %v538_v42  ;;  %v534_v43 = vsel %vm530_vm11, %v528_v40, 0.0  ;;  %s2840_s21 = smov 40   ;;  %s2841_s22 = smov 32  }
 0x104   : > { %2438 = vmatpush3.bf16.msra.mxu0 %v2994_v60  ;;  %p2338_p7 = scmp.ne.s32.totalorder %s2806_s30, 9 }
 0x106   : > { %535 = vadd.xlane.f32.xlu0 %v534_v43 }
 0x18f   : > { %v533_v44 = vpop.xlane.xlu0 %532 }
 0x190   : > { %v540_v45 = vpop.xlane.xlu1 %539  ;;  %v542_v46 = vmul.f32 0.03125, %v533_v44 }
 0x191   : > { %v544_v47 = vmul.f32 0.03125, %v540_v45 }
 0x192   : > { %v545_v48 = vsub.f32 %v527_v38, %v542_v46 }
 0x193   : > { %v547_v49 = vsub.f32 %v529_v39, %v544_v47  ;;  %v536_v50 = vpop.xlane.xlu0 %535 }
 0x194   : > { %v543_v51 = vmul.f32 0.03125, %v536_v50  ;;  %v548_v52 = vmul.f32 %v545_v48, %v545_v48 }
 0x195   : > { %v550_v53 = vmul.f32 %v547_v49, %v547_v49 }
 0x196   : > { %v546_v54 = vsub.f32 %v528_v40, %v543_v51  ;;  %v551_v55 = vsel %vm530_vm11, %v548_v52, 0.0  ;;  %v765_v52 = vld [vmem:[#allocation3] sm:$0xff] }
 0x197   : > { %552 = vadd.xlane.f32.xlu1 %v551_v55  ;;  %v557_v56 = vsel %vm537_vm12, %v550_v53, 0.0  ;;  %v766_v53 = vld [vmem:[#allocation3 + $0x8] sm:$0xff] }
 0x198   : > { %v549_v57 = vmul.f32 %v546_v54, %v546_v54  ;;  %v2596_v55 = vpack.c.bf16 %v766_v53, %v765_v52 }
 0x19a   : > { %v554_v58 = vsel %vm530_vm11, %v549_v57, 0.0 }
 0x19b   : > { %558 = vadd.xlane.f32.xlu1 %v557_v56  ;;  %555 = vadd.xlane.f32.xlu0 %v554_v58 }
 0x224   : > { %v553_v61 = vpop.xlane.xlu1 %552 }
 0x225   : > { %v560_v62 = vmul.f32 0.03125, %v553_v61 }
 0x227   : > { %v563_v63 = vadd.f32 1e-06, %v560_v62 }
 0x228   : > { %v559_v0 = vpop.xlane.xlu1 %558  ;;  %v556_v1 = vpop.xlane.xlu0 %555 }
 0x229   : > { %2708 = vrsqrt.f32 %v563_v63  ;;  %v562_v2 = vmul.f32 0.03125, %v559_v0  ;;  %v561_v3 = vmul.f32 0.03125, %v556_v1 }
 0x22b   : > { %v565_v5 = vadd.f32 1e-06, %v562_v2  ;;  %v564_v6 = vadd.f32 1e-06, %v561_v3 }
 0x22d   : > { %2710 = vrsqrt.f32 %v565_v5 }
 0x22e   : > { %2712 = vrsqrt.f32 %v564_v6 }
 0x233   : > { %v2709_v10 = vpop.eup %2708 }
 0x234   : > { %v569_v11 = vmul.f32 %v2709_v10, %v545_v48 }
 0x236   : > { %v576_v18 = vmul.f32 %v575_v12, %v569_v11  ;;  %v767_v11 = vld [vmem:[#allocation3 + $0x10] sm:$0x1] }
 0x237   : > { %v2711_v14 = vpop.eup %2710 }
 0x238   : > { %v2713_v15 = vpop.eup %2712  ;;  %v571_v16 = vmul.f32 %v2711_v14, %v547_v49  ;;  %v583_v23 = vadd.f32 %v582_v19, %v576_v18 }
 0x239   : > { %v570_v17 = vmul.f32 %v2713_v15, %v546_v54  ;;  %v2827_v54 = vmov 0.0|0.0  }
 0x23a   : > { %v578_v20 = vmul.f32 %v575_v12, %v571_v16  ;;  %2595 = vmatprep.subr.bf16.mxu0 %v2827_v54 }
 0x23b   : > { %v577_v21 = vmul.f32 %v575_v12, %v570_v17  ;;  %v2828_v12 = vmov 0.0  }
 0x23c   : > { %v585_v22 = vadd.f32 %v582_v19, %v578_v20 }
 0x23d   : > { %v584_v24 = vadd.f32 %v582_v19, %v577_v21 }
 0x23e   : > { %v587_v25 = vpack.c.bf16 %v585_v22, %v585_v22 }
 0x23f   : > { %v586_v26 = vpack.c.bf16 %v584_v24, %v583_v23 }
 0x241   : > { %2439 = vmatprep.mubr.msk.bf16.mxu0 %vm530_vm11, %v586_v26 }
 0x242   : > { %2440 = vmatmul.mubr.msk.bf16.vlgmr.msra.gmra.mrb[0].mxu0 %vm530_vm11, %v587_v25 }
 0x243   : > { %2597 = vmatpush3.bf16.msra.mxu0 %v2596_v55  ;;  %2457 = vmatprep.mubr.msk.f32.mxu0 %vm2831_vm1, %v2828_v12 }
 0x244   : > { %2455 = vmatprep.subr.mxu0 %v2828_v12 }
 0x247   : > { %2456 = vmatpush3.msk.msra.mxu0 %vm777_vm0, %v767_v11 }
 0x315   : > { %v2441_v29 = vpop.f32.mrb[0].mxu0 }
 0x316   : > { %v653_v30 = vadd.f32 %v2441_v29, %v591_v28  ;;  %v644_v31 = vpop.f32.mrb[1].mxu0 }
 0x317   : > { %v2442_v32 = vpop.f32.mrb[2].mxu0  ;;  %v645_v35 = vadd.f32 %v644_v31, %v591_v28 }
 0x318   : > { %v3019_v33 = vpack.c.bf16 %v653_v30, %v653_v30  ;;  %v647_v34 = vpop.f32.mrb[3].mxu0 }
 0x319   : > { %v648_v36 = vadd.f32 %v647_v34, %v591_v28 }
 0x31a   : > { %664 = vrot.lane.b32.xlu1 %v3019_v33, %s2826_s25 }
 0x31b   : > { %v3022_v37 = vpack.c.bf16 %v648_v36, %v645_v35 }
 0x31d   : > { %662 = vrot.lane.b32.xlu0 %v3022_v37, %s2826_s25  ;;  %2447 = vmatprep.mubr.msk.bf16.mxu1 %vm666_vm13, %v3022_v37  ;;  %s2842_s25 = smov 8  }
 0x38c   : > { %v665_v40 = vpop.permute.xlu1 %664 }
 0x38d   : > { %v677_v41 = vsel %vm666_vm13, %v665_v40, 0 }
 0x38f   : > { %v663_v38 = vpop.permute.xlu0 %662 }
 0x390   : > { %2611 = vmatprep.subr.msk.bf16.mxu1 %vm666_vm13, %v663_v38  ;;  %v674_v39 = vsel %vm666_vm13, %v663_v38, 0 }
 0x391   : > { %2444 = vmatpush3.bf16.xpose.msra.mxu1 %v674_v39 }
 0x392   : > { %2612 = vmatprep.subr.msk.bf16.mxu1 %vm666_vm13, %v665_v40 }
 0x399   : > { %2446 = vmatpush3.bf16.xpose.msra.mxu1 %v677_v41 }
 0x3a0   : > { %2448 = vmatmul.mubr.msk.bf16.vlgmr.msra.gmra.mrb[0].mxu1 %vm666_vm13, %v3019_v33 }
 0x473   : > { %v2449_v42 = vpop.f32.mrb[0].mxu1 }
 0x474   : > { %v713_v43 = vpop.f32.mrb[1].mxu1  ;;  %v729_v49 = vmul.f32 0.35355338, %v2449_v42 }
 0x475   : > { %v727_v44 = vmul.f32 0.35355338, %v713_v43  ;;  %v2450_v45 = vpop.f32.mrb[2].mxu1 }
 0x476   : > { %v716_v46 = vpop.f32.mrb[3].mxu1  ;;  %v738_v51 = vsel %vm737_vm15, %v729_v49, -inf }
 0x477   : > { %v728_v47 = vmul.f32 0.35355338, %v716_v46  ;;  %v731_v48 = vsel %vm730_vm14, %v727_v44, -inf }
 0x478   : > { %732 = vmax.xlane.f32.xlu1 %v731_v48 }
 0x479   : > { %v734_v50 = vsel %vm730_vm14, %v728_v47, -inf }
 0x47a   : > { %735 = vmax.xlane.f32.xlu0 %v734_v50 }
 0x47e   : > { %739 = vmax.xlane.f32.xlu0 %v738_v51 }
 0x505   : > { %v733_v56 = vpop.xlane.xlu1 %732 }
 0x506   : > { %v741_v61 = vsub.f32 %v727_v44, %v733_v56  ;;  %v2833_v56 = vmov 0  }
 0x507   : > { %v736_v57 = vpop.xlane.xlu0 %735 }
 0x508   : > { %v742_v58 = vsub.f32 %v728_v47, %v736_v57  ;;  %v744_v1 = vmul.f32 1.442695, %v741_v61  ;;  %v3071_v57 = vsel %vm777_vm0, 65535, %v2833_v56 }
 0x50a   : > { %v746_v62 = vmul.f32 1.442695, %v742_v58 }
 0x50b   : > { %v740_v63 = vpop.xlane.xlu0 %739 }
 0x50c   : > { %2714 = vpow2.f32 %v746_v62  ;;  %v743_v0 = vsub.f32 %v729_v49, %v740_v63 }
 0x50e   : > { %v748_v2 = vmul.f32 1.442695, %v743_v0 }
 0x510   : > { %2716 = vpow2.f32 %v748_v2 }
 0x511   : > { %2718 = vpow2.f32 %v744_v1 }
 0x516   : > { %v2715_v3 = vpop.eup %2714 }
 0x517   : > { %v753_v4 = vsel %vm730_vm14, %v2715_v3, 0.0 }
 0x518   : > { %754 = vadd.xlane.f32.xlu0 %v753_v4 }
 0x51a   : > { %v2717_v5 = vpop.eup %2716 }
 0x51b   : > { %v756_v6 = vsel %vm737_vm15, %v2717_v5, 0.0  ;;  %v2719_v8 = vpop.eup %2718 }
 0x51c   : > { %757 = vadd.xlane.f32.xlu1 %v756_v6  ;;  %v750_v10 = vsel %vm730_vm14, %v2719_v8, 0.0 }
 0x520   : > { %751 = vadd.xlane.f32.xlu1 %v750_v10  ;;  %v1036_v10 = vld [vmem:[#allocation3 + $0x20] sm:$0xff] }
 0x52e   : > { %934 = vrot.lane.b32.xlu0 %v3022_v37, %s2829_s26 }
 0x531   : > { %936 = vrot.lane.b32.xlu1 %v3019_v33, %s2829_s26  ;;  %s2843_s26 = smov 16  }
 0x535   : > { %930 = vrot.lane.b32.xlu1 %v3022_v37, %s2830_s28 }
 0x539   : > { %932 = vrot.lane.b32.xlu1 %v3019_v33, %s2830_s28  ;;  %s2844_s28 = smov 24  }
 0x5a5   : > { %v755_v13 = vpop.xlane.xlu0 %754 }
 0x5a6   : > { %2720 = vrcp.f32 %v755_v13  ;;  %v1037_v13 = vld [vmem:[#allocation3 + $0x28] sm:$0x1] }
 0x5a9   : > { %v758_v14 = vpop.xlane.xlu1 %757  ;;  %v935_v15 = vpop.permute.xlu0 %934 }
 0x5aa   : > { %2613 = vmatprep.subr.msk.bf16.mxu0 %vm666_vm13, %v935_v15  ;;  %v945_v21 = vsel %vm666_vm13, %v935_v15, 0 }
 0x5ad   : > { %v752_v16 = vpop.xlane.xlu1 %751 }
 0x5ae   : > { %2722 = vrcp.f32 %v752_v16 }
 0x5af   : > { %2724 = vrcp.f32 %v758_v14 }
 0x5b0   : > { %v2721_v17 = vpop.eup %2720 }
 0x5b1   : > { %v763_v20 = vmul.f32 %v2721_v17, %v2715_v3  ;;  %v937_v23 = vpop.permute.xlu1 %936 }
 0x5b2   : > { %v948_v26 = vsel %vm666_vm13, %v937_v23, 0 }
 0x5b5   : > { %v931_v27 = vpop.permute.xlu1 %930 }
 0x5b8   : > { %v2723_v18 = vpop.eup %2722 }
 0x5b9   : > { %v762_v19 = vmul.f32 %v2723_v18, %v2719_v8  ;;  %v2725_v24 = vpop.eup %2724  ;;  %v933_v28 = vpop.permute.xlu1 %932  ;;  %v1035_v8 = vld [vmem:[#allocation3 + $0x18] sm:$0xff] }
 0x5ba   : > { %v764_v25 = vmul.f32 %v2725_v24, %v2717_v5  ;;  %v2599_v11 = vpack.c.bf16 %v1036_v10, %v1035_v8 }
 0x5bb   : > { %2458 = vmatmul.mubr.msk.f32.vlgmr.msra.gmra.mrb[4].mxu0 %vm730_vm14, %v762_v19  ;;  %v864_v22 = vpack.c.bf16 %v763_v20, %v762_v19 }
 0x5bc   : > { %2475 = vmatpush3.bf16.xpose.msra.mxu0 %v945_v21  ;;  %2460 = vmatprep.mubr.msk.f32.mxu0 %vm2831_vm1, %v2828_v12  ;;  %v865_v1 = vpack.c.bf16 %v764_v25, %v764_v25 }
 0x5bd   : > { %2614 = vmatprep.subr.msk.bf16.mxu0 %vm666_vm13, %v937_v23  ;;  %2470 = vmatprep.mubr.msk.bf16.mxu1 %vm730_vm14, %v864_v22 }
 0x5bf   : > { %2461 = vmatmul.mubr.msk.f32.gmra.mrb[6].mxu0 %vm730_vm14, %v763_v20 }
 0x5c0   : > { %2463 = vmatprep.mubr.msk.f32.mxu0 %vm2831_vm1, %v2828_v12 }
 0x5c3   : > { %2464 = vmatmul.mubr.msk.f32.gmra.mrb[8].mxu0 %vm730_vm14, %v764_v25 }
 0x5c4   : > { %2477 = vmatpush3.bf16.xpose.msra.mxu0 %v948_v26  ;;  %2478 = vmatprep.mubr.msk.bf16.mxu0 %vm666_vm13, %v931_v27 }
 0x5cb   : > { %2479 = vmatmul.mubr.msk.bf16.vlgmr.msra.gmra.mrb[12].mxu0 %vm666_vm13, %v933_v28 }
 0x68e   : > { %v847_v29 = vpop.f32.mrb[4].mxu0 }
 0x68f   : > { %861 = vst.msk [vmem:[#allocation3] sm:$0xff] %vm730_vm14, %v847_v29  ;;  %v2459_v30 = vpop.f32.mrb[5].mxu0 }
 0x692   : > { %v852_v31 = vpop.f32.mrb[6].mxu0 }
 0x693   : > { %862 = vst.msk [vmem:[#allocation3 + $0x8] sm:$0xff] %vm730_vm14, %v852_v31  ;;  %v2462_v32 = vpop.f32.mrb[7].mxu0 }
 0x696   : > { %v857_v34 = vpop.f32.mrb[8].mxu0 }
 0x697   : > { %863 = vst.msk [vmem:[#allocation3 + $0x10] sm:$0x1] %vm737_vm15, %v857_v34  ;;  %v2465_v35 = vpop.f32.mrb[9].mxu0 }
 0x69e   : > { %v2480_v36 = vpop.f32.mrb[12].mxu0 }
 0x69f   : > { %v984_v38 = vpop.f32.mrb[13].mxu0  ;;  %v1000_v42 = vmul.f32 0.35355338, %v2480_v36 }
 0x6a0   : > { %v998_v39 = vmul.f32 0.35355338, %v984_v38  ;;  %v2481_v40 = vpop.f32.mrb[14].mxu0 }
 0x6a1   : > { %v987_v41 = vpop.f32.mrb[15].mxu0  ;;  %v1007_v46 = vsel %vm737_vm15, %v1000_v42, -inf }
 0x6a2   : > { %v999_v43 = vmul.f32 0.35355338, %v987_v41  ;;  %v1001_v44 = vsel %vm730_vm14, %v998_v39, -inf }
 0x6a3   : > { %1002 = vmax.xlane.f32.xlu0 %v1001_v44 }
 0x6a4   : > { %v1004_v45 = vsel %vm730_vm14, %v999_v43, -inf }
 0x6a5   : > { %1005 = vmax.xlane.f32.xlu1 %v1004_v45 }
 0x6a7   : > { %1008 = vmax.xlane.f32.xlu0 %v1007_v46 }
 0x6b6   : > { %868 = vrot.lane.b32.xlu1 %v3019_v33, %s2832_s29 }
 0x6bd   : > { %866 = vrot.lane.b32.xlu0 %v3022_v37, %s2832_s29  ;;  %s2346_s29 = smul.u32 48, %s2806_s30 }
 0x730   : > { %v1003_v47 = vpop.xlane.xlu0 %1002 }
 0x731   : > { %v1010_v48 = vsub.f32 %v998_v39, %v1003_v47 }
 0x732   : > { %v1006_v49 = vpop.xlane.xlu1 %1005 }
 0x733   : > { %v1013_v50 = vmul.f32 1.442695, %v1010_v48  ;;  %v1011_v51 = vsub.f32 %v999_v43, %v1006_v49 }
 0x734   : > { %v1009_v52 = vpop.xlane.xlu0 %1008 }
 0x735   : > { %2726 = vpow2.f32 %v1013_v50  ;;  %v1015_v53 = vmul.f32 1.442695, %v1011_v51  ;;  %v1012_v55 = vsub.f32 %v1000_v42, %v1009_v52 }
 0x736   : > { %v869_v58 = vpop.permute.xlu1 %868 }
 0x737   : > { %2728 = vpow2.f32 %v1015_v53  ;;  %v1017_v61 = vmul.f32 1.442695, %v1012_v55  ;;  %v880_v63 = vand.u32 %v3071_v57, %v869_v58 }
 0x738   : > { %v867_v62 = vpop.permute.xlu0 %866 }
 0x739   : > { %2730 = vpow2.f32 %v1017_v61  ;;  %2466 = vmatprep.subr.bf16.mxu1 %v867_v62 }
 0x73a   : > { %2467 = vmatpush3.bf16.msra.mxu1 %v867_v62 }
 0x73b   : > { %2468 = vmatprep.subr.bf16.mxu1 %v880_v63 }
 0x73e   : > { %2469 = vmatpush3.bf16.msra.mxu1 %v880_v63 }
 0x73f   : > { %v2727_v0 = vpop.eup %2726  ;;  %2598 = vmatprep.subr.bf16.mxu1 %v2827_v54 }
 0x740   : > { %v1019_v2 = vsel %vm730_vm14, %v2727_v0, 0.0 }
 0x741   : > { %v2729_v3 = vpop.eup %2728  ;;  %1020 = vadd.xlane.f32.xlu0 %v1019_v2  ;;  %2471 = vmatmul.mubr.msk.bf16.vlgmr.msra.gmra.mrb[4].mxu1 %vm730_vm14, %v865_v1 }
 0x742   : > { %v1022_v4 = vsel %vm730_vm14, %v2729_v3, 0.0  ;;  %2488 = vmatprep.mubr.msk.f32.mxu1 %vm2831_vm1, %v2828_v12  ;;  %2600 = vmatpush3.bf16.msra.mxu1 %v2599_v11 }
 0x743   : > { %v2731_v5 = vpop.eup %2730  ;;  %1023 = vadd.xlane.f32.xlu1 %v1022_v4  ;;  %2486 = vmatprep.subr.mxu1 %v2828_v12 }
 0x744   : > { %v1025_v6 = vsel %vm737_vm15, %v2731_v5, 0.0 }
 0x746   : > { %2487 = vmatpush3.msk.msra.mxu1 %vm777_vm0, %v1037_v13 }
 0x747   : > { %1026 = vadd.xlane.f32.xlu1 %v1025_v6 }
 0x757   : > { %1201 = vrot.lane.b32.xlu0 %v3022_v37, %s2834_s10 }
 0x75b   : > { %1203 = vrot.lane.b32.xlu0 %v3019_v33, %s2834_s10 }
 0x75f   : > { %1197 = vrot.lane.b32.xlu0 %v3022_v37, %s2835_s16 }
 0x763   : > { %1199 = vrot.lane.b32.xlu0 %v3019_v33, %s2835_s16 }
 0x7ce   : > { %v1021_v14 = vpop.xlane.xlu0 %1020 }
 0x7cf   : > { %2732 = vrcp.f32 %v1021_v14  ;;  %v1302_v14 = vld [vmem:[#allocation3 + $0x30] sm:$0xff] }
 0x7d0   : > { %v1024_v15 = vpop.xlane.xlu1 %1023 }
 0x7d1   : > { %2734 = vrcp.f32 %v1024_v15  ;;  %v1303_v15 = vld [vmem:[#allocation3 + $0x38] sm:$0xff] }
 0x7d2   : > { %v1202_v16 = vpop.permute.xlu0 %1201 }
 0x7d3   : > { %2615 = vmatprep.subr.msk.bf16.mxu1 %vm666_vm13, %v1202_v16  ;;  %v1212_v21 = vsel %vm666_vm13, %v1202_v16, 0  ;;  %v2602_v16 = vpack.c.bf16 %v1303_v15, %v1302_v14 }
 0x7d4   : > { %v1027_v17 = vpop.xlane.xlu1 %1026 }
 0x7d5   : > { %2736 = vrcp.f32 %v1027_v17 }
 0x7d6   : > { %v1204_v23 = vpop.permute.xlu0 %1203 }
 0x7d7   : > { %v1215_v27 = vsel %vm666_vm13, %v1204_v23, 0 }
 0x7d9   : > { %v2733_v18 = vpop.eup %2732 }
 0x7da   : > { %v1031_v19 = vmul.f32 %v2733_v18, %v2727_v0  ;;  %v1198_v28 = vpop.permute.xlu0 %1197  ;;  %v1304_v18 = vld [vmem:[#allocation3 + $0x40] sm:$0x1] }
 0x7db   : > { %v2735_v20 = vpop.eup %2734 }
 0x7dc   : > { %2489 = vmatmul.mubr.msk.f32.vlgmr.msra.gmra.mrb[8].mxu1 %vm730_vm14, %v1031_v19  ;;  %v1032_v22 = vmul.f32 %v2735_v20, %v2729_v3 }
 0x7dd   : > { %2506 = vmatpush3.bf16.xpose.msra.mxu1 %v1212_v21  ;;  %2491 = vmatprep.mubr.msk.f32.mxu1 %vm2831_vm1, %v2828_v12 }
 0x7de   : > { %2616 = vmatprep.subr.msk.bf16.mxu1 %vm666_vm13, %v1204_v23  ;;  %v1133_v24 = vpack.c.bf16 %v1032_v22, %v1031_v19  ;;  %v1200_v29 = vpop.permute.xlu0 %1199 }
 0x7df   : > { %v2737_v25 = vpop.eup %2736 }
 0x7e0   : > { %2492 = vmatmul.mubr.msk.f32.gmra.mrb[10].mxu1 %vm730_vm14, %v1032_v22  ;;  %2501 = vmatprep.mubr.msk.bf16.mxu0 %vm730_vm14, %v1133_v24  ;;  %v3097_v26 = vmul.f32 %v2737_v25, %v2731_v5 }
 0x7e1   : > { %2494 = vmatprep.mubr.msk.f32.mxu1 %vm2831_vm1, %v2828_v12 }
 0x7e2   : > { %v1134_v17 = vpack.c.bf16 %v3097_v26, %v3097_v26 }
 0x7e4   : > { %2495 = vmatmul.mubr.msk.f32.gmra.mrb[12].mxu1 %vm730_vm14, %v3097_v26 }
 0x7e5   : > { %2508 = vmatpush3.bf16.xpose.msra.mxu1 %v1215_v27  ;;  %2509 = vmatprep.mubr.msk.bf16.mxu1 %vm666_vm13, %v1198_v28 }
 0x7ec   : > { %2510 = vmatmul.mubr.msk.bf16.vlgmr.msra.gmra.mrb[16].mxu1 %vm666_vm13, %v1200_v29 }
 0x814   : > { %v3104_v30 = vpop.f32.mrb[4].mxu1 }
 0x815   : > { %v3106_v31 = vpop.f32.mrb[5].mxu1 }
 0x816   : > { %v2473_v32 = vpop.f32.mrb[6].mxu1 }
 0x817   : > { %v3108_v34 = vpop.f32.mrb[7].mxu1 }
 0x8af   : > { %v1116_v35 = vpop.f32.mrb[8].mxu1 }
 0x8b0   : > { %1130 = vst.msk [vmem:[#allocation3 + $0x18] sm:$0xff] %vm730_vm14, %v1116_v35  ;;  %v2490_v36 = vpop.f32.mrb[9].mxu1 }
 0x8b3   : > { %v1121_v38 = vpop.f32.mrb[10].mxu1 }
 0x8b4   : > { %1131 = vst.msk [vmem:[#allocation3 + $0x20] sm:$0xff] %vm730_vm14, %v1121_v38  ;;  %v2493_v39 = vpop.f32.mrb[11].mxu1 }
 0x8b7   : > { %v1126_v40 = vpop.f32.mrb[12].mxu1 }
 0x8b8   : > { %1132 = vst.msk [vmem:[#allocation3 + $0x28] sm:$0x1] %vm737_vm15, %v1126_v40  ;;  %v2496_v41 = vpop.f32.mrb[13].mxu1 }
 0x8bf   : > { %v2511_v42 = vpop.f32.mrb[16].mxu1 }
 0x8c0   : > { %v1251_v43 = vpop.f32.mrb[17].mxu1  ;;  %v1267_v49 = vmul.f32 0.35355338, %v2511_v42 }
 0x8c1   : > { %v1265_v44 = vmul.f32 0.35355338, %v1251_v43  ;;  %v2512_v45 = vpop.f32.mrb[18].mxu1 }
 0x8c2   : > { %v1254_v46 = vpop.f32.mrb[19].mxu1  ;;  %v1274_v51 = vsel %vm737_vm15, %v1267_v49, -inf }
 0x8c3   : > { %v1266_v47 = vmul.f32 0.35355338, %v1254_v46  ;;  %v1268_v48 = vsel %vm730_vm14, %v1265_v44, -inf }
 0x8c4   : > { %1269 = vmax.xlane.f32.xlu0 %v1268_v48 }
 0x8c5   : > { %v1271_v50 = vsel %vm730_vm14, %v1266_v47, -inf }
 0x8c6   : > { %1272 = vmax.xlane.f32.xlu1 %v1271_v50 }
 0x8ca   : > { %1275 = vmax.xlane.f32.xlu1 %v1274_v51 }
 0x8da   : > { %1135 = vrot.lane.b32.xlu0 %v3022_v37, %s2836_s17 }
 0x8de   : > { %1468 = vrot.lane.b32.xlu0 %v3022_v37, %s2837_s18 }
 0x8e2   : > { %1470 = vrot.lane.b32.xlu0 %v3019_v33, %s2837_s18 }
 0x8e6   : > { %1464 = vrot.lane.b32.xlu0 %v3022_v37, %s2838_s19 }
 0x8ea   : > { %1466 = vrot.lane.b32.xlu0 %v3019_v33, %s2838_s19 }
 0x951   : > { %v1270_v52 = vpop.xlane.xlu0 %1269 }
 0x952   : > { %v1277_v53 = vsub.f32 %v1265_v44, %v1270_v52 }
 0x953   : > { %v1273_v62 = vpop.xlane.xlu1 %1272 }
 0x954   : > { %v1280_v55 = vmul.f32 1.442695, %v1277_v53  ;;  %v1278_v63 = vsub.f32 %v1266_v47, %v1273_v62 }
 0x955   : > { %v1136_v56 = vpop.permute.xlu0 %1135 }
 0x956   : > { %2738 = vpow2.f32 %v1280_v55  ;;  %2497 = vmatprep.subr.bf16.mxu0 %v1136_v56  ;;  %v1282_v1 = vmul.f32 1.442695, %v1278_v63 }
 0x957   : > { %2498 = vmatpush3.bf16.msra.mxu0 %v1136_v56  ;;  %v1276_v0 = vpop.xlane.xlu1 %1275 }
 0x958   : > { %v1279_v2 = vsub.f32 %v1267_v49, %v1276_v0  ;;  %2740 = vpow2.f32 %v1282_v1 }
 0x959   : > { %v1469_v20 = vpop.permute.xlu0 %1468 }
 0x95a   : > { %v1284_v3 = vmul.f32 1.442695, %v1279_v2  ;;  %v1479_v22 = vsel %vm666_vm13, %v1469_v20, 0 }
 0x95c   : > { %2742 = vpow2.f32 %v1284_v3 }
 0x95d   : > { %v1471_v23 = vpop.permute.xlu0 %1470 }
 0x95e   : > { %v1482_v24 = vsel %vm666_vm13, %v1471_v23, 0 }
 0x960   : > { %v2739_v58 = vpop.eup %2738 }
 0x961   : > { %v1286_v61 = vsel %vm730_vm14, %v2739_v58, 0.0  ;;  %v1465_v35 = vpop.permute.xlu0 %1464 }
 0x962   : > { %1287 = vadd.xlane.f32.xlu1 %v1286_v61  ;;  %v2741_v4 = vpop.eup %2740 }
 0x963   : > { %v1289_v5 = vsel %vm730_vm14, %v2741_v4, 0.0 }
 0x965   : > { %v1467_v38 = vpop.permute.xlu0 %1466 }
 0x966   : > { %v2743_v6 = vpop.eup %2742 }
 0x967   : > { %v1292_v8 = vsel %vm737_vm15, %v2743_v6, 0.0 }
 0x973   : > { %1137 = vrot.lane.b32.xlu1 %v3019_v33, %s2836_s17  ;;  %s3228_s17 = scalar_lea.vmem %s3315_s6, %s2346_s29 }
 0x997   : > { %1290 = vadd.xlane.f32.xlu1 %v1289_v5 }
 0x99b   : > { %1293 = vadd.xlane.f32.xlu1 %v1292_v8 }
 0x9ef   : > { %v1288_v10 = vpop.xlane.xlu1 %1287 }
 0x9f0   : > { %2744 = vrcp.f32 %v1288_v10 }
 0x9f3   : > { %v1138_v11 = vpop.permute.xlu1 %1137 }
 0x9f4   : > { %v1147_v13 = vand.u32 %v1138_v11, %v3071_v57 }
 0x9f6   : > { %2499 = vmatprep.subr.bf16.mxu0 %v1147_v13 }
 0x9f7   : > { %2500 = vmatpush3.bf16.msra.mxu0 %v1147_v13 }
 0x9f8   : > { %2601 = vmatprep.subr.bf16.mxu0 %v2827_v54 }
 0x9fa   : > { %2502 = vmatmul.mubr.msk.bf16.vlgmr.msra.gmra.mrb[16].mxu0 %vm730_vm14, %v1134_v17  ;;  %v2745_v19 = vpop.eup %2744 }
 0x9fb   : > { %2603 = vmatpush3.bf16.msra.mxu0 %v2602_v16  ;;  %2519 = vmatprep.mubr.msk.f32.mxu0 %vm2831_vm1, %v2828_v12  ;;  %v1298_v21 = vmul.f32 %v2745_v19, %v2739_v58  ;;  %v1570_v19 = vld [vmem:[#allocation3 + $0x50] sm:$0xff] }
 0x9fc   : > { %2517 = vmatprep.subr.mxu0 %v2828_v12 }
 0x9ff   : > { %2518 = vmatpush3.msk.msra.mxu0 %vm777_vm0, %v1304_v18  ;;  %v1569_v18 = vld [vmem:[#allocation3 + $0x48] sm:$0xff] }
 0xa00   : > { %2617 = vmatprep.subr.msk.bf16.mxu0 %vm666_vm13, %v1469_v20  ;;  %v2605_v20 = vpack.c.bf16 %v1570_v19, %v1569_v18 }
 0xa02   : > { %2520 = vmatmul.mubr.msk.f32.vlgmr.msra.gmra.mrb[10].mxu0 %vm730_vm14, %v1298_v21 }
 0xa03   : > { %2522 = vmatprep.mubr.msk.f32.mxu0 %vm2831_vm1, %v2828_v12 }
 0xa06   : > { %2537 = vmatpush3.bf16.xpose.msra.mxu0 %v1479_v22 }
 0xa07   : > { %2618 = vmatprep.subr.msk.bf16.mxu0 %vm666_vm13, %v1471_v23 }
 0xa0e   : > { %2539 = vmatpush3.bf16.xpose.msra.mxu0 %v1482_v24 }
 0xa0f   : > { %2604 = vmatprep.subr.bf16.mxu0 %v2827_v54 }
 0xa24   : > { %v1291_v25 = vpop.xlane.xlu1 %1290 }
 0xa25   : > { %2746 = vrcp.f32 %v1291_v25 }
 0xa28   : > { %v1294_v26 = vpop.xlane.xlu1 %1293 }
 0xa29   : > { %2748 = vrcp.f32 %v1294_v26 }
 0xa2f   : > { %v2747_v27 = vpop.eup %2746 }
 0xa30   : > { %v1299_v28 = vmul.f32 %v2747_v27, %v2741_v4 }
 0xa32   : > { %2523 = vmatmul.mubr.msk.f32.gmra.mrb[20].mxu0 %vm730_vm14, %v1299_v28  ;;  %v1400_v29 = vpack.c.bf16 %v1299_v28, %v1298_v21  ;;  %v1571_v21 = vld [vmem:[#allocation3 + $0x58] sm:$0x1] }
 0xa33   : > { %v2749_v32 = vpop.eup %2748  ;;  %2525 = vmatprep.mubr.msk.f32.mxu0 %vm2831_vm1, %v2828_v12 }
 0xa34   : > { %2532 = vmatprep.mubr.msk.bf16.mxu1 %vm730_vm14, %v1400_v29  ;;  %v3146_v36 = vmul.f32 %v2749_v32, %v2743_v6 }
 0xa36   : > { %2526 = vmatmul.mubr.msk.f32.gmra.mrb[22].mxu0 %vm730_vm14, %v3146_v36 }
 0xa37   : > { %2540 = vmatprep.mubr.msk.bf16.mxu0 %vm666_vm13, %v1465_v35 }
 0xa3a   : > { %2541 = vmatmul.mubr.msk.bf16.vlgmr.msra.gmra.mrb[24].mxu0 %vm666_vm13, %v1467_v38  ;;  %v1401_v38 = vpack.c.bf16 %v3146_v36, %v3146_v36 }
 0xa3b   : > { %2550 = vmatprep.mubr.msk.f32.mxu0 %vm2831_vm1, %v2828_v12  ;;  %2606 = vmatpush3.bf16.msra.mxu0 %v2605_v20 }
 0xa3c   : > { %2548 = vmatprep.subr.mxu0 %v2828_v12 }
 0xa3f   : > { %2549 = vmatpush3.msk.msra.mxu0 %vm777_vm0, %v1571_v21 }
 0xacd   : > { %v2503_v39 = vpop.f32.mrb[16].mxu0 }
 0xace   : > { %v3154_v40 = vpop.f32.mrb[17].mxu0 }
 0xacf   : > { %v2504_v41 = vpop.f32.mrb[18].mxu0 }
 0xad0   : > { %v1186_v42 = vpop.f32.mrb[19].mxu0 }
 0xad1   : > { %v2685_v43 = vpack.i.bf16 %v1186_v42, %v3154_v40 }
 0xad5   : > { %v1383_v44 = vpop.f32.mrb[10].mxu0 }
 0xad6   : > { %1397 = vst.msk [vmem:[#allocation3 + $0x30] sm:$0xff] %vm730_vm14, %v1383_v44  ;;  %v2521_v45 = vpop.f32.mrb[11].mxu0 }
 0xb05   : > { %v1388_v46 = vpop.f32.mrb[20].mxu0 }
 0xb06   : > { %1398 = vst.msk [vmem:[#allocation3 + $0x38] sm:$0xff] %vm730_vm14, %v1388_v46  ;;  %v2524_v47 = vpop.f32.mrb[21].mxu0 }
 0xb09   : > { %v1393_v48 = vpop.f32.mrb[22].mxu0 }
 0xb0a   : > { %1399 = vst.msk [vmem:[#allocation3 + $0x40] sm:$0x1] %vm737_vm15, %v1393_v48  ;;  %v2527_v49 = vpop.f32.mrb[23].mxu0 }
 0xb0d   : > { %v2542_v50 = vpop.f32.mrb[24].mxu0 }
 0xb0e   : > { %v1518_v51 = vpop.f32.mrb[25].mxu0  ;;  %v1534_v61 = vmul.f32 0.35355338, %v2542_v50 }
 0xb0f   : > { %v1532_v52 = vmul.f32 0.35355338, %v1518_v51  ;;  %v2543_v53 = vpop.f32.mrb[26].mxu0 }
 0xb10   : > { %v1521_v55 = vpop.f32.mrb[27].mxu0  ;;  %v1541_v63 = vsel %vm737_vm15, %v1534_v61, -inf }
 0xb11   : > { %v1533_v56 = vmul.f32 0.35355338, %v1521_v55  ;;  %v1535_v58 = vsel %vm730_vm14, %v1532_v52, -inf }
 0xb12   : > { %1536 = vmax.xlane.f32.xlu0 %v1535_v58 }
 0xb13   : > { %v1538_v62 = vsel %vm730_vm14, %v1533_v56, -inf }
 0xb14   : > { %1539 = vmax.xlane.f32.xlu1 %v1538_v62 }
 0xb18   : > { %1542 = vmax.xlane.f32.xlu1 %v1541_v63 }
 0xb9f   : > { %v1537_v0 = vpop.xlane.xlu0 %1536 }
 0xba0   : > { %v1544_v3 = vsub.f32 %v1532_v52, %v1537_v0 }
 0xba1   : > { %v1540_v1 = vpop.xlane.xlu1 %1539 }
 0xba2   : > { %v1545_v2 = vsub.f32 %v1533_v56, %v1540_v1  ;;  %v1547_v8 = vmul.f32 1.442695, %v1544_v3 }
 0xba4   : > { %v1549_v4 = vmul.f32 1.442695, %v1545_v2 }
 0xba5   : > { %v1543_v5 = vpop.xlane.xlu1 %1542 }
 0xba6   : > { %2750 = vpow2.f32 %v1549_v4  ;;  %v1546_v6 = vsub.f32 %v1534_v61, %v1543_v5 }
 0xba8   : > { %v1551_v10 = vmul.f32 1.442695, %v1546_v6 }
 0xbaa   : > { %2752 = vpow2.f32 %v1551_v10 }
 0xbab   : > { %2754 = vpow2.f32 %v1547_v8 }
 0xbb0   : > { %v2751_v11 = vpop.eup %2750 }
 0xbb1   : > { %v1556_v13 = vsel %vm730_vm14, %v2751_v11, 0.0 }
 0xbb2   : > { %1557 = vadd.xlane.f32.xlu0 %v1556_v13 }
 0xbb4   : > { %v2753_v14 = vpop.eup %2752 }
 0xbb5   : > { %v1559_v15 = vsel %vm737_vm15, %v2753_v14, 0.0  ;;  %v2755_v16 = vpop.eup %2754 }
 0xbb6   : > { %1560 = vadd.xlane.f32.xlu1 %v1559_v15  ;;  %v1553_v17 = vsel %vm730_vm14, %v2755_v16, 0.0 }
 0xbba   : > { %1554 = vadd.xlane.f32.xlu1 %v1553_v17 }
 0xbc8   : > { %1402 = vrot.lane.b32.xlu0 %v3022_v37, %s2839_s20 }
 0xbcb   : > { %1669 = vrot.lane.b32.xlu1 %v3022_v37, %s2840_s21 }
 0xbcc   : > { %1784 = vrot.lane.b32.xlu0 %v2992_v59, %s2841_s22 }
 0xbcf   : > { %1404 = vrot.lane.b32.xlu1 %v3019_v33, %s2839_s20 }
 0xbd0   : > { %1738 = vrot.lane.b32.xlu0 %v2503_v39, %s2842_s25 }
 0xbd3   : > { %1671 = vrot.lane.b32.xlu1 %v3019_v33, %s2840_s21 }
 0xbd7   : > { %2686 = vrot.lane.b32.xlu1 %v2685_v43, %s2842_s25 }
 0xc3f   : > { %v1558_v22 = vpop.xlane.xlu0 %1557 }
 0xc40   : > { %2756 = vrcp.f32 %v1558_v22 }
 0xc43   : > { %v1403_v23 = vpop.permute.xlu0 %1402  ;;  %v1561_v24 = vpop.xlane.xlu1 %1560 }
 0xc44   : > { %2528 = vmatprep.subr.bf16.mxu1 %v1403_v23 }
 0xc45   : > { %2529 = vmatpush3.bf16.msra.mxu1 %v1403_v23 }
 0xc47   : > { %v1555_v37 = vpop.xlane.xlu1 %1554  ;;  %v1785_v36 = vpop.permute.xlu0 %1784 }
 0xc48   : > { %2758 = vrcp.f32 %v1555_v37 }
 0xc49   : > { %2760 = vrcp.f32 %v1561_v24 }
 0xc4a   : > { %v2757_v59 = vpop.eup %2756 }
 0xc4b   : > { %v1670_v25 = vpop.permute.xlu1 %1669  ;;  %v1566_v32 = vmul.f32 %v2757_v59, %v2751_v11  ;;  %v1739_v58 = vpop.permute.xlu0 %1738 }
 0xc4c   : > { %2559 = vmatprep.subr.bf16.mxu0 %v1670_v25 }
 0xc4f   : > { %v1405_v26 = vpop.permute.xlu1 %1404 }
 0xc50   : > { %v1414_v27 = vand.u32 %v1405_v26, %v3071_v57  ;;  %v2780_v26 = vld [vmem:[#allocation2] sm:$0xff] }
 0xc52   : > { %v2759_v28 = vpop.eup %2758  ;;  %2530 = vmatprep.subr.bf16.mxu1 %v1414_v27 }
 0xc53   : > { %v1565_v29 = vmul.f32 %v2759_v28, %v2755_v16  ;;  %2531 = vmatpush3.bf16.msra.mxu1 %v1414_v27  ;;  %v1672_v33 = vpop.permute.xlu1 %1671  ;;  %v2761_v35 = vpop.eup %2760  ;;  %v2781_v28 = vld [vmem:[#allocation2 + $0x10] sm:$0x1] }
 0xc54   : > { %v1681_v39 = vand.u32 %v1672_v33, %v3071_v57  ;;  %2607 = vmatprep.subr.bf16.mxu1 %v2827_v54  ;;  %v1567_v41 = vmul.f32 %v2761_v35, %v2753_v14  ;;  %v1769_v14 = vsel %vm666_vm13, %v3104_v30, %v1739_v58  ;;  %v2782_v33 = vld [vmem:[#allocation2 + $0x8] sm:$0xff] }
 0xc55   : > { %2551 = vmatmul.mubr.msk.f32.vlgmr.msra.gmra.mrb[28].mxu0 %vm730_vm14, %v1565_v29  ;;  %v1667_v40 = vpack.c.bf16 %v1566_v32, %v1565_v29 }
 0xc56   : > { %2560 = vmatpush3.bf16.msra.mxu0 %v1670_v25  ;;  %2533 = vmatmul.mubr.msk.bf16.vlgmr.msra.gmra.mrb[20].mxu1 %vm730_vm14, %v1401_v38  ;;  %v1668_v57 = vpack.c.bf16 %v1567_v41, %v1567_v41 }
 0xc57   : > { %2561 = vmatprep.subr.bf16.mxu0 %v1681_v39  ;;  %2563 = vmatprep.mubr.msk.bf16.mxu0 %vm730_vm14, %v1667_v40 }
 0xc58   : > { %2609 = vmatpush3.bf16.msra.mxu1 %v2605_v20  ;;  %2553 = vmatprep.mubr.msk.f32.mxu1 %vm2831_vm1, %v2828_v12 }
 0xc59   : > { %2608 = vmatprep.subr.mxu1 %v2828_v12 }
 0xc5a   : > { %2562 = vmatpush3.bf16.msra.mxu0 %v1681_v39 }
 0xc5c   : > { %2610 = vmatpush3.msk.msra.mxu1 %vm777_vm0, %v1571_v21 }
 0xc5d   : > { %2564 = vmatmul.mubr.msk.bf16.vlgmr.msra.gmra.mrb[32].mxu0 %vm730_vm14, %v1668_v57  ;;  %2567 = vmatprep.subr.bf16.mxu1 %v1785_v36 }
 0xc5e   : > { %2554 = vmatmul.mubr.msk.f32.vlgmr.msra.gmra.mrb[14].mxu1 %vm730_vm14, %v1566_v32 }
 0xc5f   : > { %2556 = vmatprep.mubr.msk.f32.mxu1 %vm2831_vm1, %v2828_v12  ;;  %2568 = vmatpush3.bf16.msra.mxu1 %v1785_v36 }
 0xc62   : > { %2557 = vmatmul.mubr.msk.f32.gmra.mrb[24].mxu1 %vm730_vm14, %v1567_v41 }
 0xd28   : > { %v1650_v54 = vpop.f32.mrb[28].mxu0 }
 0xd29   : > { %1664 = vst.msk [vmem:[#allocation3 + $0x48] sm:$0xff] %vm730_vm14, %v1650_v54  ;;  %v2534_v42 = vpop.f32.mrb[20].mxu1  ;;  %v2552_v43 = vpop.f32.mrb[29].mxu0 }
 0xd2a   : > { %1750 = vrot.lane.b32.xlu0 %v2534_v42, %s2843_s26  ;;  %v1450_v44 = vpop.f32.mrb[21].mxu1 }
 0xd2b   : > { %v2535_v45 = vpop.f32.mrb[22].mxu1 }
 0xd2c   : > { %v1453_v46 = vpop.f32.mrb[23].mxu1 }
 0xd2d   : > { %v2690_v47 = vpack.i.bf16 %v1453_v46, %v1450_v44 }
 0xd2e   : > { %1786 = vrot.lane.b32.xlu0 %v2994_v60, %s2841_s22  ;;  %v2687_v60 = vpop.permute.xlu1 %2686 }
 0xd2f   : > { %2691 = vrot.lane.b32.xlu1 %v2690_v47, %s2843_s26  ;;  %v2689_v0 = vunpack.i.h.bf16 %v2687_v60  ;;  %v2688_v1 = vunpack.i.l.bf16 %v2687_v60 }
 0xd30   : > { %v2565_v48 = vpop.f32.mrb[32].mxu0 }
 0xd31   : > { %v1717_v12 = vpop.f32.mrb[33].mxu0  ;;  %v1655_v49 = vpop.f32.mrb[14].mxu1  ;;  %v1768_v4 = vsel %vm666_vm13, %v3108_v34, %v2689_v0  ;;  %v1767_v6 = vsel %vm666_vm13, %v3106_v31, %v2688_v1  ;;  %v1782_v31 = vsub.s32 3, %v3001_v7  ;;  %v1888_v0 = vsub.s32 4, %v3001_v7 }
 0xd32   : > { %1665 = vst.msk [vmem:[#allocation3 + $0x50] sm:$0xff] %vm730_vm14, %v1655_v49  ;;  %v2566_v50 = vpop.f32.mrb[34].mxu0  ;;  %v2555_v51 = vpop.f32.mrb[15].mxu1 }
 0xd33   : > { %v1720_v52 = vpop.f32.mrb[35].mxu0  ;;  %v1783_v21 = vrot.slane %v3010_v9, %v1782_v31  ;;  %v2702_v50 = vld [vmem:[%s3228_s17] sm:$0xff]   ;;  %v2703_v51 = vld [vmem:[%s3228_s17 + $0x8] sm:$0xff]   ;;  %v2704_v31 = vld [vmem:[%s3228_s17 + $0x10] sm:$0xff]  }
 0xd34   : > { %v2695_v53 = vpack.i.bf16 %v1720_v52, %v1717_v12  ;;  %2575 = vmatprep.subr.bf16.mxu0 %v2702_v50 }
 0xd35   : > { %v1660_v55 = vpop.f32.mrb[24].mxu1  ;;  %2576 = vmatpush3.bf16.msra.mxu0 %v2702_v50 }
 0xd36   : > { %1666 = vst.msk [vmem:[#allocation3 + $0x58] sm:$0x1] %vm737_vm15, %v1660_v55  ;;  %2696 = vrot.lane.b32.xlu1 %v2695_v53, %s2844_s28  ;;  %v2558_v56 = vpop.f32.mrb[25].mxu1  ;;  %2577 = vmatprep.subr.bf16.mxu0 %v2703_v51 }
 0xd39   : > { %2578 = vmatpush3.bf16.msra.mxu0 %v2703_v51 }
 0xd3a   : > { %1762 = vrot.lane.b32.xlu1 %v2565_v48, %s2844_s28 }
 0xd9c   : > { %v1751_v61 = vpop.permute.xlu0 %1750 }
 0xd9d   : > { %v1773_v17 = vsel %vm1770_vm3, %v1769_v14, %v1751_v61 }
 0xda0   : > { %v1787_v62 = vpop.permute.xlu0 %1786 }
 0xda1   : > { %2569 = vmatprep.subr.bf16.mxu1 %v1787_v62  ;;  %v2692_v63 = vpop.permute.xlu1 %2691 }
 0xda2   : > { %2570 = vmatpush3.bf16.msra.mxu1 %v1787_v62  ;;  %v2694_v2 = vunpack.i.h.bf16 %v2692_v63  ;;  %v2693_v3 = vunpack.i.l.bf16 %v2692_v63 }
 0xda3   : > { %2583 = vmatprep.subr.bf16.mxu1 %v2704_v31 }
 0xda4   : > { %v1771_v11 = vsel %vm1770_vm3, %v1767_v6, %v2693_v3  ;;  %v1772_v13 = vsel %vm1770_vm3, %v1768_v4, %v2694_v2  ;;  %v3234_v3 = vld [vmem:[%s3006_s23] sm:$0xff] }
 0xda5   : > { %v1889_v4 = vrot.slane %v3234_v3, %v1888_v0 }
 0xda8   : > { %v2697_v5 = vpop.permute.xlu1 %2696 }
 0xda9   : > { %v2699_v8 = vunpack.i.h.bf16 %v2697_v5  ;;  %v2698_v10 = vunpack.i.l.bf16 %v2697_v5  ;;  %v1895_v5 = vsub.s32 5, %v3001_v7 }
 0xdab   : > { %v1775_v15 = vsel %vm1774_vm2, %v1771_v11, %v2698_v10  ;;  %v1776_v16 = vsel %vm1774_vm2, %v1772_v13, %v2699_v8  ;;  %v1896_v14 = vrot.slane %v3234_v3, %v1895_v5 }
 0xdac   : > { %v1763_v18 = vpop.permute.xlu1 %1762  ;;  %v1778_v19 = vpack.c.bf16 %v1776_v16, %v1775_v15 }
 0xdad   : > { %v1777_v20 = vsel %vm1774_vm2, %v1773_v17, %v1763_v18 }
 0xdae   : > { %v1779_v34 = vpack.c.bf16 %v1777_v20, %v1777_v20  ;;  %2571 = vmatprep.mubr.msk.bf16.mxu1 %vm530_vm11, %v1778_v19 }
 0xdb0   : > { %2572 = vmatmul.mubr.msk.bf16.vlgmr.msra.gmra.mrb[28].mxu1 %vm530_vm11, %v1779_v34 }
 0xdb1   : > { %2584 = vmatpush3.bf16.msra.mxu1 %v2704_v31 }
 0xe83   : > { %v2573_v22 = vpop.f32.mrb[28].mxu1 }
 0xe84   : > { %v1830_v23 = vpop.f32.mrb[29].mxu1  ;;  %v1839_v24 = vadd.f32 %v2573_v22, %v1783_v21  ;;  %v2706_v22 = vld [vmem:[%s3228_s17 + $0x20] sm:$0xff]  }
 0xe85   : > { %v1831_v37 = vadd.f32 %v1830_v23, %v1783_v21  ;;  %v2574_v30 = vpop.f32.mrb[30].mxu1  ;;  %v2707_v23 = vld [vmem:[%s3228_s17 + $0x28] sm:$0xff]  }
 0xe86   : > { %v1833_v25 = vpop.f32.mrb[31].mxu1  ;;  %v3208_v29 = vadd.f32 %v2781_v28, %v1839_v24  ;;  %v1904_v24 = vsub.s32 6, %v3001_v7 }
 0xe87   : > { %v3206_v59 = vadd.f32 %v2780_v26, %v1831_v37  ;;  %v1834_v27 = vadd.f32 %v1833_v25, %v1783_v21  ;;  %v2705_v21 = vld [vmem:[%s3228_s17 + $0x18] sm:$0xff]  }
 0xe88   : > { %v1853_v38 = vsel %vm537_vm12, %v3208_v29, 0.0  ;;  %2585 = vmatprep.subr.bf16.mxu1 %v2705_v21  ;;  %v1905_v37 = vrot.slane %v3234_v3, %v1904_v24 }
 0xe89   : > { %v3210_v32 = vadd.f32 %v2782_v33, %v1834_v27  ;;  %v1847_v35 = vsel %vm530_vm11, %v3206_v59, 0.0  ;;  %2586 = vmatpush3.bf16.msra.mxu1 %v2705_v21 }
 0xe8a   : > { %1848 = vadd.xlane.f32.xlu0 %v1847_v35  ;;  %2587 = vmatprep.subr.bf16.mxu1 %v2706_v22 }
 0xe8b   : > { %v1850_v9 = vsel %vm530_vm11, %v3210_v32, 0.0 }
 0xe8c   : > { %1851 = vadd.xlane.f32.xlu1 %v1850_v9 }
 0xe8d   : > { %2588 = vmatpush3.bf16.msra.mxu1 %v2706_v22 }
 0xe8e   : > { %1854 = vadd.xlane.f32.xlu0 %v1853_v38  ;;  %2589 = vmatprep.subr.bf16.mxu1 %v2707_v23 }
 0xe91   : > { %2590 = vmatpush3.bf16.msra.mxu1 %v2707_v23 }
 0xf17   : > { %v1849_v39 = vpop.xlane.xlu0 %1848 }
 0xf18   : > { %v1856_v40 = vmul.f32 0.03125, %v1849_v39 }
 0xf19   : > { %v1852_v41 = vpop.xlane.xlu1 %1851 }
 0xf1a   : > { %v1859_v57 = vsub.f32 %v3206_v59, %v1856_v40  ;;  %v1857_v36 = vmul.f32 0.03125, %v1852_v41 }
 0xf1b   : > { %v1855_v54 = vpop.xlane.xlu0 %1854 }
 0xf1c   : > { %v1860_v42 = vsub.f32 %v3210_v32, %v1857_v36  ;;  %v1858_v43 = vmul.f32 0.03125, %v1855_v54  ;;  %v1862_v44 = vmul.f32 %v1859_v57, %v1859_v57 }
 0xf1e   : > { %v1861_v45 = vsub.f32 %v3208_v29, %v1858_v43  ;;  %v1865_v46 = vsel %vm530_vm11, %v1862_v44, 0.0  ;;  %v1863_v47 = vmul.f32 %v1860_v42, %v1860_v42 }
 0xf1f   : > { %1866 = vadd.xlane.f32.xlu0 %v1865_v46 }
 0xf20   : > { %v1864_v48 = vmul.f32 %v1861_v45, %v1861_v45  ;;  %v1868_v12 = vsel %vm530_vm11, %v1863_v47, 0.0 }
 0xf22   : > { %v1871_v49 = vsel %vm537_vm12, %v1864_v48, 0.0 }
 0xf23   : > { %1869 = vadd.xlane.f32.xlu0 %v1868_v12  ;;  %1872 = vadd.xlane.f32.xlu1 %v1871_v49 }
 0xfac   : > { %v1867_v52 = vpop.xlane.xlu0 %1866 }
 0xfad   : > { %v1874_v53 = vmul.f32 0.03125, %v1867_v52 }
 0xfaf   : > { %v1877_v55 = vadd.f32 1e-06, %v1874_v53 }
 0xfb0   : > { %v1873_v56 = vpop.xlane.xlu1 %1872  ;;  %v1870_v58 = vpop.xlane.xlu0 %1869 }
 0xfb1   : > { %2762 = vrsqrt.f32 %v1877_v55  ;;  %v1876_v61 = vmul.f32 0.03125, %v1873_v56  ;;  %v1875_v60 = vmul.f32 0.03125, %v1870_v58 }
 0xfb3   : > { %v1879_v62 = vadd.f32 1e-06, %v1876_v61  ;;  %v1878_v63 = vadd.f32 1e-06, %v1875_v60 }
 0xfb5   : > { %2764 = vrsqrt.f32 %v1879_v62 }
 0xfb6   : > { %2766 = vrsqrt.f32 %v1878_v63 }
 0xfbb   : > { %v2763_v1 = vpop.eup %2762 }
 0xfbc   : > { %v1883_v2 = vmul.f32 %v2763_v1, %v1859_v57 }
 0xfbe   : > { %v1890_v13 = vmul.f32 %v1889_v4, %v1883_v2 }
 0xfbf   : > { %v2765_v6 = vpop.eup %2764 }
 0xfc0   : > { %v2767_v8 = vpop.eup %2766  ;;  %v1885_v10 = vmul.f32 %v2765_v6, %v1861_v45  ;;  %v1897_v18 = vadd.f32 %v1896_v14, %v1890_v13 }
 0xfc1   : > { %v1884_v11 = vmul.f32 %v2767_v8, %v1860_v42 }
 0xfc2   : > { %v1892_v15 = vmul.f32 %v1889_v4, %v1885_v10 }
 0xfc3   : > { %v1891_v16 = vmul.f32 %v1889_v4, %v1884_v11 }
 0xfc4   : > { %v1899_v17 = vadd.f32 %v1896_v14, %v1892_v15 }
 0xfc5   : > { %v1898_v19 = vadd.f32 %v1896_v14, %v1891_v16 }
 0xfc6   : > { %v1901_v20 = vpack.c.bf16 %v1899_v17, %v1899_v17 }
 0xfc7   : > { %v1900_v34 = vpack.c.bf16 %v1898_v19, %v1897_v18 }
 0xfc9   : > { %2579 = vmatprep.mubr.msk.bf16.mxu0 %vm530_vm11, %v1900_v34 }
 0xfca   : > { %2580 = vmatmul.mubr.msk.bf16.vlgmr.msra.gmra.mrb[36].mxu0 %vm530_vm11, %v1901_v20 }
0x109d   : > { %v2581_v30 = vpop.f32.mrb[36].mxu0 }
0x109e   : > { %v3247_v25 = vadd.f32 %v2581_v30, %v1905_v37  ;;  %v1958_v26 = vpop.f32.mrb[37].mxu0 }
0x109f   : > { %v3249_v27 = vadd.f32 %v1958_v26, %v1905_v37  ;;  %v2582_v28 = vpop.f32.mrb[38].mxu0 }
0x10a0   : > { %v3252_v33 = vmul.f32 0.70710677, %v3247_v25  ;;  %v1961_v35 = vpop.f32.mrb[39].mxu0 }
0x10a1   : > { %v3255_v9 = vmul.f32 0.70710677, %v3249_v27  ;;  %v3257_v38 = vadd.f32 %v1961_v35, %v1905_v37 }
0x10a2   : > { %v1986_v39 = vand.u32 2147483647, %v3252_v33  ;;  %vm1980_vm4 = vcmp.ge.f32.partialorder %v3252_v33, 0.0 }
0x10a3   : > { %v1984_v40 = vand.u32 2147483647, %v3255_v9  ;;  %v3262_v57 = vmul.f32 0.70710677, %v3257_v38  ;;  %vm1978_vm5 = vcmp.ge.f32.partialorder %v3255_v9, 0.0  ;;  %v1974_v9 = vmul.f32 0.5, %v3247_v25 }
0x10a4   : > { %v1989_v41 = vmul.f32 0.3275911, %v1986_v39  ;;  %v2028_v46 = vsub.f32 0.0, %v1986_v39 }
0x10a5   : > { %v1987_v36 = vmul.f32 0.3275911, %v1984_v40  ;;  %v1985_v42 = vand.u32 2147483647, %v3262_v57  ;;  %v2026_v47 = vsub.f32 0.0, %v1984_v40  ;;  %vm1979_vm6 = vcmp.ge.f32.partialorder %v3262_v57, 0.0 }
0x10a6   : > { %v1992_v54 = vadd.f32 1.0, %v1989_v41  ;;  %v2031_v12 = vmul.f32 %v2028_v46, %v1986_v39 }
0x10a7   : > { %v1990_v43 = vadd.f32 1.0, %v1987_v36  ;;  %v1988_v44 = vmul.f32 0.3275911, %v1985_v42  ;;  %v2027_v49 = vsub.f32 0.0, %v1985_v42  ;;  %v2029_v52 = vmul.f32 %v2026_v47, %v1984_v40 }
0x10a8   : > { %2768 = vrcp.f32 %v1992_v54  ;;  %v2036_v58 = vmul.f32 1.442695, %v2031_v12  ;;  %v2845_v40 = vmov -1.0   ;;  %v1972_v12 = vmul.f32 0.5, %v3249_v27 }
0x10a9   : > { %2770 = vrcp.f32 %v1990_v43  ;;  %v1991_v45 = vadd.f32 1.0, %v1988_v44  ;;  %v2030_v60 = vmul.f32 %v2027_v49, %v1985_v42  ;;  %v2032_v63 = vmul.f32 1.442695, %v2029_v52 }
0x10aa   : > { %v1983_v41 = vsel %vm1980_vm4, 1.0, %v2845_v40  ;;  %v1981_v42 = vsel %vm1978_vm5, 1.0, %v2845_v40  ;;  %v1982_v33 = vsel %vm1979_vm6, 1.0, %v2845_v40  ;;  %v1973_v49 = vmul.f32 0.5, %v3257_v38 }
0x10ab   : > { %2772 = vrcp.f32 %v1991_v45  ;;  %v2034_v6 = vmul.f32 1.442695, %v2030_v60 }
0x10ac   : > { %2774 = vpow2.f32 %v2036_v58 }
0x10ad   : > { %2776 = vpow2.f32 %v2032_v63 }
0x10ae   : > { %2778 = vpow2.f32 %v2034_v6 }
0x10b2   : > { %v2769_v48 = vpop.eup %2768 }
0x10b3   : > { %v2771_v50 = vpop.eup %2770  ;;  %v2001_v51 = vmul.f32 1.0614054, %v2769_v48 }
0x10b4   : > { %v1999_v53 = vmul.f32 1.0614054, %v2771_v50 }
0x10b5   : > { %v2004_v55 = vadd.f32 -1.4531521, %v2001_v51  ;;  %v2773_v56 = vpop.eup %2772 }
0x10b6   : > { %v2002_v61 = vadd.f32 -1.4531521, %v1999_v53  ;;  %v2000_v0 = vmul.f32 1.0614054, %v2773_v56  ;;  %v2775_v22 = vpop.eup %2774 }
0x10b7   : > { %v2007_v62 = vmul.f32 %v2769_v48, %v2004_v55  ;;  %v2777_v24 = vpop.eup %2776 }
0x10b8   : > { %v2005_v1 = vmul.f32 %v2771_v50, %v2002_v61  ;;  %v2003_v4 = vadd.f32 -1.4531521, %v2000_v0  ;;  %v2779_v39 = vpop.eup %2778 }
0x10b9   : > { %v2010_v2 = vadd.f32 1.4214138, %v2007_v62 }
0x10ba   : > { %v2008_v5 = vadd.f32 1.4214138, %v2005_v1  ;;  %v2006_v10 = vmul.f32 %v2773_v56, %v2003_v4  ;;  %v2159_v4 = vld [vmem:[#allocation3 + $0x30] sm:$0x1] (!%p2338_p7) }
0x10bb   : > { %v2013_v8 = vmul.f32 %v2769_v48, %v2010_v2  ;;  %2340 = vst.msk [vmem:[%s2941_s27 + $0x2] sm:$0x1] (!%p2338_p7), %vm737_vm15, %v2159_v4 }
0x10bc   : > { %v2011_v11 = vmul.f32 %v2771_v50, %v2008_v5  ;;  %v2009_v14 = vadd.f32 1.4214138, %v2006_v10  ;;  %v2162_v5 = vld [vmem:[#allocation3 + $0x48] sm:$0x1] (!%p2338_p7) }
0x10bd   : > { %v2016_v13 = vadd.f32 -0.28449672, %v2013_v8  ;;  %2341 = vst.msk [vmem:[%s2941_s27 + $0x3] sm:$0x1] (!%p2338_p7), %vm737_vm15, %v2162_v5 }
0x10be   : > { %v2014_v15 = vadd.f32 -0.28449672, %v2011_v11  ;;  %v2012_v17 = vmul.f32 %v2773_v56, %v2009_v14 }
0x10bf   : > { %v2019_v16 = vmul.f32 %v2769_v48, %v2016_v13 }
0x10c0   : > { %v2017_v18 = vmul.f32 %v2771_v50, %v2014_v15  ;;  %v2015_v20 = vadd.f32 -0.28449672, %v2012_v17 }
0x10c1   : > { %v2022_v19 = vadd.f32 0.2548296, %v2019_v16 }
0x10c2   : > { %v2020_v34 = vadd.f32 0.2548296, %v2017_v18  ;;  %v2018_v21 = vmul.f32 %v2773_v56, %v2015_v20 }
0x10c3   : > { %v2025_v31 = vmul.f32 %v2769_v48, %v2022_v19 }
0x10c4   : > { %v2023_v23 = vmul.f32 %v2771_v50, %v2020_v34  ;;  %v2021_v30 = vadd.f32 0.2548296, %v2018_v21 }
0x10c5   : > { %v2040_v37 = vmul.f32 %v2775_v22, %v2025_v31 }
0x10c6   : > { %v2038_v26 = vmul.f32 %v2777_v24, %v2023_v23  ;;  %v2024_v35 = vmul.f32 %v2773_v56, %v2021_v30  ;;  %v2057_v56 = vsub.s32 7, %v3001_v7 }
0x10c7   : > { %v2043_v28 = vsub.f32 1.0, %v2040_v37 }
0x10c8   : > { %v2041_v36 = vsub.f32 1.0, %v2038_v26  ;;  %v2039_v43 = vmul.f32 %v2779_v39, %v2024_v35  ;;  %v2058_v58 = vrot.slane %v3234_v3, %v2057_v56  ;;  %v2156_v3 = vld [vmem:[#allocation3 + $0x18] sm:$0x1] (!%p2338_p7) }
0x10c9   : > { %v2046_v54 = vmul.f32 %v2043_v28, %v1983_v41  ;;  %2339 = vst.msk [vmem:[%s2941_s27 + $0x1] sm:$0x1] (!%p2338_p7), %vm737_vm15, %v2156_v3 }
0x10ca   : > { %v2044_v44 = vmul.f32 %v2041_v36, %v1981_v42  ;;  %v2042_v45 = vsub.f32 1.0, %v2039_v43 }
0x10cb   : > { %v2049_v46 = vadd.f32 1.0, %v2046_v54 }
0x10cc   : > { %v2047_v47 = vadd.f32 1.0, %v2044_v44  ;;  %v2045_v48 = vmul.f32 %v2042_v45, %v1982_v33 }
0x10cd   : > { %v2052_v51 = vmul.f32 %v2049_v46, %v1974_v9 }
0x10ce   : > { %v2048_v50 = vadd.f32 1.0, %v2045_v48  ;;  %v2050_v52 = vmul.f32 %v2047_v47, %v1972_v12 }
0x10cf   : > { %v2054_v57 = vpack.c.bf16 %v2052_v51, %v2052_v51 }
0x10d0   : > { %v2051_v53 = vmul.f32 %v2048_v50, %v1973_v49 }
0x10d2   : > { %v2053_v55 = vpack.c.bf16 %v2051_v53, %v2050_v52 }
0x10d4   : > { %2591 = vmatprep.mubr.msk.bf16.mxu1 %vm2083_vm7, %v2053_v55 }
0x10d5   : > { %2592 = vmatmul.mubr.msk.bf16.vlgmr.msra.gmra.mrb[32].mxu1 %vm2083_vm7, %v2054_v57 }
0x11a8   : > { %v2593_v61 = vpop.f32.mrb[32].mxu1 }
0x11a9   : > { %v2133_v60 = vadd.f32 %v2593_v61, %v2058_v58  ;;  %v2124_v25 = vpop.f32.mrb[33].mxu1 }
0x11aa   : > { %v2125_v62 = vadd.f32 %v2124_v25, %v2058_v58  ;;  %v2594_v27 = vpop.f32.mrb[34].mxu1  ;;  %2147 = sbr.rel (%p2338_p7) target bundleno = 4537 (0x11b9), region = 60 }
0x11ab   : > { %v2140_v38 = vadd.f32 %v2133_v60, %v3208_v29  ;;  %v2127_v63 = vpop.f32.mrb[35].mxu1 }
0x11ac   : > { %v2138_v0 = vadd.f32 %v2125_v62, %v3206_v59  ;;  %v2128_v1 = vadd.f32 %v2127_v63, %v2058_v58 }
0x11ad   : > { %2143 = vst.msk [vmem:[#allocation2 + $0x10] sm:$0x1] %vm537_vm12, %v2140_v38 }
0x11ae   : > { %2141 = vst.msk [vmem:[#allocation2] sm:$0xff] %vm530_vm11, %v2138_v0  ;;  %v2139_v2 = vadd.f32 %v2128_v1, %v3210_v32  ;;  %v2154_v32 = vld [vmem:[#allocation3] sm:$0x1] (!%p2338_p7) }
0x11af   : > { %2155 = vst.msk [vmem:[%s2941_s27] sm:$0x1] (!%p2338_p7), %vm737_vm15, %v2154_v32 }
0x11b0   : > { %2142 = vst.msk [vmem:[#allocation2 + $0x8] sm:$0xff] %vm530_vm11, %v2139_v2 }
0x11b4   : > { %v2150_v29 = vld [vmem:[#allocation2 + $0x10] sm:$0x1] }
0x11b5   : > { %v2148_v7 = vld [vmem:[#allocation2] sm:$0xff]  ;;  %2153 = vst.msk [vmem:[%s2936_s24 + $0x10] sm:$0x1] %vm537_vm12, %v2150_v29 }
0x11b6   : > { %2151 = vst.msk [vmem:[%s2936_s24] sm:$0xff] %vm530_vm11, %v2148_v7 }
0x11b7   : > { %v2149_v59 = vld [vmem:[#allocation2 + $0x8] sm:$0xff] }
0x11b8   : > { %2152 = vst.msk [vmem:[%s2936_s24 + $0x8] sm:$0xff] %vm530_vm11, %v2149_v59 }
0x11b9 PF: > { %s20_s13 = sadd.s32 1, %s2822_s13   ;;  %s3319_s30 = smov %s2814_s11 }
0x11ba   : > { %p17_p8 = scmp.ge.s32.totalorder %s20_s13, 22   ;;  %s3320_s10 = smov %s2818_s12 }
0x11bb   : > { %s3321_s11 = smov %s3324_s14  ;;  %s3322_s12 = smov %s3328_s15 }
0x11bc   :  { %19 = sbr.rel (!%p17_p8) target bundleno = 3 (0x3), region = 111 }

// kernel: transformer_forward.4
= control target key start
LH: loop header
LB: loop body
LE: loop exit
PB: predicated region body
PF: predicated region fallthrough
CT: control target
= control target key end

     0   :  { %s1968_s18 = smov 0   ;;  %s2270_s0 = inlined_call_operand.vmem [shape: f32[2,17,32], index: 0, kind: input, shape index: {}]   ;;  %s2271_s1 = inlined_call_operand.vmem [shape: bf16[32,128], index: 1, kind: input, shape index: {}]   ;;  %s2272_s2 = inlined_call_operand.vmem [shape: bf16[96,128], index: 2, kind: input, shape index: {}]   ;;  %s2273_s3 = inlined_call_operand.vmem [shape: f32[8,128], index: 3, kind: input, shape index: {}]   ;;  %s2274_s4 = inlined_call_operand.vmem [shape: f32[2,17,32], index: 4, kind: output, shape index: {0}]   ;;  %s2275_s5 = inlined_call_operand.vmem [shape: f32[2,4,17,17], index: 5, kind: output, shape index: {1}]  }
   0x1 LB: > { %s1581_s19 = sadd.s32 4294967295, %s1919_s18   ;;  %p1585_p0 = scmp.ge.s32.totalorder %s1919_s18, 1  ;;  %s1919_s18 = sphi %s1968_s18, %s16_s18  }
   0x2   : > { %p190_p1 = scmp.lt.s32.totalorder %s1919_s18, 3 }
   0x4   : > { %p191_p2 = pnand %p1585_p0, %p190_p1 }
   0x5   : > { %p223_p3 = scmp.lt.s32.totalorder (!%p191_p2), %s1581_s19, 1  ;;  %vm259_vm0 = vcmask (!%p191_p2), 261120   ;;  %vm266_vm1 = vcmask (!%p191_p2), 253952   ;;  %v2005_v21 = vld [vmem:[%s2271_s1] sm:$0xff] (!%p191_p2)   ;;  %v2010_v22 = vld [vmem:[%s2271_s1 + $0x8] sm:$0xff] (!%p191_p2)   ;;  %v301_v30 = vlaneseq (!%p191_p2)  ;;  %s1921_s30 = smov (!%p191_p2), 96  }
   0x6   : > { %194 = sbr.rel (%p191_p2) target bundleno = 4253 (0x109d), region = 36  ;;  %1682 = vmatprep.subr.bf16.mxu0 (!%p191_p2), %v2005_v21  ;;  %v2022_v35 = vld [vmem:[%s2273_s3] sm:$0xff] (!%p191_p2)  ;;  %vm395_vm2 = vcmask (!%p191_p2), 64512   ;;  %vm459_vm3 = vcmask (!%p191_p2), 138240   ;;  %vm466_vm4 = vcmask (!%p191_p2), 131072   ;;  %s1922_s6 = smov (!%p191_p2), 64  }
   0x7   : > { %1683 = vmatpush3.bf16.msra.mxu0 (!%p191_p2), %v2005_v21  ;;  %v2016_v33 = vshrl.u32 (!%p191_p2), %v301_v30, 7  ;;  %s1923_s7 = smov (!%p191_p2), 120   ;;  %s1924_s8 = smov (!%p191_p2), 88   ;;  %vm510_vm5 = vcmask (!%p191_p2), 1040384   ;;  %vm1119_vm6 = vcmask (!%p191_p2), 130048   ;;  %vm1123_vm7 = vcmask (!%p191_p2), 195584  }
   0x8   : > { %1684 = vmatprep.subr.bf16.mxu0 (!%p191_p2), %v2010_v22  ;;  %s1926_s13 = smov (!%p191_p2), 56   ;;  %s1927_s14 = smov (!%p191_p2), 80   ;;  %vm1432_vm11 = vcmask (!%p191_p2), 523264  }
   0x9   : > { %v303_v34 = vsub.s32 (!%p191_p2), 0, %v2016_v33  ;;  %v310_v39 = vsub.s32 (!%p191_p2), 1, %v2016_v33  ;;  %v319_v53 = vsub.s32 (!%p191_p2), 2, %v2016_v33  ;;  %s1928_s15 = smov (!%p191_p2), 112   ;;  %s1929_s16 = smov (!%p191_p2), 48  }
   0xa   : > { %s1930_s17 = smov (!%p191_p2), 72   ;;  %s1931_s21 = smov (!%p191_p2), 104  }
   0xb   : > { %1685 = vmatpush3.bf16.msra.mxu0 (!%p191_p2), %v2010_v22  ;;  %v304_v38 = vrot.slane (!%p191_p2), %v2022_v35, %v303_v34  ;;  %v311_v45 = vrot.slane (!%p191_p2), %v2022_v35, %v310_v39  ;;  %v320_v54 = vrot.slane (!%p191_p2), %v2022_v35, %v319_v53  ;;  %s1932_s22 = smov (!%p191_p2), 40   ;;  %s1934_s24 = smov (!%p191_p2), 8  }
   0xc   : > { %s1935_s25 = smov (!%p191_p2), 16   ;;  %s1936_s26 = smov (!%p191_p2), 24  }
   0xd   : > { %s2277_s19 = smov (!%p223_p3, %s1581_s19), 1 }
   0xe   : > { %s1790_s20 = smul.u32 24, %s2277_s19 }
   0xf   : > { %s1791_s9 = smul.u32 96, %s2277_s19 }
  0x10   : > { %s227_s23 = scalar_lea.vmem %s2270_s0, %s1790_s20 }
  0x11   : > { %v1984_v0 = vld [vmem:[%s227_s23] sm:$0xff]  ;;  %v1986_v1 = vld [vmem:[%s227_s23 + $0x10] sm:$0x1]  ;;  %v1988_v2 = vld [vmem:[%s227_s23 + $0x8] sm:$0xff]  ;;  %s2063_s12 = scalar_lea.vmem %s2275_s5, %s1791_s9  ;;  %s1933_s23 = smov 32  }
  0x12   : > { %v260_v3 = vsel %vm259_vm0, %v1984_v0, 0.0  ;;  %v267_v4 = vsel %vm266_vm1, %v1986_v1, 0.0  ;;  %v263_v5 = vsel %vm259_vm0, %v1988_v2, 0.0 }
  0x13   : > { %261 = vadd.xlane.f32.xlu0 %v260_v3  ;;  %268 = vadd.xlane.f32.xlu1 %v267_v4 }
  0x17   : > { %264 = vadd.xlane.f32.xlu0 %v263_v5 }
  0xa0   : > { %v262_v6 = vpop.xlane.xlu0 %261  ;;  %v269_v7 = vpop.xlane.xlu1 %268 }
  0xa1   : > { %v271_v8 = vmul.f32 0.03125, %v262_v6  ;;  %v273_v9 = vmul.f32 0.03125, %v269_v7 }
  0xa3   : > { %v274_v10 = vsub.f32 %v1984_v0, %v271_v8  ;;  %v276_v11 = vsub.f32 %v1986_v1, %v273_v9 }
  0xa4   : > { %v265_v12 = vpop.xlane.xlu0 %264 }
  0xa5   : > { %v272_v13 = vmul.f32 0.03125, %v265_v12  ;;  %v277_v14 = vmul.f32 %v274_v10, %v274_v10  ;;  %v279_v15 = vmul.f32 %v276_v11, %v276_v11 }
  0xa7   : > { %v275_v16 = vsub.f32 %v1988_v2, %v272_v13  ;;  %v280_v17 = vsel %vm259_vm0, %v277_v14, 0.0  ;;  %v286_v18 = vsel %vm266_vm1, %v279_v15, 0.0 }
  0xa8   : > { %281 = vadd.xlane.f32.xlu1 %v280_v17 }
  0xa9   : > { %v278_v19 = vmul.f32 %v275_v16, %v275_v16 }
  0xab   : > { %v283_v20 = vsel %vm259_vm0, %v278_v19, 0.0 }
  0xac   : > { %287 = vadd.xlane.f32.xlu1 %v286_v18  ;;  %284 = vadd.xlane.f32.xlu0 %v283_v20 }
 0x135   : > { %v282_v23 = vpop.xlane.xlu1 %281 }
 0x136   : > { %v289_v24 = vmul.f32 0.03125, %v282_v23 }
 0x138   : > { %v292_v25 = vadd.f32 1e-06, %v289_v24 }
 0x139   : > { %v288_v26 = vpop.xlane.xlu1 %287  ;;  %v285_v27 = vpop.xlane.xlu0 %284 }
 0x13a   : > { %1840 = vrsqrt.f32 %v292_v25  ;;  %v291_v28 = vmul.f32 0.03125, %v288_v26  ;;  %v290_v29 = vmul.f32 0.03125, %v285_v27 }
 0x13c   : > { %v294_v31 = vadd.f32 1e-06, %v291_v28  ;;  %v293_v32 = vadd.f32 1e-06, %v290_v29 }
 0x13e   : > { %1842 = vrsqrt.f32 %v294_v31 }
 0x13f   : > { %1844 = vrsqrt.f32 %v293_v32 }
 0x144   : > { %v1841_v36 = vpop.eup %1840 }
 0x145   : > { %v298_v37 = vmul.f32 %v1841_v36, %v274_v10 }
 0x147   : > { %v305_v44 = vmul.f32 %v304_v38, %v298_v37 }
 0x148   : > { %v1843_v40 = vpop.eup %1842 }
 0x149   : > { %v1845_v41 = vpop.eup %1844  ;;  %v300_v42 = vmul.f32 %v1843_v40, %v276_v11  ;;  %v312_v49 = vadd.f32 %v311_v45, %v305_v44  ;;  %v1925_v40 = vmov 0  }
 0x14a   : > { %v299_v43 = vmul.f32 %v1845_v41, %v275_v16  ;;  %v2058_v41 = vsel %vm510_vm5, 65535, %v1925_v40 }
 0x14b   : > { %v307_v46 = vmul.f32 %v304_v38, %v300_v42 }
 0x14c   : > { %v306_v47 = vmul.f32 %v304_v38, %v299_v43 }
 0x14d   : > { %v314_v48 = vadd.f32 %v311_v45, %v307_v46 }
 0x14e   : > { %v313_v50 = vadd.f32 %v311_v45, %v306_v47 }
 0x14f   : > { %v316_v51 = vpack.c.bf16 %v314_v48, %v314_v48 }
 0x150   : > { %v315_v52 = vpack.c.bf16 %v313_v50, %v312_v49 }
 0x152   : > { %1686 = vmatprep.mubr.msk.bf16.mxu0 %vm259_vm0, %v315_v52 }
 0x153   : > { %1687 = vmatmul.mubr.msk.bf16.vlgmr.msra.gmra.mrb[0].mxu0 %vm259_vm0, %v316_v51 }
 0x226   : > { %v1688_v55 = vpop.f32.mrb[0].mxu0 }
 0x227   : > { %v382_v56 = vadd.f32 %v1688_v55, %v320_v54  ;;  %v373_v57 = vpop.f32.mrb[1].mxu0 }
 0x228   : > { %v1689_v58 = vpop.f32.mrb[2].mxu0  ;;  %v374_v61 = vadd.f32 %v373_v57, %v320_v54 }
 0x229   : > { %v2031_v59 = vpack.c.bf16 %v382_v56, %v382_v56  ;;  %v376_v60 = vpop.f32.mrb[3].mxu0 }
 0x22a   : > { %v377_v62 = vadd.f32 %v376_v60, %v320_v54 }
 0x22b   : > { %393 = vrot.lane.b32.xlu1 %v2031_v59, %s1921_s30 }
 0x22c   : > { %v2034_v63 = vpack.c.bf16 %v377_v62, %v374_v61 }
 0x22e   : > { %391 = vrot.lane.b32.xlu0 %v2034_v63, %s1921_s30  ;;  %1694 = vmatprep.mubr.msk.bf16.mxu1 %vm395_vm2, %v2034_v63 }
 0x29d   : > { %v394_v5 = vpop.permute.xlu1 %393 }
 0x29e   : > { %v406_v6 = vsel %vm395_vm2, %v394_v5, 0 }
 0x2a0   : > { %v392_v3 = vpop.permute.xlu0 %391 }
 0x2a1   : > { %1782 = vmatprep.subr.msk.bf16.mxu1 %vm395_vm2, %v392_v3  ;;  %v403_v4 = vsel %vm395_vm2, %v392_v3, 0 }
 0x2a2   : > { %1691 = vmatpush3.bf16.xpose.msra.mxu1 %v403_v4 }
 0x2a3   : > { %1783 = vmatprep.subr.msk.bf16.mxu1 %vm395_vm2, %v394_v5 }
 0x2aa   : > { %1693 = vmatpush3.bf16.xpose.msra.mxu1 %v406_v6 }
 0x2b1   : > { %1695 = vmatmul.mubr.msk.bf16.vlgmr.msra.gmra.mrb[0].mxu1 %vm395_vm2, %v2031_v59 }
 0x384   : > { %v1696_v7 = vpop.f32.mrb[0].mxu1 }
 0x385   : > { %v442_v8 = vpop.f32.mrb[1].mxu1  ;;  %v458_v14 = vmul.f32 0.35355338, %v1696_v7 }
 0x386   : > { %v456_v9 = vmul.f32 0.35355338, %v442_v8  ;;  %v1697_v10 = vpop.f32.mrb[2].mxu1 }
 0x387   : > { %v445_v11 = vpop.f32.mrb[3].mxu1  ;;  %v467_v16 = vsel %vm466_vm4, %v458_v14, -inf }
 0x388   : > { %v457_v12 = vmul.f32 0.35355338, %v445_v11  ;;  %v460_v13 = vsel %vm459_vm3, %v456_v9, -inf }
 0x389   : > { %461 = vmax.xlane.f32.xlu1 %v460_v13 }
 0x38a   : > { %v463_v15 = vsel %vm459_vm3, %v457_v12, -inf }
 0x38b   : > { %464 = vmax.xlane.f32.xlu0 %v463_v15 }
 0x38f   : > { %468 = vmax.xlane.f32.xlu0 %v467_v16 }
 0x416   : > { %v462_v17 = vpop.xlane.xlu1 %461 }
 0x417   : > { %v470_v20 = vsub.f32 %v456_v9, %v462_v17 }
 0x418   : > { %v465_v18 = vpop.xlane.xlu0 %464 }
 0x419   : > { %v471_v19 = vsub.f32 %v457_v12, %v465_v18  ;;  %v473_v26 = vmul.f32 1.442695, %v470_v20 }
 0x41b   : > { %v475_v23 = vmul.f32 1.442695, %v471_v19 }
 0x41c   : > { %v469_v24 = vpop.xlane.xlu0 %468 }
 0x41d   : > { %1846 = vpow2.f32 %v475_v23  ;;  %v472_v25 = vsub.f32 %v458_v14, %v469_v24 }
 0x41f   : > { %v477_v27 = vmul.f32 1.442695, %v472_v25 }
 0x421   : > { %1848 = vpow2.f32 %v477_v27 }
 0x422   : > { %1850 = vpow2.f32 %v473_v26 }
 0x427   : > { %v1847_v28 = vpop.eup %1846 }
 0x428   : > { %v482_v29 = vsel %vm459_vm3, %v1847_v28, 0.0 }
 0x429   : > { %483 = vadd.xlane.f32.xlu0 %v482_v29 }
 0x42b   : > { %v1849_v30 = vpop.eup %1848 }
 0x42c   : > { %v485_v31 = vsel %vm466_vm4, %v1849_v30, 0.0  ;;  %v1851_v32 = vpop.eup %1850 }
 0x42d   : > { %486 = vadd.xlane.f32.xlu1 %v485_v31  ;;  %v479_v34 = vsel %vm459_vm3, %v1851_v32, 0.0 }
 0x431   : > { %480 = vadd.xlane.f32.xlu1 %v479_v34 }
 0x43f   : > { %499 = vrot.lane.b32.xlu0 %v2034_v63, %s1922_s6 }
 0x442   : > { %501 = vrot.lane.b32.xlu1 %v2031_v59, %s1922_s6 }
 0x443   : > { %564 = vrot.lane.b32.xlu0 %v2034_v63, %s1923_s7 }
 0x446   : > { %568 = vrot.lane.b32.xlu1 %v2034_v63, %s1924_s8 }
 0x44a   : > { %570 = vrot.lane.b32.xlu1 %v2031_v59, %s1924_s8 }
 0x44e   : > { %566 = vrot.lane.b32.xlu1 %v2031_v59, %s1923_s7 }
 0x4b6   : > { %v484_v36 = vpop.xlane.xlu0 %483 }
 0x4b7   : > { %1852 = vrcp.f32 %v484_v36 }
 0x4ba   : > { %v487_v37 = vpop.xlane.xlu1 %486  ;;  %v500_v38 = vpop.permute.xlu0 %499 }
 0x4bb   : > { %1854 = vrcp.f32 %v487_v37  ;;  %1698 = vmatprep.subr.bf16.mxu0 %v500_v38 }
 0x4bc   : > { %1699 = vmatpush3.bf16.msra.mxu0 %v500_v38 }
 0x4be   : > { %v481_v39 = vpop.xlane.xlu1 %480  ;;  %v565_v53 = vpop.permute.xlu0 %564 }
 0x4bf   : > { %1856 = vrcp.f32 %v481_v39 }
 0x4c1   : > { %v1853_v42 = vpop.eup %1852 }
 0x4c2   : > { %v502_v43 = vpop.permute.xlu1 %501  ;;  %v492_v44 = vmul.f32 %v1853_v42, %v1847_v28 }
 0x4c3   : > { %v514_v45 = vand.u32 %v2058_v41, %v502_v43 }
 0x4c4   : > { %495 = vst.msk [vmem:[%s2063_s12 + $0x8] sm:$0xff] %vm459_vm3, %v492_v44 }
 0x4c5   : > { %v1855_v46 = vpop.eup %1854  ;;  %1700 = vmatprep.subr.bf16.mxu0 %v514_v45 }
 0x4c6   : > { %v493_v47 = vmul.f32 %v1855_v46, %v1849_v30  ;;  %v569_v48 = vpop.permute.xlu1 %568  ;;  %1701 = vmatpush3.bf16.msra.mxu0 %v514_v45 }
 0x4c7   : > { %1784 = vmatprep.subr.msk.bf16.mxu0 %vm395_vm2, %v569_v48  ;;  %v579_v54 = vsel %vm395_vm2, %v569_v48, 0 }
 0x4c8   : > { %496 = vst.msk [vmem:[%s2063_s12 + $0x10] sm:$0x1] %vm466_vm4, %v493_v47  ;;  %v498_v52 = vpack.c.bf16 %v493_v47, %v493_v47 }
 0x4c9   : > { %v1857_v49 = vpop.eup %1856 }
 0x4ca   : > { %v491_v50 = vmul.f32 %v1857_v49, %v1851_v32  ;;  %v571_v55 = vpop.permute.xlu1 %570 }
 0x4cb   : > { %v582_v56 = vsel %vm395_vm2, %v571_v55, 0 }
 0x4cc   : > { %494 = vst.msk [vmem:[%s2063_s12] sm:$0xff] %vm459_vm3, %v491_v50  ;;  %v497_v51 = vpack.c.bf16 %v492_v44, %v491_v50 }
 0x4ce   : > { %1702 = vmatprep.mubr.msk.bf16.mxu0 %vm459_vm3, %v497_v51  ;;  %v567_v57 = vpop.permute.xlu1 %566 }
 0x4cf   : > { %1703 = vmatmul.mubr.msk.bf16.vlgmr.msra.gmra.mrb[4].mxu0 %vm459_vm3, %v498_v52 }
 0x4d0   : > { %1707 = vmatpush3.bf16.xpose.msra.mxu0 %v579_v54  ;;  %1710 = vmatprep.mubr.msk.bf16.mxu0 %vm395_vm2, %v565_v53 }
 0x4d1   : > { %1785 = vmatprep.subr.msk.bf16.mxu0 %vm395_vm2, %v571_v55 }
 0x4d8   : > { %1709 = vmatpush3.bf16.xpose.msra.mxu0 %v582_v56 }
 0x4df   : > { %1711 = vmatmul.mubr.msk.bf16.vlgmr.msra.gmra.mrb[8].mxu0 %vm395_vm2, %v567_v57 }
 0x5a2   : > { %v2080_v58 = vpop.f32.mrb[4].mxu0 }
 0x5a3   : > { %v2082_v60 = vpop.f32.mrb[5].mxu0 }
 0x5a4   : > { %v1705_v61 = vpop.f32.mrb[6].mxu0 }
 0x5a5   : > { %v2084_v62 = vpop.f32.mrb[7].mxu0 }
 0x5b2   : > { %v1712_v3 = vpop.f32.mrb[8].mxu0 }
 0x5b3   : > { %v618_v4 = vpop.f32.mrb[9].mxu0  ;;  %v634_v8 = vmul.f32 0.35355338, %v1712_v3 }
 0x5b4   : > { %v632_v5 = vmul.f32 0.35355338, %v618_v4  ;;  %v1713_v6 = vpop.f32.mrb[10].mxu0 }
 0x5b5   : > { %v621_v7 = vpop.f32.mrb[11].mxu0  ;;  %v641_v12 = vsel %vm466_vm4, %v634_v8, -inf }
 0x5b6   : > { %v633_v9 = vmul.f32 0.35355338, %v621_v7  ;;  %v635_v10 = vsel %vm459_vm3, %v632_v5, -inf }
 0x5b7   : > { %636 = vmax.xlane.f32.xlu0 %v635_v10 }
 0x5b8   : > { %v638_v11 = vsel %vm459_vm3, %v633_v9, -inf }
 0x5b9   : > { %639 = vmax.xlane.f32.xlu1 %v638_v11 }
 0x5bb   : > { %642 = vmax.xlane.f32.xlu0 %v641_v12 }
 0x644   : > { %v637_v13 = vpop.xlane.xlu0 %636 }
 0x645   : > { %v644_v14 = vsub.f32 %v632_v5, %v637_v13 }
 0x646   : > { %v640_v15 = vpop.xlane.xlu1 %639 }
 0x647   : > { %v647_v16 = vmul.f32 1.442695, %v644_v14  ;;  %v645_v17 = vsub.f32 %v633_v9, %v640_v15 }
 0x648   : > { %v643_v18 = vpop.xlane.xlu0 %642 }
 0x649   : > { %1858 = vpow2.f32 %v647_v16  ;;  %v649_v19 = vmul.f32 1.442695, %v645_v17  ;;  %v646_v20 = vsub.f32 %v634_v8, %v643_v18 }
 0x64b   : > { %1860 = vpow2.f32 %v649_v19  ;;  %v651_v23 = vmul.f32 1.442695, %v646_v20 }
 0x64d   : > { %1862 = vpow2.f32 %v651_v23 }
 0x653   : > { %v1859_v24 = vpop.eup %1858 }
 0x654   : > { %v653_v25 = vsel %vm459_vm3, %v1859_v24, 0.0 }
 0x655   : > { %v1861_v26 = vpop.eup %1860  ;;  %654 = vadd.xlane.f32.xlu0 %v653_v25 }
 0x656   : > { %v656_v29 = vsel %vm459_vm3, %v1861_v26, 0.0 }
 0x657   : > { %v1863_v27 = vpop.eup %1862 }
 0x658   : > { %v659_v28 = vsel %vm466_vm4, %v1863_v27, 0.0 }
 0x659   : > { %660 = vadd.xlane.f32.xlu1 %v659_v28  ;;  %657 = vadd.xlane.f32.xlu0 %v656_v29 }
 0x66a   : > { %676 = vrot.lane.b32.xlu1 %v2031_v59, %s1926_s13 }
 0x66e   : > { %740 = vrot.lane.b32.xlu1 %v2034_v63, %s1927_s14 }
 0x66f   : > { %674 = vrot.lane.b32.xlu0 %v2034_v63, %s1926_s13 }
 0x672   : > { %742 = vrot.lane.b32.xlu1 %v2031_v59, %s1927_s14 }
 0x673   : > { %736 = vrot.lane.b32.xlu0 %v2034_v63, %s1928_s15 }
 0x676   : > { %738 = vrot.lane.b32.xlu1 %v2031_v59, %s1928_s15 }
 0x6e2   : > { %v655_v30 = vpop.xlane.xlu0 %654 }
 0x6e3   : > { %1864 = vrcp.f32 %v655_v30 }
 0x6e6   : > { %v658_v31 = vpop.xlane.xlu0 %657  ;;  %v661_v32 = vpop.xlane.xlu1 %660 }
 0x6e7   : > { %1866 = vrcp.f32 %v658_v31 }
 0x6e8   : > { %1868 = vrcp.f32 %v661_v32 }
 0x6ea   : > { %v675_v34 = vpop.permute.xlu0 %674  ;;  %v677_v36 = vpop.permute.xlu1 %676 }
 0x6eb   : > { %v686_v37 = vand.u32 %v677_v36, %v2058_v41  ;;  %1714 = vmatprep.subr.bf16.mxu1 %v675_v34 }
 0x6ec   : > { %1715 = vmatpush3.bf16.msra.mxu1 %v675_v34 }
 0x6ed   : > { %v1865_v38 = vpop.eup %1864  ;;  %1716 = vmatprep.subr.bf16.mxu1 %v686_v37 }
 0x6ee   : > { %v665_v39 = vmul.f32 %v1865_v38, %v1859_v24  ;;  %v741_v40 = vpop.permute.xlu1 %740  ;;  %v737_v48 = vpop.permute.xlu0 %736 }
 0x6ef   : > { %v751_v49 = vsel %vm395_vm2, %v741_v40, 0 }
 0x6f0   : > { %1717 = vmatpush3.bf16.msra.mxu1 %v686_v37  ;;  %1599 = vst.msk [vmem:[%s2063_s12 + $0x18] sm:$0xff] %vm459_vm3, %v665_v39 }
 0x6f1   : > { %v1867_v42 = vpop.eup %1866  ;;  %1786 = vmatprep.subr.msk.bf16.mxu1 %vm395_vm2, %v741_v40 }
 0x6f2   : > { %v1869_v43 = vpop.eup %1868  ;;  %v666_v44 = vmul.f32 %v1867_v42, %v1861_v26  ;;  %v743_v50 = vpop.permute.xlu1 %742 }
 0x6f3   : > { %v667_v45 = vmul.f32 %v1869_v43, %v1863_v27  ;;  %v754_v51 = vsel %vm395_vm2, %v743_v50, 0 }
 0x6f4   : > { %1600 = vst.msk [vmem:[%s2063_s12 + $0x20] sm:$0xff] %vm459_vm3, %v666_v44  ;;  %v672_v46 = vpack.c.bf16 %v666_v44, %v665_v39 }
 0x6f5   : > { %1601 = vst.msk [vmem:[%s2063_s12 + $0x28] sm:$0x1] %vm466_vm4, %v667_v45  ;;  %v673_v47 = vpack.c.bf16 %v667_v45, %v667_v45 }
 0x6f6   : > { %1718 = vmatprep.mubr.msk.bf16.mxu1 %vm459_vm3, %v672_v46  ;;  %v739_v52 = vpop.permute.xlu1 %738 }
 0x6f7   : > { %1719 = vmatmul.mubr.msk.bf16.vlgmr.msra.gmra.mrb[4].mxu1 %vm459_vm3, %v673_v47 }
 0x6f8   : > { %1726 = vmatprep.mubr.msk.bf16.mxu1 %vm395_vm2, %v737_v48 }
 0x6f9   : > { %1723 = vmatpush3.bf16.xpose.msra.mxu1 %v751_v49 }
 0x6fa   : > { %1787 = vmatprep.subr.msk.bf16.mxu1 %vm395_vm2, %v743_v50 }
 0x701   : > { %1725 = vmatpush3.bf16.xpose.msra.mxu1 %v754_v51 }
 0x708   : > { %1727 = vmatmul.mubr.msk.bf16.vlgmr.msra.gmra.mrb[8].mxu1 %vm395_vm2, %v739_v52 }
 0x7ca   : > { %v2113_v53 = vpop.f32.mrb[4].mxu1 }
 0x7cb   : > { %v2115_v54 = vpop.f32.mrb[5].mxu1 }
 0x7cc   : > { %v1721_v55 = vpop.f32.mrb[6].mxu1 }
 0x7cd   : > { %v2117_v56 = vpop.f32.mrb[7].mxu1 }
 0x7ce   : > { %v1817_v57 = vpack.i.bf16 %v2117_v56, %v2115_v54 }
 0x7db   : > { %v1728_v61 = vpop.f32.mrb[8].mxu1 }
 0x7dc   : > { %v790_v3 = vpop.f32.mrb[9].mxu1  ;;  %v806_v7 = vmul.f32 0.35355338, %v1728_v61 }
 0x7dd   : > { %v804_v4 = vmul.f32 0.35355338, %v790_v3  ;;  %v1729_v5 = vpop.f32.mrb[10].mxu1 }
 0x7de   : > { %v793_v6 = vpop.f32.mrb[11].mxu1  ;;  %v813_v11 = vsel %vm466_vm4, %v806_v7, -inf }
 0x7df   : > { %v805_v8 = vmul.f32 0.35355338, %v793_v6  ;;  %v807_v9 = vsel %vm459_vm3, %v804_v4, -inf }
 0x7e0   : > { %808 = vmax.xlane.f32.xlu0 %v807_v9 }
 0x7e1   : > { %v810_v10 = vsel %vm459_vm3, %v805_v8, -inf }
 0x7e2   : > { %811 = vmax.xlane.f32.xlu1 %v810_v10 }
 0x7e4   : > { %814 = vmax.xlane.f32.xlu0 %v813_v11 }
 0x86d   : > { %v809_v12 = vpop.xlane.xlu0 %808 }
 0x86e   : > { %v816_v13 = vsub.f32 %v804_v4, %v809_v12 }
 0x86f   : > { %v812_v14 = vpop.xlane.xlu1 %811 }
 0x870   : > { %v819_v15 = vmul.f32 1.442695, %v816_v13  ;;  %v817_v16 = vsub.f32 %v805_v8, %v812_v14 }
 0x871   : > { %v815_v17 = vpop.xlane.xlu0 %814 }
 0x872   : > { %1870 = vpow2.f32 %v819_v15  ;;  %v821_v18 = vmul.f32 1.442695, %v817_v16  ;;  %v818_v19 = vsub.f32 %v806_v7, %v815_v17 }
 0x874   : > { %1872 = vpow2.f32 %v821_v18  ;;  %v823_v20 = vmul.f32 1.442695, %v818_v19 }
 0x876   : > { %1874 = vpow2.f32 %v823_v20 }
 0x87c   : > { %v1871_v23 = vpop.eup %1870 }
 0x87d   : > { %v825_v24 = vsel %vm459_vm3, %v1871_v23, 0.0 }
 0x87e   : > { %v1873_v25 = vpop.eup %1872  ;;  %826 = vadd.xlane.f32.xlu0 %v825_v24 }
 0x87f   : > { %v828_v28 = vsel %vm459_vm3, %v1873_v25, 0.0 }
 0x880   : > { %v1875_v26 = vpop.eup %1874 }
 0x881   : > { %v831_v27 = vsel %vm466_vm4, %v1875_v26, 0.0 }
 0x882   : > { %832 = vadd.xlane.f32.xlu1 %v831_v27  ;;  %829 = vadd.xlane.f32.xlu0 %v828_v28 }
 0x893   : > { %848 = vrot.lane.b32.xlu1 %v2031_v59, %s1929_s16 }
 0x897   : > { %912 = vrot.lane.b32.xlu1 %v2034_v63, %s1930_s17 }
 0x898   : > { %846 = vrot.lane.b32.xlu0 %v2034_v63, %s1929_s16 }
 0x89b   : > { %914 = vrot.lane.b32.xlu1 %v2031_v59, %s1930_s17 }
 0x89c   : > { %908 = vrot.lane.b32.xlu0 %v2034_v63, %s1931_s21 }
 0x89f   : > { %910 = vrot.lane.b32.xlu1 %v2031_v59, %s1931_s21  ;;  %s232_s21 = scalar_lea.vmem %s2274_s4, %s1790_s20 }
 0x90b   : > { %v827_v29 = vpop.xlane.xlu0 %826 }
 0x90c   : > { %1876 = vrcp.f32 %v827_v29 }
 0x90f   : > { %v830_v30 = vpop.xlane.xlu0 %829  ;;  %v833_v31 = vpop.xlane.xlu1 %832 }
 0x910   : > { %1878 = vrcp.f32 %v830_v30 }
 0x911   : > { %1880 = vrcp.f32 %v833_v31 }
 0x913   : > { %v847_v32 = vpop.permute.xlu0 %846  ;;  %v849_v34 = vpop.permute.xlu1 %848 }
 0x914   : > { %v858_v36 = vand.u32 %v849_v34, %v2058_v41  ;;  %1730 = vmatprep.subr.bf16.mxu0 %v847_v32 }
 0x915   : > { %1731 = vmatpush3.bf16.msra.mxu0 %v847_v32 }
 0x916   : > { %v1877_v37 = vpop.eup %1876  ;;  %1732 = vmatprep.subr.bf16.mxu0 %v858_v36 }
 0x917   : > { %v837_v38 = vmul.f32 %v1877_v37, %v1871_v23  ;;  %v913_v39 = vpop.permute.xlu1 %912  ;;  %v909_v47 = vpop.permute.xlu0 %908 }
 0x918   : > { %v923_v48 = vsel %vm395_vm2, %v913_v39, 0 }
 0x919   : > { %1733 = vmatpush3.bf16.msra.mxu0 %v858_v36  ;;  %1606 = vst.msk [vmem:[%s2063_s12 + $0x30] sm:$0xff] %vm459_vm3, %v837_v38 }
 0x91a   : > { %v1879_v40 = vpop.eup %1878  ;;  %1788 = vmatprep.subr.msk.bf16.mxu0 %vm395_vm2, %v913_v39 }
 0x91b   : > { %v1881_v42 = vpop.eup %1880  ;;  %v838_v43 = vmul.f32 %v1879_v40, %v1873_v25  ;;  %v915_v49 = vpop.permute.xlu1 %914 }
 0x91c   : > { %v839_v44 = vmul.f32 %v1881_v42, %v1875_v26  ;;  %v926_v50 = vsel %vm395_vm2, %v915_v49, 0 }
 0x91d   : > { %1607 = vst.msk [vmem:[%s2063_s12 + $0x38] sm:$0xff] %vm459_vm3, %v838_v43  ;;  %v844_v45 = vpack.c.bf16 %v838_v43, %v837_v38 }
 0x91e   : > { %1608 = vst.msk [vmem:[%s2063_s12 + $0x40] sm:$0x1] %vm466_vm4, %v839_v44  ;;  %v845_v46 = vpack.c.bf16 %v839_v44, %v839_v44 }
 0x91f   : > { %1734 = vmatprep.mubr.msk.bf16.mxu0 %vm459_vm3, %v844_v45  ;;  %v911_v51 = vpop.permute.xlu1 %910 }
 0x920   : > { %1735 = vmatmul.mubr.msk.bf16.vlgmr.msra.gmra.mrb[12].mxu0 %vm459_vm3, %v845_v46 }
 0x921   : > { %1742 = vmatprep.mubr.msk.bf16.mxu0 %vm395_vm2, %v909_v47 }
 0x922   : > { %1739 = vmatpush3.bf16.xpose.msra.mxu0 %v923_v48 }
 0x923   : > { %1789 = vmatprep.subr.msk.bf16.mxu0 %vm395_vm2, %v915_v49 }
 0x92a   : > { %1741 = vmatpush3.bf16.xpose.msra.mxu0 %v926_v50 }
 0x931   : > { %1743 = vmatmul.mubr.msk.bf16.vlgmr.msra.gmra.mrb[16].mxu0 %vm395_vm2, %v911_v51 }
 0x9f3   : > { %v1736_v52 = vpop.f32.mrb[12].mxu0 }
 0x9f4   : > { %v894_v55 = vpop.f32.mrb[13].mxu0 }
 0x9f5   : > { %v1737_v61 = vpop.f32.mrb[14].mxu0 }
 0x9f6   : > { %v897_v3 = vpop.f32.mrb[15].mxu0 }
 0x9f7   : > { %v1822_v4 = vpack.i.bf16 %v897_v3, %v894_v55 }
 0xa04   : > { %v1744_v5 = vpop.f32.mrb[16].mxu0 }
 0xa05   : > { %v962_v6 = vpop.f32.mrb[17].mxu0  ;;  %v978_v10 = vmul.f32 0.35355338, %v1744_v5 }
 0xa06   : > { %v976_v7 = vmul.f32 0.35355338, %v962_v6  ;;  %v1745_v8 = vpop.f32.mrb[18].mxu0 }
 0xa07   : > { %v965_v9 = vpop.f32.mrb[19].mxu0  ;;  %v985_v14 = vsel %vm466_vm4, %v978_v10, -inf }
 0xa08   : > { %v977_v11 = vmul.f32 0.35355338, %v965_v9  ;;  %v979_v12 = vsel %vm459_vm3, %v976_v7, -inf }
 0xa09   : > { %980 = vmax.xlane.f32.xlu0 %v979_v12 }
 0xa0a   : > { %v982_v13 = vsel %vm459_vm3, %v977_v11, -inf }
 0xa0b   : > { %983 = vmax.xlane.f32.xlu1 %v982_v13 }
 0xa0d   : > { %986 = vmax.xlane.f32.xlu0 %v985_v14 }
 0xa96   : > { %v981_v15 = vpop.xlane.xlu0 %980 }
 0xa97   : > { %v988_v16 = vsub.f32 %v976_v7, %v981_v15 }
 0xa98   : > { %v984_v17 = vpop.xlane.xlu1 %983 }
 0xa99   : > { %v991_v18 = vmul.f32 1.442695, %v988_v16  ;;  %v989_v19 = vsub.f32 %v977_v11, %v984_v17 }
 0xa9a   : > { %v987_v20 = vpop.xlane.xlu0 %986 }
 0xa9b   : > { %1882 = vpow2.f32 %v991_v18  ;;  %v993_v23 = vmul.f32 1.442695, %v989_v19  ;;  %v990_v24 = vsub.f32 %v978_v10, %v987_v20 }
 0xa9d   : > { %1884 = vpow2.f32 %v993_v23  ;;  %v995_v25 = vmul.f32 1.442695, %v990_v24 }
 0xa9f   : > { %1886 = vpow2.f32 %v995_v25 }
 0xaa5   : > { %v1883_v26 = vpop.eup %1882 }
 0xaa6   : > { %v997_v27 = vsel %vm459_vm3, %v1883_v26, 0.0 }
 0xaa7   : > { %v1885_v28 = vpop.eup %1884  ;;  %998 = vadd.xlane.f32.xlu0 %v997_v27 }
 0xaa8   : > { %v1000_v31 = vsel %vm459_vm3, %v1885_v28, 0.0 }
 0xaa9   : > { %v1887_v29 = vpop.eup %1886 }
 0xaaa   : > { %v1003_v30 = vsel %vm466_vm4, %v1887_v29, 0.0 }
 0xaab   : > { %1004 = vadd.xlane.f32.xlu1 %v1003_v30  ;;  %1001 = vadd.xlane.f32.xlu0 %v1000_v31 }
 0xabc   : > { %1020 = vrot.lane.b32.xlu1 %v2031_v59, %s1932_s22 }
 0xac0   : > { %1133 = vrot.lane.b32.xlu1 %v2005_v21, %s1933_s23 }
 0xac1   : > { %1018 = vrot.lane.b32.xlu0 %v2034_v63, %s1932_s22 }
 0xac4   : > { %1818 = vrot.lane.b32.xlu1 %v1817_v57, %s1934_s24 }
 0xac5   : > { %1087 = vrot.lane.b32.xlu0 %v2113_v53, %s1934_s24 }
 0xac8   : > { %1823 = vrot.lane.b32.xlu1 %v1822_v4, %s1935_s25 }
 0xac9   : > { %1099 = vrot.lane.b32.xlu0 %v1736_v52, %s1935_s25 }
 0xacd   : > { %1135 = vrot.lane.b32.xlu0 %v2010_v22, %s1933_s23 }
 0xb34   : > { %v999_v32 = vpop.xlane.xlu0 %998 }
 0xb35   : > { %1888 = vrcp.f32 %v999_v32 }
 0xb38   : > { %v1002_v59 = vpop.xlane.xlu0 %1001  ;;  %v1005_v34 = vpop.xlane.xlu1 %1004 }
 0xb39   : > { %1890 = vrcp.f32 %v1002_v59 }
 0xb3a   : > { %1892 = vrcp.f32 %v1005_v34 }
 0xb3c   : > { %v1019_v21 = vpop.permute.xlu0 %1018  ;;  %v1021_v63 = vpop.permute.xlu1 %1020 }
 0xb3d   : > { %v1030_v36 = vand.u32 %v1021_v63, %v2058_v41  ;;  %1746 = vmatprep.subr.bf16.mxu1 %v1019_v21 }
 0xb3e   : > { %1747 = vmatpush3.bf16.msra.mxu1 %v1019_v21 }
 0xb3f   : > { %v1889_v53 = vpop.eup %1888  ;;  %1748 = vmatprep.subr.bf16.mxu1 %v1030_v36 }
 0xb40   : > { %v1088_v54 = vpop.permute.xlu0 %1087  ;;  %v1009_v56 = vmul.f32 %v1889_v53, %v1883_v26  ;;  %v1134_v57 = vpop.permute.xlu1 %1133 }
 0xb41   : > { %v1118_v22 = vsel %vm395_vm2, %v2080_v58, %v1088_v54 }
 0xb42   : > { %1749 = vmatpush3.bf16.msra.mxu1 %v1030_v36  ;;  %1613 = vst.msk [vmem:[%s2063_s12 + $0x48] sm:$0xff] %vm459_vm3, %v1009_v56 }
 0xb43   : > { %v1891_v37 = vpop.eup %1890  ;;  %1754 = vmatprep.subr.bf16.mxu1 %v1134_v57 }
 0xb44   : > { %v1893_v38 = vpop.eup %1892  ;;  %v1010_v39 = vmul.f32 %v1891_v37, %v1885_v28  ;;  %v1100_v58 = vpop.permute.xlu0 %1099 }
 0xb45   : > { %v1011_v41 = vmul.f32 %v1893_v38, %v1887_v29  ;;  %v1819_v49 = vpop.permute.xlu1 %1818  ;;  %v1122_v12 = vsel %vm1119_vm6, %v1118_v22, %v1100_v58  ;;  %v1834_v38 = vld [vmem:[%s2272_s2] sm:$0xff]  }
 0xb46   : > { %1614 = vst.msk [vmem:[%s2063_s12 + $0x50] sm:$0xff] %vm459_vm3, %v1010_v39  ;;  %v1016_v40 = vpack.c.bf16 %v1010_v39, %v1009_v56  ;;  %v1821_v51 = vunpack.i.h.bf16 %v1819_v49  ;;  %v1820_v52 = vunpack.i.l.bf16 %v1819_v49  ;;  %1762 = vmatprep.subr.bf16.mxu0 %v1834_v38  ;;  %v1835_v39 = vld [vmem:[%s2272_s2 + $0x8] sm:$0xff]  }
 0xb47   : > { %1615 = vst.msk [vmem:[%s2063_s12 + $0x58] sm:$0x1] %vm466_vm4, %v1011_v41  ;;  %v1017_v42 = vpack.c.bf16 %v1011_v41, %v1011_v41  ;;  %1763 = vmatpush3.bf16.msra.mxu0 %v1834_v38 }
 0xb48   : > { %1750 = vmatprep.mubr.msk.bf16.mxu1 %vm459_vm3, %v1016_v40  ;;  %v1136_v43 = vpop.permute.xlu0 %1135  ;;  %v1117_v4 = vsel %vm395_vm2, %v2084_v62, %v1821_v51  ;;  %v1116_v5 = vsel %vm395_vm2, %v2082_v60, %v1820_v52  ;;  %v1131_v62 = vsub.s32 3, %v2016_v33  ;;  %1764 = vmatprep.subr.bf16.mxu0 %v1835_v39  ;;  %v1244_v52 = vsub.s32 5, %v2016_v33 }
 0xb49   : > { %1751 = vmatmul.mubr.msk.bf16.vlgmr.msra.gmra.mrb[12].mxu1 %vm459_vm3, %v1017_v42  ;;  %v1824_v50 = vpop.permute.xlu1 %1823 }
 0xb4a   : > { %1755 = vmatpush3.bf16.msra.mxu1 %v1134_v57  ;;  %v1826_v55 = vunpack.i.h.bf16 %v1824_v50  ;;  %v1825_v61 = vunpack.i.l.bf16 %v1824_v50  ;;  %v1132_v17 = vrot.slane %v2022_v35, %v1131_v62  ;;  %v1839_v62 = vld [vmem:[%s2272_s2 + $0x28] sm:$0xff]  }
 0xb4b   : > { %1756 = vmatprep.subr.bf16.mxu1 %v1136_v43  ;;  %1765 = vmatpush3.bf16.msra.mxu0 %v1835_v39 }
 0xb4c   : > { %v1120_v8 = vsel %vm1119_vm6, %v1116_v5, %v1825_v61  ;;  %v1121_v9 = vsel %vm1119_vm6, %v1117_v4, %v1826_v55 }
 0xb4e   : > { %1757 = vmatpush3.bf16.msra.mxu1 %v1136_v43 }
 0xc1c   : > { %v1752_v44 = vpop.f32.mrb[12].mxu1 }
 0xc1d   : > { %v1066_v45 = vpop.f32.mrb[13].mxu1 }
 0xc1e   : > { %v1753_v46 = vpop.f32.mrb[14].mxu1 }
 0xc1f   : > { %v1069_v47 = vpop.f32.mrb[15].mxu1 }
 0xc20   : > { %v1827_v48 = vpack.i.bf16 %v1069_v47, %v1066_v45 }
 0xc22   : > { %1828 = vrot.lane.b32.xlu1 %v1827_v48, %s1936_s26  ;;  %v1237_v48 = vsub.s32 4, %v2016_v33 }
 0xc24   : > { %v1238_v51 = vrot.slane %v2022_v35, %v1237_v48 }
 0xc26   : > { %1111 = vrot.lane.b32.xlu1 %v1752_v44, %s1936_s26 }
 0xc94   : > { %v1829_v3 = vpop.permute.xlu1 %1828 }
 0xc95   : > { %v1831_v6 = vunpack.i.h.bf16 %v1829_v3  ;;  %v1830_v7 = vunpack.i.l.bf16 %v1829_v3 }
 0xc97   : > { %v1124_v10 = vsel %vm1123_vm7, %v1120_v8, %v1830_v7  ;;  %v1125_v11 = vsel %vm1123_vm7, %v1121_v9, %v1831_v6  ;;  %v1245_v6 = vrot.slane %v2022_v35, %v1244_v52 }
 0xc98   : > { %v1112_v13 = vpop.permute.xlu1 %1111  ;;  %v1127_v14 = vpack.c.bf16 %v1125_v11, %v1124_v10 }
 0xc99   : > { %v1126_v15 = vsel %vm1123_vm7, %v1122_v12, %v1112_v13 }
 0xc9a   : > { %v1128_v16 = vpack.c.bf16 %v1126_v15, %v1126_v15  ;;  %1758 = vmatprep.mubr.msk.bf16.mxu1 %vm259_vm0, %v1127_v14  ;;  %v1836_v14 = vld [vmem:[%s2272_s2 + $0x10] sm:$0xff]   ;;  %v1837_v15 = vld [vmem:[%s2272_s2 + $0x18] sm:$0xff]  }
 0xc9b   : > { %1770 = vmatprep.subr.bf16.mxu1 %v1836_v14 }
 0xc9c   : > { %1759 = vmatmul.mubr.msk.bf16.vlgmr.msra.gmra.mrb[16].mxu1 %vm259_vm0, %v1128_v16  ;;  %v1838_v16 = vld [vmem:[%s2272_s2 + $0x20] sm:$0xff]  }
 0xc9d   : > { %1771 = vmatpush3.bf16.msra.mxu1 %v1836_v14 }
 0xc9e   : > { %1772 = vmatprep.subr.bf16.mxu1 %v1837_v15 }
 0xca1   : > { %1773 = vmatpush3.bf16.msra.mxu1 %v1837_v15 }
 0xca2   : > { %1774 = vmatprep.subr.bf16.mxu1 %v1838_v16 }
 0xca5   : > { %1775 = vmatpush3.bf16.msra.mxu1 %v1838_v16 }
 0xca6   : > { %1776 = vmatprep.subr.bf16.mxu1 %v1839_v62 }
 0xca9   : > { %1777 = vmatpush3.bf16.msra.mxu1 %v1839_v62 }
 0xd6f   : > { %v1760_v60 = vpop.f32.mrb[16].mxu1 }
 0xd70   : > { %v1179_v18 = vpop.f32.mrb[17].mxu1  ;;  %v1188_v19 = vadd.f32 %v1760_v60, %v1132_v17 }
 0xd71   : > { %v1180_v20 = vadd.f32 %v1179_v18, %v1132_v17  ;;  %v1761_v23 = vpop.f32.mrb[18].mxu1 }
 0xd72   : > { %v1182_v24 = vpop.f32.mrb[19].mxu1  ;;  %v2185_v27 = vadd.f32 %v1188_v19, %v1986_v1 }
 0xd73   : > { %v2182_v25 = vadd.f32 %v1180_v20, %v1984_v0  ;;  %v1183_v26 = vadd.f32 %v1182_v24, %v1132_v17  ;;  %v1253_v17 = vsub.s32 6, %v2016_v33 }
 0xd74   : > { %v1202_v31 = vsel %vm266_vm1, %v2185_v27, 0.0 }
 0xd75   : > { %v2188_v28 = vadd.f32 %v1183_v26, %v1988_v2  ;;  %v1196_v29 = vsel %vm259_vm0, %v2182_v25, 0.0  ;;  %v1254_v60 = vrot.slane %v2022_v35, %v1253_v17 }
 0xd76   : > { %1197 = vadd.xlane.f32.xlu0 %v1196_v29 }
 0xd77   : > { %v1199_v30 = vsel %vm259_vm0, %v2188_v28, 0.0 }
 0xd78   : > { %1200 = vadd.xlane.f32.xlu1 %v1199_v30 }
 0xd7a   : > { %1203 = vadd.xlane.f32.xlu0 %v1202_v31 }
 0xe03   : > { %v1198_v0 = vpop.xlane.xlu0 %1197 }
 0xe04   : > { %v1205_v32 = vmul.f32 0.03125, %v1198_v0 }
 0xe05   : > { %v1201_v59 = vpop.xlane.xlu1 %1200 }
 0xe06   : > { %v1208_v1 = vsub.f32 %v2182_v25, %v1205_v32  ;;  %v1206_v34 = vmul.f32 0.03125, %v1201_v59 }
 0xe07   : > { %v1204_v2 = vpop.xlane.xlu0 %1203 }
 0xe08   : > { %v1209_v21 = vsub.f32 %v2188_v28, %v1206_v34  ;;  %v1207_v63 = vmul.f32 0.03125, %v1204_v2  ;;  %v1211_v36 = vmul.f32 %v1208_v1, %v1208_v1 }
 0xe0a   : > { %v1210_v53 = vsub.f32 %v2185_v27, %v1207_v63  ;;  %v1214_v54 = vsel %vm259_vm0, %v1211_v36, 0.0  ;;  %v1212_v56 = vmul.f32 %v1209_v21, %v1209_v21 }
 0xe0b   : > { %1215 = vadd.xlane.f32.xlu0 %v1214_v54 }
 0xe0c   : > { %v1213_v22 = vmul.f32 %v1210_v53, %v1210_v53  ;;  %v1217_v57 = vsel %vm259_vm0, %v1212_v56, 0.0 }
 0xe0e   : > { %v1220_v37 = vsel %vm266_vm1, %v1213_v22, 0.0 }
 0xe0f   : > { %1218 = vadd.xlane.f32.xlu0 %v1217_v57  ;;  %1221 = vadd.xlane.f32.xlu1 %v1220_v37 }
 0xe98   : > { %v1216_v41 = vpop.xlane.xlu0 %1215 }
 0xe99   : > { %v1223_v40 = vmul.f32 0.03125, %v1216_v41 }
 0xe9b   : > { %v1226_v42 = vadd.f32 1e-06, %v1223_v40 }
 0xe9c   : > { %v1222_v58 = vpop.xlane.xlu1 %1221  ;;  %v1219_v43 = vpop.xlane.xlu0 %1218 }
 0xe9d   : > { %1894 = vrsqrt.f32 %v1226_v42  ;;  %v1225_v44 = vmul.f32 0.03125, %v1222_v58  ;;  %v1224_v45 = vmul.f32 0.03125, %v1219_v43 }
 0xe9f   : > { %v1228_v46 = vadd.f32 1e-06, %v1225_v44  ;;  %v1227_v47 = vadd.f32 1e-06, %v1224_v45 }
 0xea1   : > { %1896 = vrsqrt.f32 %v1228_v46 }
 0xea2   : > { %1898 = vrsqrt.f32 %v1227_v47 }
 0xea7   : > { %v1895_v49 = vpop.eup %1894 }
 0xea8   : > { %v1232_v50 = vmul.f32 %v1895_v49, %v1208_v1 }
 0xeaa   : > { %v1239_v5 = vmul.f32 %v1238_v51, %v1232_v50 }
 0xeab   : > { %v1897_v55 = vpop.eup %1896 }
 0xeac   : > { %v1899_v61 = vpop.eup %1898  ;;  %v1234_v3 = vmul.f32 %v1897_v55, %v1210_v53  ;;  %v1246_v10 = vadd.f32 %v1245_v6, %v1239_v5 }
 0xead   : > { %v1233_v4 = vmul.f32 %v1899_v61, %v1209_v21 }
 0xeae   : > { %v1241_v7 = vmul.f32 %v1238_v51, %v1234_v3 }
 0xeaf   : > { %v1240_v8 = vmul.f32 %v1238_v51, %v1233_v4 }
 0xeb0   : > { %v1248_v9 = vadd.f32 %v1245_v6, %v1241_v7 }
 0xeb1   : > { %v1247_v11 = vadd.f32 %v1245_v6, %v1240_v8 }
 0xeb2   : > { %v1250_v12 = vpack.c.bf16 %v1248_v9, %v1248_v9 }
 0xeb3   : > { %v1249_v13 = vpack.c.bf16 %v1247_v11, %v1246_v10 }
 0xeb5   : > { %1766 = vmatprep.mubr.msk.bf16.mxu0 %vm259_vm0, %v1249_v13 }
 0xeb6   : > { %1767 = vmatmul.mubr.msk.bf16.vlgmr.msra.gmra.mrb[20].mxu0 %vm259_vm0, %v1250_v12 }
 0xf89   : > { %v1768_v18 = vpop.f32.mrb[20].mxu0 }
 0xf8a   : > { %v2228_v19 = vadd.f32 %v1768_v18, %v1254_v60  ;;  %v1307_v20 = vpop.f32.mrb[21].mxu0 }
 0xf8b   : > { %v2230_v23 = vadd.f32 %v1307_v20, %v1254_v60  ;;  %v1769_v24 = vpop.f32.mrb[22].mxu0 }
 0xf8c   : > { %v2233_v26 = vmul.f32 0.70710677, %v2228_v19  ;;  %v1310_v29 = vpop.f32.mrb[23].mxu0 }
 0xf8d   : > { %v2236_v30 = vmul.f32 0.70710677, %v2230_v23  ;;  %v2238_v31 = vadd.f32 %v1310_v29, %v1254_v60 }
 0xf8e   : > { %v1335_v0 = vand.u32 2147483647, %v2233_v26  ;;  %vm1329_vm8 = vcmp.ge.f32.partialorder %v2233_v26, 0.0 }
 0xf8f   : > { %v1333_v35 = vand.u32 2147483647, %v2236_v30  ;;  %v2243_v59 = vmul.f32 0.70710677, %v2238_v31  ;;  %vm1327_vm9 = vcmp.ge.f32.partialorder %v2236_v30, 0.0  ;;  %v1323_v30 = vmul.f32 0.5, %v2228_v19 }
 0xf90   : > { %v1338_v32 = vmul.f32 0.3275911, %v1335_v0  ;;  %v1377_v53 = vsub.f32 0.0, %v1335_v0  ;;  %v1912_v19 = vld [vmem:[%s2273_s3] sm:$0xff] }
 0xf91   : > { %v1336_v1 = vmul.f32 0.3275911, %v1333_v35  ;;  %v1334_v2 = vand.u32 2147483647, %v2243_v59  ;;  %v1375_v54 = vsub.f32 0.0, %v1333_v35  ;;  %vm1328_vm10 = vcmp.ge.f32.partialorder %v2243_v59, 0.0 }
 0xf92   : > { %v1341_v34 = vadd.f32 1.0, %v1338_v32  ;;  %v1380_v22 = vmul.f32 %v1377_v53, %v1335_v0  ;;  %v1937_v0 = vmov -1.0  }
 0xf93   : > { %v1339_v21 = vadd.f32 1.0, %v1336_v1  ;;  %v1337_v63 = vmul.f32 0.3275911, %v1334_v2  ;;  %v1376_v57 = vsub.f32 0.0, %v1334_v2  ;;  %v1378_v39 = vmul.f32 %v1375_v54, %v1333_v35 }
 0xf94   : > { %1900 = vrcp.f32 %v1341_v34  ;;  %v1385_v58 = vmul.f32 1.442695, %v1380_v22  ;;  %v1332_v35 = vsel %vm1329_vm8, 1.0, %v1937_v0  ;;  %v1330_v34 = vsel %vm1327_vm9, 1.0, %v1937_v0 }
 0xf95   : > { %1902 = vrcp.f32 %v1339_v21  ;;  %v1340_v36 = vadd.f32 1.0, %v1337_v63  ;;  %v1379_v44 = vmul.f32 %v1376_v57, %v1334_v2  ;;  %v1381_v46 = vmul.f32 1.442695, %v1378_v39 }
 0xf96   : > { %v1331_v26 = vsel %vm1328_vm10, 1.0, %v1937_v0  ;;  %v1322_v22 = vmul.f32 0.5, %v2238_v31 }
 0xf97   : > { %1904 = vrcp.f32 %v1340_v36  ;;  %v1383_v52 = vmul.f32 1.442695, %v1379_v44 }
 0xf98   : > { %1906 = vpow2.f32 %v1385_v58 }
 0xf99   : > { %1908 = vpow2.f32 %v1381_v46 }
 0xf9a   : > { %1910 = vpow2.f32 %v1383_v52 }
 0xf9e   : > { %v1901_v56 = vpop.eup %1900 }
 0xf9f   : > { %v1903_v37 = vpop.eup %1902  ;;  %v1350_v38 = vmul.f32 1.0614054, %v1901_v56 }
 0xfa0   : > { %v1348_v41 = vmul.f32 1.0614054, %v1903_v37 }
 0xfa1   : > { %v1353_v40 = vadd.f32 -1.4531521, %v1350_v38  ;;  %v1905_v42 = vpop.eup %1904 }
 0xfa2   : > { %v1351_v43 = vadd.f32 -1.4531521, %v1348_v41  ;;  %v1349_v47 = vmul.f32 1.0614054, %v1905_v42  ;;  %v1907_v15 = vpop.eup %1906 }
 0xfa3   : > { %v1356_v45 = vmul.f32 %v1901_v56, %v1353_v40  ;;  %v1909_v62 = vpop.eup %1908  ;;  %v1406_v40 = vsub.s32 7, %v2016_v33 }
 0xfa4   : > { %v1354_v48 = vmul.f32 %v1903_v37, %v1351_v43  ;;  %v1352_v50 = vadd.f32 -1.4531521, %v1349_v47  ;;  %v1911_v29 = vpop.eup %1910 }
 0xfa5   : > { %v1359_v49 = vadd.f32 1.4214138, %v1356_v45 }
 0xfa6   : > { %v1357_v51 = vadd.f32 1.4214138, %v1354_v48  ;;  %v1355_v61 = vmul.f32 %v1905_v42, %v1352_v50 }
 0xfa7   : > { %v1362_v55 = vmul.f32 %v1901_v56, %v1359_v49 }
 0xfa8   : > { %v1360_v3 = vmul.f32 %v1903_v37, %v1357_v51  ;;  %v1358_v5 = vadd.f32 1.4214138, %v1355_v61 }
 0xfa9   : > { %v1365_v4 = vadd.f32 -0.28449672, %v1362_v55 }
 0xfaa   : > { %v1363_v6 = vadd.f32 -0.28449672, %v1360_v3  ;;  %v1361_v8 = vmul.f32 %v1905_v42, %v1358_v5 }
 0xfab   : > { %v1368_v7 = vmul.f32 %v1901_v56, %v1365_v4 }
 0xfac   : > { %v1366_v9 = vmul.f32 %v1903_v37, %v1363_v6  ;;  %v1364_v11 = vadd.f32 -0.28449672, %v1361_v8 }
 0xfad   : > { %v1371_v10 = vadd.f32 0.2548296, %v1368_v7 }
 0xfae   : > { %v1369_v12 = vadd.f32 0.2548296, %v1366_v9  ;;  %v1367_v14 = vmul.f32 %v1905_v42, %v1364_v11 }
 0xfaf   : > { %v1374_v13 = vmul.f32 %v1901_v56, %v1371_v10  ;;  %v1321_v56 = vmul.f32 0.5, %v2230_v23 }
 0xfb0   : > { %v1372_v16 = vmul.f32 %v1903_v37, %v1369_v12  ;;  %v1370_v60 = vadd.f32 0.2548296, %v1367_v14 }
 0xfb1   : > { %v1389_v17 = vmul.f32 %v1907_v15, %v1374_v13 }
 0xfb2   : > { %v1387_v18 = vmul.f32 %v1909_v62, %v1372_v16  ;;  %v1373_v24 = vmul.f32 %v1905_v42, %v1370_v60  ;;  %v1407_v42 = vrot.slane %v1912_v19, %v1406_v40 }
 0xfb3   : > { %v1392_v20 = vsub.f32 1.0, %v1389_v17 }
 0xfb4   : > { %v1390_v32 = vsub.f32 1.0, %v1387_v18  ;;  %v1388_v2 = vmul.f32 %v1911_v29, %v1373_v24 }
 0xfb5   : > { %v1395_v1 = vmul.f32 %v1392_v20, %v1332_v35 }
 0xfb6   : > { %v1393_v21 = vmul.f32 %v1390_v32, %v1330_v34  ;;  %v1391_v63 = vsub.f32 1.0, %v1388_v2 }
 0xfb7   : > { %v1398_v36 = vadd.f32 1.0, %v1395_v1 }
 0xfb8   : > { %v1396_v53 = vadd.f32 1.0, %v1393_v21  ;;  %v1394_v54 = vmul.f32 %v1391_v63, %v1331_v26 }
 0xfb9   : > { %v1401_v37 = vmul.f32 %v1398_v36, %v1323_v30 }
 0xfba   : > { %v1397_v57 = vadd.f32 1.0, %v1394_v54  ;;  %v1399_v38 = vmul.f32 %v1396_v53, %v1321_v56 }
 0xfbb   : > { %v1403_v41 = vpack.c.bf16 %v1401_v37, %v1401_v37 }
 0xfbc   : > { %v1400_v39 = vmul.f32 %v1397_v57, %v1322_v22 }
 0xfbe   : > { %v1402_v59 = vpack.c.bf16 %v1400_v39, %v1399_v38 }
 0xfc0   : > { %1778 = vmatprep.mubr.msk.bf16.mxu1 %vm1432_vm11, %v1402_v59 }
 0xfc1   : > { %1779 = vmatmul.mubr.msk.bf16.vlgmr.msra.gmra.mrb[20].mxu1 %vm1432_vm11, %v1403_v41 }
0x1094   : > { %v1780_v23 = vpop.f32.mrb[20].mxu1 }
0x1095   : > { %v1482_v58 = vadd.f32 %v1780_v23, %v1407_v42  ;;  %v1473_v31 = vpop.f32.mrb[21].mxu1 }
0x1096   : > { %v1474_v43 = vadd.f32 %v1473_v31, %v1407_v42  ;;  %v1781_v44 = vpop.f32.mrb[22].mxu1 }
0x1097   : > { %v1489_v45 = vadd.f32 %v1482_v58, %v2185_v27  ;;  %v1476_v46 = vpop.f32.mrb[23].mxu1 }
0x1098   : > { %v1487_v33 = vadd.f32 %v1474_v43, %v2182_v25  ;;  %v1477_v47 = vadd.f32 %v1476_v46, %v1407_v42 }
0x1099   : > { %1492 = vst.msk [vmem:[%s232_s21 + $0x10] sm:$0x1] %vm266_vm1, %v1489_v45 }
0x109a   : > { %1490 = vst.msk [vmem:[%s232_s21] sm:$0xff] %vm259_vm0, %v1487_v33  ;;  %v1488_v48 = vadd.f32 %v1477_v47, %v2188_v28 }
0x109c   : > { %1491 = vst.msk [vmem:[%s232_s21 + $0x8] sm:$0xff] %vm259_vm0, %v1488_v48 }
0x109d PF: > { %s16_s18 = sadd.s32 1, %s1919_s18  }
0x109e   : > { %p13_p4 = scmp.ge.s32.totalorder %s16_s18, 4  }
0x10a0   :  { %15 = sbr.rel (!%p13_p4) target bundleno = 1 (0x1), region = 81 }

// kernel: transformer_forward.5
= control target key start
LH: loop header
LB: loop body
LE: loop exit
PB: predicated region body
PF: predicated region fallthrough
CT: control target
= control target key end

     0   :  { %s2060_s21 = smov 0   ;;  %s2379_s0 = inlined_call_operand.vmem [shape: f32[2,17,32], index: 0, kind: input, shape index: {}]   ;;  %s2380_s1 = inlined_call_operand.vmem [shape: bf16[32,128], index: 1, kind: input, shape index: {}]   ;;  %s2381_s2 = inlined_call_operand.vmem [shape: bf16[96,128], index: 2, kind: input, shape index: {}]   ;;  %s2382_s3 = inlined_call_operand.vmem [shape: f32[8,128], index: 3, kind: input, shape index: {}]   ;;  %s2383_s4 = inlined_call_operand.vmem [shape: f32[2,32], index: 4, kind: input, shape index: {}]   ;;  %s2384_s5 = inlined_call_operand.vmem [shape: f32[2,17,32], index: 5, kind: output, shape index: {0}]   ;;  %s2385_s6 = inlined_call_operand.vmem [shape: f32[2,4,17,17], index: 6, kind: output, shape index: {1}]  }
   0x1 LB: > { %s1662_s22 = sadd.s32 4294967295, %s2006_s21   ;;  %p1666_p0 = scmp.ge.s32.totalorder %s2006_s21, 1  ;;  %s2006_s21 = sphi %s2060_s21, %s17_s21  }
   0x2   : > { %p215_p1 = scmp.lt.s32.totalorder %s2006_s21, 3 }
   0x4   : > { %p216_p2 = pnand %p1666_p0, %p215_p1 }
   0x5   : > { %p250_p3 = scmp.lt.s32.totalorder (!%p216_p2), %s1662_s22, 1  ;;  %vm286_vm0 = vcmask (!%p216_p2), 261120   ;;  %vm293_vm1 = vcmask (!%p216_p2), 253952   ;;  %v2097_v21 = vld [vmem:[%s2380_s1] sm:$0xff] (!%p216_p2)   ;;  %v2102_v22 = vld [vmem:[%s2380_s1 + $0x8] sm:$0xff] (!%p216_p2)   ;;  %v328_v30 = vlaneseq (!%p216_p2)  ;;  %s2008_s9 = smov (!%p216_p2), 96  }
   0x6   : > { %219 = sbr.rel (%p216_p2) target bundleno = 4568 (0x11d8), region = 40  ;;  %1763 = vmatprep.subr.bf16.mxu0 (!%p216_p2), %v2097_v21  ;;  %v2114_v35 = vld [vmem:[%s2382_s3] sm:$0xff] (!%p216_p2)  ;;  %vm422_vm2 = vcmask (!%p216_p2), 64512   ;;  %vm486_vm3 = vcmask (!%p216_p2), 138240   ;;  %vm493_vm4 = vcmask (!%p216_p2), 131072   ;;  %s2009_s10 = smov (!%p216_p2), 64  }
   0x7   : > { %1764 = vmatpush3.bf16.msra.mxu0 (!%p216_p2), %v2097_v21  ;;  %v2108_v33 = vshrl.u32 (!%p216_p2), %v328_v30, 7  ;;  %s2010_s11 = smov (!%p216_p2), 120   ;;  %s2011_s12 = smov (!%p216_p2), 88   ;;  %vm537_vm5 = vcmask (!%p216_p2), 1040384   ;;  %vm1146_vm6 = vcmask (!%p216_p2), 130048   ;;  %vm1150_vm7 = vcmask (!%p216_p2), 195584  }
   0x8   : > { %1765 = vmatprep.subr.bf16.mxu0 (!%p216_p2), %v2102_v22  ;;  %s2013_s17 = smov (!%p216_p2), 56   ;;  %s2014_s18 = smov (!%p216_p2), 80   ;;  %vm1459_vm11 = vcmask (!%p216_p2), 523264  }
   0x9   : > { %v330_v34 = vsub.s32 (!%p216_p2), 0, %v2108_v33  ;;  %v337_v39 = vsub.s32 (!%p216_p2), 1, %v2108_v33  ;;  %v346_v53 = vsub.s32 (!%p216_p2), 2, %v2108_v33  ;;  %s2015_s19 = smov (!%p216_p2), 112   ;;  %s2016_s20 = smov (!%p216_p2), 48  }
   0xa   : > { %s2017_s24 = smov (!%p216_p2), 72   ;;  %s2018_s25 = smov (!%p216_p2), 104  }
   0xb   : > { %1766 = vmatpush3.bf16.msra.mxu0 (!%p216_p2), %v2102_v22  ;;  %v331_v38 = vrot.slane (!%p216_p2), %v2114_v35, %v330_v34  ;;  %v338_v45 = vrot.slane (!%p216_p2), %v2114_v35, %v337_v39  ;;  %v347_v54 = vrot.slane (!%p216_p2), %v2114_v35, %v346_v53  ;;  %s2020_s27 = smov (!%p216_p2), 32   ;;  %s2021_s28 = smov (!%p216_p2), 8  }
   0xc   : > { %s2022_s29 = smov (!%p216_p2), 16   ;;  %s2023_s30 = smov (!%p216_p2), 24  }
   0xd   : > { %s2387_s22 = smov (!%p250_p3, %s1662_s22), 1 }
   0xe   : > { %s1871_s23 = smul.u32 24, %s2387_s22 }
   0xf   : > { %s1872_s13 = smul.u32 96, %s2387_s22 }
  0x10   : > { %s254_s26 = scalar_lea.vmem %s2379_s0, %s1871_s23 }
  0x11   : > { %v2076_v0 = vld [vmem:[%s254_s26] sm:$0xff]  ;;  %v2078_v1 = vld [vmem:[%s254_s26 + $0x10] sm:$0x1]  ;;  %v2080_v2 = vld [vmem:[%s254_s26 + $0x8] sm:$0xff]  ;;  %s2159_s16 = scalar_lea.vmem %s2385_s6, %s1872_s13  ;;  %s2019_s26 = smov 40  }
  0x12   : > { %v287_v3 = vsel %vm286_vm0, %v2076_v0, 0.0  ;;  %v294_v4 = vsel %vm293_vm1, %v2078_v1, 0.0  ;;  %v290_v5 = vsel %vm286_vm0, %v2080_v2, 0.0 }
  0x13   : > { %288 = vadd.xlane.f32.xlu0 %v287_v3  ;;  %295 = vadd.xlane.f32.xlu1 %v294_v4 }
  0x17   : > { %291 = vadd.xlane.f32.xlu0 %v290_v5 }
  0xa0   : > { %v289_v6 = vpop.xlane.xlu0 %288  ;;  %v296_v7 = vpop.xlane.xlu1 %295 }
  0xa1   : > { %v298_v8 = vmul.f32 0.03125, %v289_v6  ;;  %v300_v9 = vmul.f32 0.03125, %v296_v7 }
  0xa3   : > { %v301_v10 = vsub.f32 %v2076_v0, %v298_v8  ;;  %v303_v11 = vsub.f32 %v2078_v1, %v300_v9 }
  0xa4   : > { %v292_v12 = vpop.xlane.xlu0 %291 }
  0xa5   : > { %v299_v13 = vmul.f32 0.03125, %v292_v12  ;;  %v304_v14 = vmul.f32 %v301_v10, %v301_v10  ;;  %v306_v15 = vmul.f32 %v303_v11, %v303_v11 }
  0xa7   : > { %v302_v16 = vsub.f32 %v2080_v2, %v299_v13  ;;  %v307_v17 = vsel %vm286_vm0, %v304_v14, 0.0  ;;  %v313_v18 = vsel %vm293_vm1, %v306_v15, 0.0 }
  0xa8   : > { %308 = vadd.xlane.f32.xlu1 %v307_v17 }
  0xa9   : > { %v305_v19 = vmul.f32 %v302_v16, %v302_v16 }
  0xab   : > { %v310_v20 = vsel %vm286_vm0, %v305_v19, 0.0 }
  0xac   : > { %314 = vadd.xlane.f32.xlu1 %v313_v18  ;;  %311 = vadd.xlane.f32.xlu0 %v310_v20 }
 0x135   : > { %v309_v23 = vpop.xlane.xlu1 %308 }
 0x136   : > { %v316_v24 = vmul.f32 0.03125, %v309_v23 }
 0x138   : > { %v319_v25 = vadd.f32 1e-06, %v316_v24 }
 0x139   : > { %v315_v26 = vpop.xlane.xlu1 %314  ;;  %v312_v27 = vpop.xlane.xlu0 %311 }
 0x13a   : > { %1921 = vrsqrt.f32 %v319_v25  ;;  %v318_v28 = vmul.f32 0.03125, %v315_v26  ;;  %v317_v29 = vmul.f32 0.03125, %v312_v27 }
 0x13c   : > { %v321_v31 = vadd.f32 1e-06, %v318_v28  ;;  %v320_v32 = vadd.f32 1e-06, %v317_v29 }
 0x13e   : > { %1923 = vrsqrt.f32 %v321_v31 }
 0x13f   : > { %1925 = vrsqrt.f32 %v320_v32 }
 0x144   : > { %v1922_v36 = vpop.eup %1921 }
 0x145   : > { %v325_v37 = vmul.f32 %v1922_v36, %v301_v10 }
 0x147   : > { %v332_v44 = vmul.f32 %v331_v38, %v325_v37 }
 0x148   : > { %v1924_v40 = vpop.eup %1923 }
 0x149   : > { %v1926_v41 = vpop.eup %1925  ;;  %v327_v42 = vmul.f32 %v1924_v40, %v303_v11  ;;  %v339_v49 = vadd.f32 %v338_v45, %v332_v44 }
 0x14a   : > { %v326_v43 = vmul.f32 %v1926_v41, %v302_v16 }
 0x14b   : > { %v334_v46 = vmul.f32 %v331_v38, %v327_v42  ;;  %v2012_v42 = vmov 0  }
 0x14c   : > { %v333_v47 = vmul.f32 %v331_v38, %v326_v43  ;;  %v2154_v43 = vsel %vm537_vm5, 65535, %v2012_v42 }
 0x14d   : > { %v341_v48 = vadd.f32 %v338_v45, %v334_v46 }
 0x14e   : > { %v340_v50 = vadd.f32 %v338_v45, %v333_v47 }
 0x14f   : > { %v343_v51 = vpack.c.bf16 %v341_v48, %v341_v48 }
 0x150   : > { %v342_v52 = vpack.c.bf16 %v340_v50, %v339_v49 }
 0x152   : > { %1767 = vmatprep.mubr.msk.bf16.mxu0 %vm286_vm0, %v342_v52 }
 0x153   : > { %1768 = vmatmul.mubr.msk.bf16.vlgmr.msra.gmra.mrb[0].mxu0 %vm286_vm0, %v343_v51 }
 0x226   : > { %v1769_v55 = vpop.f32.mrb[0].mxu0 }
 0x227   : > { %v409_v56 = vadd.f32 %v1769_v55, %v347_v54  ;;  %v400_v57 = vpop.f32.mrb[1].mxu0 }
 0x228   : > { %v1770_v58 = vpop.f32.mrb[2].mxu0  ;;  %v401_v61 = vadd.f32 %v400_v57, %v347_v54 }
 0x229   : > { %v2127_v59 = vpack.c.bf16 %v409_v56, %v409_v56  ;;  %v403_v60 = vpop.f32.mrb[3].mxu0 }
 0x22a   : > { %v404_v62 = vadd.f32 %v403_v60, %v347_v54 }
 0x22b   : > { %420 = vrot.lane.b32.xlu1 %v2127_v59, %s2008_s9 }
 0x22c   : > { %v2130_v63 = vpack.c.bf16 %v404_v62, %v401_v61 }
 0x22e   : > { %418 = vrot.lane.b32.xlu0 %v2130_v63, %s2008_s9  ;;  %1775 = vmatprep.mubr.msk.bf16.mxu1 %vm422_vm2, %v2130_v63 }
 0x29d   : > { %v421_v5 = vpop.permute.xlu1 %420 }
 0x29e   : > { %v433_v6 = vsel %vm422_vm2, %v421_v5, 0 }
 0x2a0   : > { %v419_v3 = vpop.permute.xlu0 %418 }
 0x2a1   : > { %1863 = vmatprep.subr.msk.bf16.mxu1 %vm422_vm2, %v419_v3  ;;  %v430_v4 = vsel %vm422_vm2, %v419_v3, 0 }
 0x2a2   : > { %1772 = vmatpush3.bf16.xpose.msra.mxu1 %v430_v4 }
 0x2a3   : > { %1864 = vmatprep.subr.msk.bf16.mxu1 %vm422_vm2, %v421_v5 }
 0x2aa   : > { %1774 = vmatpush3.bf16.xpose.msra.mxu1 %v433_v6 }
 0x2b1   : > { %1776 = vmatmul.mubr.msk.bf16.vlgmr.msra.gmra.mrb[0].mxu1 %vm422_vm2, %v2127_v59 }
 0x384   : > { %v1777_v7 = vpop.f32.mrb[0].mxu1 }
 0x385   : > { %v469_v8 = vpop.f32.mrb[1].mxu1  ;;  %v485_v14 = vmul.f32 0.35355338, %v1777_v7 }
 0x386   : > { %v483_v9 = vmul.f32 0.35355338, %v469_v8  ;;  %v1778_v10 = vpop.f32.mrb[2].mxu1 }
 0x387   : > { %v472_v11 = vpop.f32.mrb[3].mxu1  ;;  %v494_v16 = vsel %vm493_vm4, %v485_v14, -inf }
 0x388   : > { %v484_v12 = vmul.f32 0.35355338, %v472_v11  ;;  %v487_v13 = vsel %vm486_vm3, %v483_v9, -inf }
 0x389   : > { %488 = vmax.xlane.f32.xlu1 %v487_v13 }
 0x38a   : > { %v490_v15 = vsel %vm486_vm3, %v484_v12, -inf }
 0x38b   : > { %491 = vmax.xlane.f32.xlu0 %v490_v15 }
 0x38f   : > { %495 = vmax.xlane.f32.xlu0 %v494_v16 }
 0x416   : > { %v489_v17 = vpop.xlane.xlu1 %488 }
 0x417   : > { %v497_v20 = vsub.f32 %v483_v9, %v489_v17 }
 0x418   : > { %v492_v18 = vpop.xlane.xlu0 %491 }
 0x419   : > { %v498_v19 = vsub.f32 %v484_v12, %v492_v18  ;;  %v500_v26 = vmul.f32 1.442695, %v497_v20 }
 0x41b   : > { %v502_v23 = vmul.f32 1.442695, %v498_v19 }
 0x41c   : > { %v496_v24 = vpop.xlane.xlu0 %495 }
 0x41d   : > { %1927 = vpow2.f32 %v502_v23  ;;  %v499_v25 = vsub.f32 %v485_v14, %v496_v24 }
 0x41f   : > { %v504_v27 = vmul.f32 1.442695, %v499_v25 }
 0x421   : > { %1929 = vpow2.f32 %v504_v27 }
 0x422   : > { %1931 = vpow2.f32 %v500_v26 }
 0x427   : > { %v1928_v28 = vpop.eup %1927 }
 0x428   : > { %v509_v29 = vsel %vm486_vm3, %v1928_v28, 0.0 }
 0x429   : > { %510 = vadd.xlane.f32.xlu0 %v509_v29 }
 0x42b   : > { %v1930_v30 = vpop.eup %1929 }
 0x42c   : > { %v512_v31 = vsel %vm493_vm4, %v1930_v30, 0.0  ;;  %v1932_v32 = vpop.eup %1931 }
 0x42d   : > { %513 = vadd.xlane.f32.xlu1 %v512_v31  ;;  %v506_v36 = vsel %vm486_vm3, %v1932_v32, 0.0 }
 0x431   : > { %507 = vadd.xlane.f32.xlu1 %v506_v36 }
 0x43f   : > { %526 = vrot.lane.b32.xlu0 %v2130_v63, %s2009_s10 }
 0x442   : > { %528 = vrot.lane.b32.xlu1 %v2127_v59, %s2009_s10 }
 0x443   : > { %591 = vrot.lane.b32.xlu0 %v2130_v63, %s2010_s11 }
 0x446   : > { %595 = vrot.lane.b32.xlu1 %v2130_v63, %s2011_s12 }
 0x44a   : > { %597 = vrot.lane.b32.xlu1 %v2127_v59, %s2011_s12 }
 0x44e   : > { %593 = vrot.lane.b32.xlu1 %v2127_v59, %s2010_s11 }
 0x4b6   : > { %v511_v37 = vpop.xlane.xlu0 %510 }
 0x4b7   : > { %1933 = vrcp.f32 %v511_v37 }
 0x4ba   : > { %v514_v38 = vpop.xlane.xlu1 %513  ;;  %v527_v40 = vpop.permute.xlu0 %526 }
 0x4bb   : > { %1935 = vrcp.f32 %v514_v38  ;;  %1779 = vmatprep.subr.bf16.mxu0 %v527_v40 }
 0x4bc   : > { %1780 = vmatpush3.bf16.msra.mxu0 %v527_v40 }
 0x4be   : > { %v508_v41 = vpop.xlane.xlu1 %507  ;;  %v592_v55 = vpop.permute.xlu0 %591 }
 0x4bf   : > { %1937 = vrcp.f32 %v508_v41 }
 0x4c1   : > { %v1934_v44 = vpop.eup %1933 }
 0x4c2   : > { %v529_v45 = vpop.permute.xlu1 %528  ;;  %v519_v46 = vmul.f32 %v1934_v44, %v1928_v28 }
 0x4c3   : > { %v541_v47 = vand.u32 %v2154_v43, %v529_v45 }
 0x4c4   : > { %522 = vst.msk [vmem:[%s2159_s16 + $0x8] sm:$0xff] %vm486_vm3, %v519_v46 }
 0x4c5   : > { %v1936_v48 = vpop.eup %1935  ;;  %1781 = vmatprep.subr.bf16.mxu0 %v541_v47 }
 0x4c6   : > { %v520_v49 = vmul.f32 %v1936_v48, %v1930_v30  ;;  %v596_v50 = vpop.permute.xlu1 %595  ;;  %1782 = vmatpush3.bf16.msra.mxu0 %v541_v47 }
 0x4c7   : > { %1865 = vmatprep.subr.msk.bf16.mxu0 %vm422_vm2, %v596_v50  ;;  %v606_v56 = vsel %vm422_vm2, %v596_v50, 0 }
 0x4c8   : > { %523 = vst.msk [vmem:[%s2159_s16 + $0x10] sm:$0x1] %vm493_vm4, %v520_v49  ;;  %v525_v54 = vpack.c.bf16 %v520_v49, %v520_v49 }
 0x4c9   : > { %v1938_v51 = vpop.eup %1937 }
 0x4ca   : > { %v518_v52 = vmul.f32 %v1938_v51, %v1932_v32  ;;  %v598_v57 = vpop.permute.xlu1 %597 }
 0x4cb   : > { %v609_v58 = vsel %vm422_vm2, %v598_v57, 0 }
 0x4cc   : > { %521 = vst.msk [vmem:[%s2159_s16] sm:$0xff] %vm486_vm3, %v518_v52  ;;  %v524_v53 = vpack.c.bf16 %v519_v46, %v518_v52 }
 0x4ce   : > { %1783 = vmatprep.mubr.msk.bf16.mxu0 %vm486_vm3, %v524_v53  ;;  %v594_v60 = vpop.permute.xlu1 %593 }
 0x4cf   : > { %1784 = vmatmul.mubr.msk.bf16.vlgmr.msra.gmra.mrb[4].mxu0 %vm486_vm3, %v525_v54 }
 0x4d0   : > { %1788 = vmatpush3.bf16.xpose.msra.mxu0 %v606_v56  ;;  %1791 = vmatprep.mubr.msk.bf16.mxu0 %vm422_vm2, %v592_v55 }
 0x4d1   : > { %1866 = vmatprep.subr.msk.bf16.mxu0 %vm422_vm2, %v598_v57 }
 0x4d8   : > { %1790 = vmatpush3.bf16.xpose.msra.mxu0 %v609_v58 }
 0x4df   : > { %1792 = vmatmul.mubr.msk.bf16.vlgmr.msra.gmra.mrb[8].mxu0 %vm422_vm2, %v594_v60 }
 0x5a2   : > { %v2176_v61 = vpop.f32.mrb[4].mxu0 }
 0x5a3   : > { %v2178_v62 = vpop.f32.mrb[5].mxu0 }
 0x5a4   : > { %v1786_v3 = vpop.f32.mrb[6].mxu0 }
 0x5a5   : > { %v2180_v4 = vpop.f32.mrb[7].mxu0 }
 0x5b2   : > { %v1793_v5 = vpop.f32.mrb[8].mxu0 }
 0x5b3   : > { %v645_v6 = vpop.f32.mrb[9].mxu0  ;;  %v661_v10 = vmul.f32 0.35355338, %v1793_v5 }
 0x5b4   : > { %v659_v7 = vmul.f32 0.35355338, %v645_v6  ;;  %v1794_v8 = vpop.f32.mrb[10].mxu0 }
 0x5b5   : > { %v648_v9 = vpop.f32.mrb[11].mxu0  ;;  %v668_v14 = vsel %vm493_vm4, %v661_v10, -inf }
 0x5b6   : > { %v660_v11 = vmul.f32 0.35355338, %v648_v9  ;;  %v662_v12 = vsel %vm486_vm3, %v659_v7, -inf }
 0x5b7   : > { %663 = vmax.xlane.f32.xlu0 %v662_v12 }
 0x5b8   : > { %v665_v13 = vsel %vm486_vm3, %v660_v11, -inf }
 0x5b9   : > { %666 = vmax.xlane.f32.xlu1 %v665_v13 }
 0x5bb   : > { %669 = vmax.xlane.f32.xlu0 %v668_v14 }
 0x644   : > { %v664_v15 = vpop.xlane.xlu0 %663 }
 0x645   : > { %v671_v16 = vsub.f32 %v659_v7, %v664_v15 }
 0x646   : > { %v667_v17 = vpop.xlane.xlu1 %666 }
 0x647   : > { %v674_v18 = vmul.f32 1.442695, %v671_v16  ;;  %v672_v19 = vsub.f32 %v660_v11, %v667_v17 }
 0x648   : > { %v670_v20 = vpop.xlane.xlu0 %669 }
 0x649   : > { %1939 = vpow2.f32 %v674_v18  ;;  %v676_v23 = vmul.f32 1.442695, %v672_v19  ;;  %v673_v24 = vsub.f32 %v661_v10, %v670_v20 }
 0x64b   : > { %1941 = vpow2.f32 %v676_v23  ;;  %v678_v25 = vmul.f32 1.442695, %v673_v24 }
 0x64d   : > { %1943 = vpow2.f32 %v678_v25 }
 0x653   : > { %v1940_v26 = vpop.eup %1939 }
 0x654   : > { %v680_v27 = vsel %vm486_vm3, %v1940_v26, 0.0 }
 0x655   : > { %v1942_v28 = vpop.eup %1941  ;;  %681 = vadd.xlane.f32.xlu0 %v680_v27 }
 0x656   : > { %v683_v31 = vsel %vm486_vm3, %v1942_v28, 0.0 }
 0x657   : > { %v1944_v29 = vpop.eup %1943 }
 0x658   : > { %v686_v30 = vsel %vm493_vm4, %v1944_v29, 0.0 }
 0x659   : > { %687 = vadd.xlane.f32.xlu1 %v686_v30  ;;  %684 = vadd.xlane.f32.xlu0 %v683_v31 }
 0x66a   : > { %703 = vrot.lane.b32.xlu1 %v2127_v59, %s2013_s17 }
 0x66e   : > { %767 = vrot.lane.b32.xlu1 %v2130_v63, %s2014_s18 }
 0x66f   : > { %701 = vrot.lane.b32.xlu0 %v2130_v63, %s2013_s17 }
 0x672   : > { %769 = vrot.lane.b32.xlu1 %v2127_v59, %s2014_s18 }
 0x673   : > { %763 = vrot.lane.b32.xlu0 %v2130_v63, %s2015_s19 }
 0x676   : > { %765 = vrot.lane.b32.xlu1 %v2127_v59, %s2015_s19 }
 0x6e2   : > { %v682_v32 = vpop.xlane.xlu0 %681 }
 0x6e3   : > { %1945 = vrcp.f32 %v682_v32 }
 0x6e6   : > { %v685_v36 = vpop.xlane.xlu0 %684  ;;  %v688_v37 = vpop.xlane.xlu1 %687 }
 0x6e7   : > { %1947 = vrcp.f32 %v685_v36 }
 0x6e8   : > { %1949 = vrcp.f32 %v688_v37 }
 0x6ea   : > { %v702_v38 = vpop.permute.xlu0 %701  ;;  %v704_v40 = vpop.permute.xlu1 %703 }
 0x6eb   : > { %v713_v41 = vand.u32 %v704_v40, %v2154_v43  ;;  %1795 = vmatprep.subr.bf16.mxu1 %v702_v38 }
 0x6ec   : > { %1796 = vmatpush3.bf16.msra.mxu1 %v702_v38 }
 0x6ed   : > { %v1946_v42 = vpop.eup %1945  ;;  %1797 = vmatprep.subr.bf16.mxu1 %v713_v41 }
 0x6ee   : > { %v692_v44 = vmul.f32 %v1946_v42, %v1940_v26  ;;  %v768_v45 = vpop.permute.xlu1 %767  ;;  %v764_v52 = vpop.permute.xlu0 %763 }
 0x6ef   : > { %v778_v53 = vsel %vm422_vm2, %v768_v45, 0 }
 0x6f0   : > { %1798 = vmatpush3.bf16.msra.mxu1 %v713_v41  ;;  %1680 = vst.msk [vmem:[%s2159_s16 + $0x18] sm:$0xff] %vm486_vm3, %v692_v44 }
 0x6f1   : > { %v1948_v46 = vpop.eup %1947  ;;  %1867 = vmatprep.subr.msk.bf16.mxu1 %vm422_vm2, %v768_v45 }
 0x6f2   : > { %v1950_v47 = vpop.eup %1949  ;;  %v693_v48 = vmul.f32 %v1948_v46, %v1942_v28  ;;  %v770_v54 = vpop.permute.xlu1 %769 }
 0x6f3   : > { %v694_v49 = vmul.f32 %v1950_v47, %v1944_v29  ;;  %v781_v55 = vsel %vm422_vm2, %v770_v54, 0 }
 0x6f4   : > { %1681 = vst.msk [vmem:[%s2159_s16 + $0x20] sm:$0xff] %vm486_vm3, %v693_v48  ;;  %v699_v50 = vpack.c.bf16 %v693_v48, %v692_v44 }
 0x6f5   : > { %1682 = vst.msk [vmem:[%s2159_s16 + $0x28] sm:$0x1] %vm493_vm4, %v694_v49  ;;  %v700_v51 = vpack.c.bf16 %v694_v49, %v694_v49 }
 0x6f6   : > { %1799 = vmatprep.mubr.msk.bf16.mxu1 %vm486_vm3, %v699_v50  ;;  %v766_v56 = vpop.permute.xlu1 %765 }
 0x6f7   : > { %1800 = vmatmul.mubr.msk.bf16.vlgmr.msra.gmra.mrb[4].mxu1 %vm486_vm3, %v700_v51 }
 0x6f8   : > { %1807 = vmatprep.mubr.msk.bf16.mxu1 %vm422_vm2, %v764_v52 }
 0x6f9   : > { %1804 = vmatpush3.bf16.xpose.msra.mxu1 %v778_v53 }
 0x6fa   : > { %1868 = vmatprep.subr.msk.bf16.mxu1 %vm422_vm2, %v770_v54 }
 0x701   : > { %1806 = vmatpush3.bf16.xpose.msra.mxu1 %v781_v55 }
 0x708   : > { %1808 = vmatmul.mubr.msk.bf16.vlgmr.msra.gmra.mrb[8].mxu1 %vm422_vm2, %v766_v56 }
 0x7ca   : > { %v2209_v57 = vpop.f32.mrb[4].mxu1 }
 0x7cb   : > { %v2211_v58 = vpop.f32.mrb[5].mxu1 }
 0x7cc   : > { %v1802_v60 = vpop.f32.mrb[6].mxu1 }
 0x7cd   : > { %v2213_v3 = vpop.f32.mrb[7].mxu1 }
 0x7ce   : > { %v1898_v5 = vpack.i.bf16 %v2213_v3, %v2211_v58 }
 0x7db   : > { %v1809_v6 = vpop.f32.mrb[8].mxu1 }
 0x7dc   : > { %v817_v7 = vpop.f32.mrb[9].mxu1  ;;  %v833_v11 = vmul.f32 0.35355338, %v1809_v6 }
 0x7dd   : > { %v831_v8 = vmul.f32 0.35355338, %v817_v7  ;;  %v1810_v9 = vpop.f32.mrb[10].mxu1 }
 0x7de   : > { %v820_v10 = vpop.f32.mrb[11].mxu1  ;;  %v840_v15 = vsel %vm493_vm4, %v833_v11, -inf }
 0x7df   : > { %v832_v12 = vmul.f32 0.35355338, %v820_v10  ;;  %v834_v13 = vsel %vm486_vm3, %v831_v8, -inf }
 0x7e0   : > { %835 = vmax.xlane.f32.xlu0 %v834_v13 }
 0x7e1   : > { %v837_v14 = vsel %vm486_vm3, %v832_v12, -inf }
 0x7e2   : > { %838 = vmax.xlane.f32.xlu1 %v837_v14 }
 0x7e4   : > { %841 = vmax.xlane.f32.xlu0 %v840_v15 }
 0x86d   : > { %v836_v16 = vpop.xlane.xlu0 %835 }
 0x86e   : > { %v843_v17 = vsub.f32 %v831_v8, %v836_v16 }
 0x86f   : > { %v839_v18 = vpop.xlane.xlu1 %838 }
 0x870   : > { %v846_v19 = vmul.f32 1.442695, %v843_v17  ;;  %v844_v20 = vsub.f32 %v832_v12, %v839_v18 }
 0x871   : > { %v842_v23 = vpop.xlane.xlu0 %841 }
 0x872   : > { %1951 = vpow2.f32 %v846_v19  ;;  %v848_v24 = vmul.f32 1.442695, %v844_v20  ;;  %v845_v25 = vsub.f32 %v833_v11, %v842_v23 }
 0x874   : > { %1953 = vpow2.f32 %v848_v24  ;;  %v850_v26 = vmul.f32 1.442695, %v845_v25 }
 0x876   : > { %1955 = vpow2.f32 %v850_v26 }
 0x87c   : > { %v1952_v27 = vpop.eup %1951 }
 0x87d   : > { %v852_v28 = vsel %vm486_vm3, %v1952_v27, 0.0 }
 0x87e   : > { %v1954_v29 = vpop.eup %1953  ;;  %853 = vadd.xlane.f32.xlu0 %v852_v28 }
 0x87f   : > { %v855_v32 = vsel %vm486_vm3, %v1954_v29, 0.0 }
 0x880   : > { %v1956_v30 = vpop.eup %1955 }
 0x881   : > { %v858_v31 = vsel %vm493_vm4, %v1956_v30, 0.0 }
 0x882   : > { %859 = vadd.xlane.f32.xlu1 %v858_v31  ;;  %856 = vadd.xlane.f32.xlu0 %v855_v32 }
 0x893   : > { %875 = vrot.lane.b32.xlu1 %v2127_v59, %s2016_s20 }
 0x897   : > { %939 = vrot.lane.b32.xlu1 %v2130_v63, %s2017_s24 }
 0x898   : > { %873 = vrot.lane.b32.xlu0 %v2130_v63, %s2016_s20 }
 0x89b   : > { %941 = vrot.lane.b32.xlu1 %v2127_v59, %s2017_s24 }
 0x89c   : > { %935 = vrot.lane.b32.xlu0 %v2130_v63, %s2018_s25 }
 0x89f   : > { %937 = vrot.lane.b32.xlu1 %v2127_v59, %s2018_s25 }
 0x90b   : > { %v854_v36 = vpop.xlane.xlu0 %853 }
 0x90c   : > { %1957 = vrcp.f32 %v854_v36 }
 0x90f   : > { %v857_v37 = vpop.xlane.xlu0 %856  ;;  %v860_v38 = vpop.xlane.xlu1 %859 }
 0x910   : > { %1959 = vrcp.f32 %v857_v37 }
 0x911   : > { %1961 = vrcp.f32 %v860_v38 }
 0x913   : > { %v874_v40 = vpop.permute.xlu0 %873  ;;  %v876_v41 = vpop.permute.xlu1 %875 }
 0x914   : > { %v885_v42 = vand.u32 %v876_v41, %v2154_v43  ;;  %1811 = vmatprep.subr.bf16.mxu0 %v874_v40 }
 0x915   : > { %1812 = vmatpush3.bf16.msra.mxu0 %v874_v40 }
 0x916   : > { %v1958_v44 = vpop.eup %1957  ;;  %1813 = vmatprep.subr.bf16.mxu0 %v885_v42 }
 0x917   : > { %v864_v45 = vmul.f32 %v1958_v44, %v1952_v27  ;;  %v940_v46 = vpop.permute.xlu1 %939  ;;  %v936_v53 = vpop.permute.xlu0 %935 }
 0x918   : > { %v950_v54 = vsel %vm422_vm2, %v940_v46, 0 }
 0x919   : > { %1814 = vmatpush3.bf16.msra.mxu0 %v885_v42  ;;  %1687 = vst.msk [vmem:[%s2159_s16 + $0x30] sm:$0xff] %vm486_vm3, %v864_v45 }
 0x91a   : > { %v1960_v47 = vpop.eup %1959  ;;  %1869 = vmatprep.subr.msk.bf16.mxu0 %vm422_vm2, %v940_v46 }
 0x91b   : > { %v1962_v48 = vpop.eup %1961  ;;  %v865_v49 = vmul.f32 %v1960_v47, %v1954_v29  ;;  %v942_v55 = vpop.permute.xlu1 %941 }
 0x91c   : > { %v866_v50 = vmul.f32 %v1962_v48, %v1956_v30  ;;  %v953_v56 = vsel %vm422_vm2, %v942_v55, 0 }
 0x91d   : > { %1688 = vst.msk [vmem:[%s2159_s16 + $0x38] sm:$0xff] %vm486_vm3, %v865_v49  ;;  %v871_v51 = vpack.c.bf16 %v865_v49, %v864_v45 }
 0x91e   : > { %1689 = vst.msk [vmem:[%s2159_s16 + $0x40] sm:$0x1] %vm493_vm4, %v866_v50  ;;  %v872_v52 = vpack.c.bf16 %v866_v50, %v866_v50 }
 0x91f   : > { %1815 = vmatprep.mubr.msk.bf16.mxu0 %vm486_vm3, %v871_v51  ;;  %v938_v60 = vpop.permute.xlu1 %937 }
 0x920   : > { %1816 = vmatmul.mubr.msk.bf16.vlgmr.msra.gmra.mrb[12].mxu0 %vm486_vm3, %v872_v52 }
 0x921   : > { %1823 = vmatprep.mubr.msk.bf16.mxu0 %vm422_vm2, %v936_v53 }
 0x922   : > { %1820 = vmatpush3.bf16.xpose.msra.mxu0 %v950_v54 }
 0x923   : > { %1870 = vmatprep.subr.msk.bf16.mxu0 %vm422_vm2, %v942_v55 }
 0x92a   : > { %1822 = vmatpush3.bf16.xpose.msra.mxu0 %v953_v56 }
 0x931   : > { %1824 = vmatmul.mubr.msk.bf16.vlgmr.msra.gmra.mrb[16].mxu0 %vm422_vm2, %v938_v60 }
 0x9f3   : > { %v1817_v6 = vpop.f32.mrb[12].mxu0 }
 0x9f4   : > { %v921_v7 = vpop.f32.mrb[13].mxu0 }
 0x9f5   : > { %v1818_v8 = vpop.f32.mrb[14].mxu0 }
 0x9f6   : > { %v924_v9 = vpop.f32.mrb[15].mxu0 }
 0x9f7   : > { %v1903_v10 = vpack.i.bf16 %v924_v9, %v921_v7 }
 0xa04   : > { %v1825_v11 = vpop.f32.mrb[16].mxu0 }
 0xa05   : > { %v989_v12 = vpop.f32.mrb[17].mxu0  ;;  %v1005_v16 = vmul.f32 0.35355338, %v1825_v11 }
 0xa06   : > { %v1003_v13 = vmul.f32 0.35355338, %v989_v12  ;;  %v1826_v14 = vpop.f32.mrb[18].mxu0 }
 0xa07   : > { %v992_v15 = vpop.f32.mrb[19].mxu0  ;;  %v1012_v20 = vsel %vm493_vm4, %v1005_v16, -inf }
 0xa08   : > { %v1004_v17 = vmul.f32 0.35355338, %v992_v15  ;;  %v1006_v18 = vsel %vm486_vm3, %v1003_v13, -inf }
 0xa09   : > { %1007 = vmax.xlane.f32.xlu0 %v1006_v18 }
 0xa0a   : > { %v1009_v19 = vsel %vm486_vm3, %v1004_v17, -inf }
 0xa0b   : > { %1010 = vmax.xlane.f32.xlu1 %v1009_v19 }
 0xa0d   : > { %1013 = vmax.xlane.f32.xlu0 %v1012_v20 }
 0xa96   : > { %v1008_v23 = vpop.xlane.xlu0 %1007 }
 0xa97   : > { %v1015_v24 = vsub.f32 %v1003_v13, %v1008_v23 }
 0xa98   : > { %v1011_v25 = vpop.xlane.xlu1 %1010 }
 0xa99   : > { %v1018_v26 = vmul.f32 1.442695, %v1015_v24  ;;  %v1016_v27 = vsub.f32 %v1004_v17, %v1011_v25 }
 0xa9a   : > { %v1014_v28 = vpop.xlane.xlu0 %1013 }
 0xa9b   : > { %1963 = vpow2.f32 %v1018_v26  ;;  %v1020_v29 = vmul.f32 1.442695, %v1016_v27  ;;  %v1017_v30 = vsub.f32 %v1005_v16, %v1014_v28 }
 0xa9d   : > { %1965 = vpow2.f32 %v1020_v29  ;;  %v1022_v31 = vmul.f32 1.442695, %v1017_v30 }
 0xa9f   : > { %1967 = vpow2.f32 %v1022_v31 }
 0xaa5   : > { %v1964_v32 = vpop.eup %1963 }
 0xaa6   : > { %v1024_v36 = vsel %vm486_vm3, %v1964_v32, 0.0 }
 0xaa7   : > { %v1966_v37 = vpop.eup %1965  ;;  %1025 = vadd.xlane.f32.xlu0 %v1024_v36 }
 0xaa8   : > { %v1027_v41 = vsel %vm486_vm3, %v1966_v37, 0.0 }
 0xaa9   : > { %v1968_v38 = vpop.eup %1967 }
 0xaaa   : > { %v1030_v40 = vsel %vm493_vm4, %v1968_v38, 0.0 }
 0xaab   : > { %1031 = vadd.xlane.f32.xlu1 %v1030_v40  ;;  %1028 = vadd.xlane.f32.xlu0 %v1027_v41 }
 0xabc   : > { %1047 = vrot.lane.b32.xlu1 %v2127_v59, %s2019_s26 }
 0xac0   : > { %1160 = vrot.lane.b32.xlu1 %v2097_v21, %s2020_s27 }
 0xac1   : > { %1045 = vrot.lane.b32.xlu0 %v2130_v63, %s2019_s26 }
 0xac4   : > { %1899 = vrot.lane.b32.xlu1 %v1898_v5, %s2021_s28 }
 0xac5   : > { %1114 = vrot.lane.b32.xlu0 %v2209_v57, %s2021_s28  ;;  %s259_s28 = scalar_lea.vmem %s2384_s5, %s1871_s23 }
 0xac8   : > { %1904 = vrot.lane.b32.xlu1 %v1903_v10, %s2022_s29 }
 0xac9   : > { %1126 = vrot.lane.b32.xlu0 %v1817_v6, %s2022_s29 }
 0xacd   : > { %1162 = vrot.lane.b32.xlu0 %v2102_v22, %s2020_s27 }
 0xb34   : > { %v1026_v42 = vpop.xlane.xlu0 %1025 }
 0xb35   : > { %1969 = vrcp.f32 %v1026_v42 }
 0xb38   : > { %v1029_v59 = vpop.xlane.xlu0 %1028  ;;  %v1032_v44 = vpop.xlane.xlu1 %1031 }
 0xb39   : > { %1971 = vrcp.f32 %v1029_v59 }
 0xb3a   : > { %1973 = vrcp.f32 %v1032_v44 }
 0xb3c   : > { %v1046_v21 = vpop.permute.xlu0 %1045  ;;  %v1048_v63 = vpop.permute.xlu1 %1047 }
 0xb3d   : > { %v1057_v45 = vand.u32 %v1048_v63, %v2154_v43  ;;  %1827 = vmatprep.subr.bf16.mxu1 %v1046_v21 }
 0xb3e   : > { %1828 = vmatpush3.bf16.msra.mxu1 %v1046_v21 }
 0xb3f   : > { %v1970_v57 = vpop.eup %1969  ;;  %1829 = vmatprep.subr.bf16.mxu1 %v1057_v45 }
 0xb40   : > { %v1115_v58 = vpop.permute.xlu0 %1114  ;;  %v1036_v3 = vmul.f32 %v1970_v57, %v1964_v32  ;;  %v1161_v5 = vpop.permute.xlu1 %1160 }
 0xb41   : > { %v1145_v22 = vsel %vm422_vm2, %v2176_v61, %v1115_v58 }
 0xb42   : > { %1830 = vmatpush3.bf16.msra.mxu1 %v1057_v45  ;;  %1694 = vst.msk [vmem:[%s2159_s16 + $0x48] sm:$0xff] %vm486_vm3, %v1036_v3 }
 0xb43   : > { %v1972_v46 = vpop.eup %1971  ;;  %1835 = vmatprep.subr.bf16.mxu1 %v1161_v5 }
 0xb44   : > { %v1974_v47 = vpop.eup %1973  ;;  %v1037_v48 = vmul.f32 %v1972_v46, %v1966_v37  ;;  %v1127_v61 = vpop.permute.xlu0 %1126 }
 0xb45   : > { %v1038_v43 = vmul.f32 %v1974_v47, %v1968_v38  ;;  %v1900_v60 = vpop.permute.xlu1 %1899  ;;  %v1149_v20 = vsel %vm1146_vm6, %v1145_v22, %v1127_v61 }
 0xb46   : > { %1695 = vst.msk [vmem:[%s2159_s16 + $0x50] sm:$0xff] %vm486_vm3, %v1037_v48  ;;  %v1043_v49 = vpack.c.bf16 %v1037_v48, %v1036_v3  ;;  %v1902_v7 = vunpack.i.h.bf16 %v1900_v60  ;;  %v1901_v8 = vunpack.i.l.bf16 %v1900_v60 }
 0xb47   : > { %1696 = vst.msk [vmem:[%s2159_s16 + $0x58] sm:$0x1] %vm493_vm4, %v1038_v43  ;;  %v1044_v50 = vpack.c.bf16 %v1038_v43, %v1038_v43  ;;  %v1915_v43 = vld [vmem:[%s2381_s2] sm:$0xff]  }
 0xb48   : > { %1831 = vmatprep.mubr.msk.bf16.mxu1 %vm486_vm3, %v1043_v49  ;;  %v1163_v51 = vpop.permute.xlu0 %1162  ;;  %v1144_v12 = vsel %vm422_vm2, %v2180_v4, %v1902_v7  ;;  %v1143_v13 = vsel %vm422_vm2, %v2178_v62, %v1901_v8  ;;  %v1158_v4 = vsub.s32 3, %v2108_v33  ;;  %v1916_v49 = vld [vmem:[%s2381_s2 + $0x8] sm:$0xff]   ;;  %1843 = vmatprep.subr.bf16.mxu0 %v1915_v43 }
 0xb49   : > { %1832 = vmatmul.mubr.msk.bf16.vlgmr.msra.gmra.mrb[12].mxu1 %vm486_vm3, %v1044_v50  ;;  %v1905_v6 = vpop.permute.xlu1 %1904  ;;  %1844 = vmatpush3.bf16.msra.mxu0 %v1915_v43 }
 0xb4a   : > { %1836 = vmatpush3.bf16.msra.mxu1 %v1161_v5  ;;  %v1907_v9 = vunpack.i.h.bf16 %v1905_v6  ;;  %v1906_v10 = vunpack.i.l.bf16 %v1905_v6  ;;  %v1159_v27 = vrot.slane %v2114_v35, %v1158_v4  ;;  %1845 = vmatprep.subr.bf16.mxu0 %v1916_v49  ;;  %v1264_v6 = vsub.s32 4, %v2108_v33  ;;  %v1918_v4 = vld [vmem:[%s2381_s2 + $0x18] sm:$0xff]  }
 0xb4b   : > { %1837 = vmatprep.subr.bf16.mxu1 %v1163_v51 }
 0xb4c   : > { %v1147_v16 = vsel %vm1146_vm6, %v1143_v13, %v1906_v10  ;;  %v1148_v17 = vsel %vm1146_vm6, %v1144_v12, %v1907_v9  ;;  %v1265_v9 = vrot.slane %v2114_v35, %v1264_v6  ;;  %v1271_v10 = vsub.s32 5, %v2108_v33 }
 0xb4d   : > { %1846 = vmatpush3.bf16.msra.mxu0 %v1916_v49 }
 0xb4e   : > { %1838 = vmatpush3.bf16.msra.mxu1 %v1163_v51 }
 0xc1c   : > { %v1833_v52 = vpop.f32.mrb[12].mxu1 }
 0xc1d   : > { %v1093_v53 = vpop.f32.mrb[13].mxu1 }
 0xc1e   : > { %v1834_v54 = vpop.f32.mrb[14].mxu1 }
 0xc1f   : > { %v1096_v55 = vpop.f32.mrb[15].mxu1 }
 0xc20   : > { %v1908_v56 = vpack.i.bf16 %v1096_v55, %v1093_v53 }
 0xc22   : > { %1909 = vrot.lane.b32.xlu1 %v1908_v56, %s2023_s30 }
 0xc26   : > { %1138 = vrot.lane.b32.xlu1 %v1833_v52, %s2023_s30 }
 0xc94   : > { %v1910_v11 = vpop.permute.xlu1 %1909 }
 0xc95   : > { %v1912_v14 = vunpack.i.h.bf16 %v1910_v11  ;;  %v1911_v15 = vunpack.i.l.bf16 %v1910_v11 }
 0xc97   : > { %v1151_v18 = vsel %vm1150_vm7, %v1147_v16, %v1911_v15  ;;  %v1152_v19 = vsel %vm1150_vm7, %v1148_v17, %v1912_v14  ;;  %v1272_v16 = vrot.slane %v2114_v35, %v1271_v10 }
 0xc98   : > { %v1139_v23 = vpop.permute.xlu1 %1138  ;;  %v1154_v24 = vpack.c.bf16 %v1152_v19, %v1151_v18 }
 0xc99   : > { %v1153_v25 = vsel %vm1150_vm7, %v1149_v20, %v1139_v23 }
 0xc9a   : > { %v1155_v26 = vpack.c.bf16 %v1153_v25, %v1153_v25  ;;  %1839 = vmatprep.mubr.msk.bf16.mxu1 %vm286_vm0, %v1154_v24 }
 0xc9c   : > { %1840 = vmatmul.mubr.msk.bf16.vlgmr.msra.gmra.mrb[16].mxu1 %vm286_vm0, %v1155_v26  ;;  %v1917_v26 = vld [vmem:[%s2381_s2 + $0x10] sm:$0xff]  }
 0xc9d   : > { %1851 = vmatprep.subr.bf16.mxu1 %v1917_v26 }
 0xc9e   : > { %1852 = vmatpush3.bf16.msra.mxu1 %v1917_v26 }
 0xc9f   : > { %1853 = vmatprep.subr.bf16.mxu1 %v1918_v4 }
 0xca2   : > { %1854 = vmatpush3.bf16.msra.mxu1 %v1918_v4 }
 0xd6f   : > { %v1841_v62 = vpop.f32.mrb[16].mxu1 }
 0xd70   : > { %v1206_v28 = vpop.f32.mrb[17].mxu1  ;;  %v1215_v29 = vadd.f32 %v1841_v62, %v1159_v27  ;;  %v1920_v62 = vld [vmem:[%s2381_s2 + $0x28] sm:$0xff]  }
 0xd71   : > { %v1207_v30 = vadd.f32 %v1206_v28, %v1159_v27  ;;  %v1842_v31 = vpop.f32.mrb[18].mxu1  ;;  %v1280_v28 = vsub.s32 6, %v2108_v33 }
 0xd72   : > { %v1209_v32 = vpop.f32.mrb[19].mxu1  ;;  %v2281_v38 = vadd.f32 %v1215_v29, %v2078_v1 }
 0xd73   : > { %v2278_v36 = vadd.f32 %v1207_v30, %v2076_v0  ;;  %v1210_v37 = vadd.f32 %v1209_v32, %v1159_v27  ;;  %v1919_v27 = vld [vmem:[%s2381_s2 + $0x20] sm:$0xff]   ;;  %v1281_v29 = vrot.slane %v2114_v35, %v1280_v28 }
 0xd74   : > { %v1229_v59 = vsel %vm293_vm1, %v2281_v38, 0.0  ;;  %1855 = vmatprep.subr.bf16.mxu1 %v1919_v27 }
 0xd75   : > { %v2284_v40 = vadd.f32 %v1210_v37, %v2080_v2  ;;  %v1223_v41 = vsel %vm286_vm0, %v2278_v36, 0.0  ;;  %1856 = vmatpush3.bf16.msra.mxu1 %v1919_v27 }
 0xd76   : > { %1224 = vadd.xlane.f32.xlu0 %v1223_v41  ;;  %1857 = vmatprep.subr.bf16.mxu1 %v1920_v62 }
 0xd77   : > { %v1226_v42 = vsel %vm286_vm0, %v2284_v40, 0.0 }
 0xd78   : > { %1227 = vadd.xlane.f32.xlu1 %v1226_v42 }
 0xd79   : > { %1858 = vmatpush3.bf16.msra.mxu1 %v1920_v62 }
 0xd7a   : > { %1230 = vadd.xlane.f32.xlu0 %v1229_v59 }
 0xe03   : > { %v1225_v0 = vpop.xlane.xlu0 %1224 }
 0xe04   : > { %v1232_v44 = vmul.f32 0.03125, %v1225_v0 }
 0xe05   : > { %v1228_v21 = vpop.xlane.xlu1 %1227 }
 0xe06   : > { %v1235_v1 = vsub.f32 %v2278_v36, %v1232_v44  ;;  %v1233_v63 = vmul.f32 0.03125, %v1228_v21 }
 0xe07   : > { %v1231_v2 = vpop.xlane.xlu0 %1230 }
 0xe08   : > { %v1236_v45 = vsub.f32 %v2284_v40, %v1233_v63  ;;  %v1234_v57 = vmul.f32 0.03125, %v1231_v2  ;;  %v1238_v58 = vmul.f32 %v1235_v1, %v1235_v1 }
 0xe0a   : > { %v1237_v3 = vsub.f32 %v2281_v38, %v1234_v57  ;;  %v1241_v22 = vsel %vm286_vm0, %v1238_v58, 0.0  ;;  %v1239_v5 = vmul.f32 %v1236_v45, %v1236_v45 }
 0xe0b   : > { %1242 = vadd.xlane.f32.xlu0 %v1241_v22 }
 0xe0c   : > { %v1240_v46 = vmul.f32 %v1237_v3, %v1237_v3  ;;  %v1244_v47 = vsel %vm286_vm0, %v1239_v5, 0.0 }
 0xe0e   : > { %v1247_v48 = vsel %vm293_vm1, %v1240_v46, 0.0 }
 0xe0f   : > { %1245 = vadd.xlane.f32.xlu0 %v1244_v47  ;;  %1248 = vadd.xlane.f32.xlu1 %v1247_v48 }
 0xe98   : > { %v1243_v50 = vpop.xlane.xlu0 %1242 }
 0xe99   : > { %v1250_v61 = vmul.f32 0.03125, %v1243_v50 }
 0xe9b   : > { %v1253_v51 = vadd.f32 1e-06, %v1250_v61 }
 0xe9c   : > { %v1249_v52 = vpop.xlane.xlu1 %1248  ;;  %v1246_v53 = vpop.xlane.xlu0 %1245 }
 0xe9d   : > { %1975 = vrsqrt.f32 %v1253_v51  ;;  %v1252_v54 = vmul.f32 0.03125, %v1249_v52  ;;  %v1251_v55 = vmul.f32 0.03125, %v1246_v53 }
 0xe9f   : > { %v1255_v56 = vadd.f32 1e-06, %v1252_v54  ;;  %v1254_v60 = vadd.f32 1e-06, %v1251_v55 }
 0xea1   : > { %1977 = vrsqrt.f32 %v1255_v56 }
 0xea2   : > { %1979 = vrsqrt.f32 %v1254_v60 }
 0xea7   : > { %v1976_v7 = vpop.eup %1975 }
 0xea8   : > { %v1259_v8 = vmul.f32 %v1976_v7, %v1235_v1 }
 0xeaa   : > { %v1266_v15 = vmul.f32 %v1265_v9, %v1259_v8 }
 0xeab   : > { %v1978_v11 = vpop.eup %1977 }
 0xeac   : > { %v1980_v12 = vpop.eup %1979  ;;  %v1261_v13 = vmul.f32 %v1978_v11, %v1237_v3  ;;  %v1273_v20 = vadd.f32 %v1272_v16, %v1266_v15 }
 0xead   : > { %v1260_v14 = vmul.f32 %v1980_v12, %v1236_v45 }
 0xeae   : > { %v1268_v17 = vmul.f32 %v1265_v9, %v1261_v13 }
 0xeaf   : > { %v1267_v18 = vmul.f32 %v1265_v9, %v1260_v14 }
 0xeb0   : > { %v1275_v19 = vadd.f32 %v1272_v16, %v1268_v17 }
 0xeb1   : > { %v1274_v23 = vadd.f32 %v1272_v16, %v1267_v18 }
 0xeb2   : > { %v1277_v24 = vpack.c.bf16 %v1275_v19, %v1275_v19 }
 0xeb3   : > { %v1276_v25 = vpack.c.bf16 %v1274_v23, %v1273_v20 }
 0xeb5   : > { %1847 = vmatprep.mubr.msk.bf16.mxu0 %vm286_vm0, %v1276_v25 }
 0xeb6   : > { %1848 = vmatmul.mubr.msk.bf16.vlgmr.msra.gmra.mrb[20].mxu0 %vm286_vm0, %v1277_v24 }
 0xf89   : > { %v1849_v30 = vpop.f32.mrb[20].mxu0 }
 0xf8a   : > { %v2324_v31 = vadd.f32 %v1849_v30, %v1281_v29  ;;  %v1334_v32 = vpop.f32.mrb[21].mxu0 }
 0xf8b   : > { %v2326_v37 = vadd.f32 %v1334_v32, %v1281_v29  ;;  %v1850_v41 = vpop.f32.mrb[22].mxu0 }
 0xf8c   : > { %v2329_v42 = vmul.f32 0.70710677, %v2324_v31  ;;  %v1337_v59 = vpop.f32.mrb[23].mxu0 }
 0xf8d   : > { %v2332_v0 = vmul.f32 0.70710677, %v2326_v37  ;;  %v2334_v44 = vadd.f32 %v1337_v59, %v1281_v29 }
 0xf8e   : > { %v1362_v21 = vand.u32 2147483647, %v2329_v42  ;;  %vm1356_vm8 = vcmp.ge.f32.partialorder %v2329_v42, 0.0 }
 0xf8f   : > { %v1360_v35 = vand.u32 2147483647, %v2332_v0  ;;  %v2339_v63 = vmul.f32 0.70710677, %v2334_v44  ;;  %vm1354_vm9 = vcmp.ge.f32.partialorder %v2332_v0, 0.0  ;;  %v1350_v0 = vmul.f32 0.5, %v2324_v31 }
 0xf90   : > { %v1365_v1 = vmul.f32 0.3275911, %v1362_v21  ;;  %v1404_v5 = vsub.f32 0.0, %v1362_v21 }
 0xf91   : > { %v1363_v2 = vmul.f32 0.3275911, %v1360_v35  ;;  %v1361_v57 = vand.u32 2147483647, %v2339_v63  ;;  %v1402_v46 = vsub.f32 0.0, %v1360_v35  ;;  %vm1355_vm10 = vcmp.ge.f32.partialorder %v2339_v63, 0.0 }
 0xf92   : > { %v1368_v45 = vadd.f32 1.0, %v1365_v1  ;;  %v1407_v48 = vmul.f32 %v1404_v5, %v1362_v21  ;;  %v2024_v1 = vmov -1.0  }
 0xf93   : > { %v1366_v58 = vadd.f32 1.0, %v1363_v2  ;;  %v1364_v3 = vmul.f32 0.3275911, %v1361_v57  ;;  %v1403_v43 = vsub.f32 0.0, %v1361_v57  ;;  %v1405_v61 = vmul.f32 %v1402_v46, %v1360_v35 }
 0xf94   : > { %1981 = vrcp.f32 %v1368_v45  ;;  %v1412_v54 = vmul.f32 1.442695, %v1407_v48  ;;  %v1359_v2 = vsel %vm1356_vm8, 1.0, %v2024_v1  ;;  %v1358_v42 = vsel %vm1355_vm10, 1.0, %v2024_v1 }
 0xf95   : > { %1983 = vrcp.f32 %v1366_v58  ;;  %v1367_v22 = vadd.f32 1.0, %v1364_v3  ;;  %v1406_v56 = vmul.f32 %v1403_v43, %v1361_v57  ;;  %v1408_v6 = vmul.f32 1.442695, %v1405_v61 }
 0xf96   : > { %v1357_v58 = vsel %vm1354_vm9, 1.0, %v2024_v1  ;;  %v1348_v43 = vmul.f32 0.5, %v2326_v37  ;;  %v1517_v1 = vld [vmem:[%s2383_s4] sm:$0x3] }
 0xf97   : > { %1985 = vrcp.f32 %v1367_v22  ;;  %v1410_v12 = vmul.f32 1.442695, %v1406_v56 }
 0xf98   : > { %1987 = vpow2.f32 %v1412_v54  ;;  %v1433_v54 = vsub.s32 7, %v2108_v33 }
 0xf99   : > { %1989 = vpow2.f32 %v1408_v6 }
 0xf9a   : > { %1991 = vpow2.f32 %v1410_v12 }
 0xf9e   : > { %v1982_v47 = vpop.eup %1981 }
 0xf9f   : > { %v1984_v49 = vpop.eup %1983  ;;  %v1377_v50 = vmul.f32 1.0614054, %v1982_v47 }
 0xfa0   : > { %v1375_v51 = vmul.f32 1.0614054, %v1984_v49 }
 0xfa1   : > { %v1380_v52 = vadd.f32 -1.4531521, %v1377_v50  ;;  %v1986_v53 = vpop.eup %1985 }
 0xfa2   : > { %v1378_v55 = vadd.f32 -1.4531521, %v1375_v51  ;;  %v1376_v7 = vmul.f32 1.0614054, %v1986_v53  ;;  %v1988_v62 = vpop.eup %1987 }
 0xfa3   : > { %v1383_v60 = vmul.f32 %v1982_v47, %v1380_v52  ;;  %v1990_v29 = vpop.eup %1989 }
 0xfa4   : > { %v1381_v8 = vmul.f32 %v1984_v49, %v1378_v55  ;;  %v1379_v10 = vadd.f32 -1.4531521, %v1376_v7  ;;  %v1992_v35 = vpop.eup %1991  ;;  %v1999_v55 = vld [vmem:[%s2382_s3] sm:$0xff] }
 0xfa5   : > { %v1386_v9 = vadd.f32 1.4214138, %v1383_v60  ;;  %v1434_v31 = vrot.slane %v1999_v55, %v1433_v54 }
 0xfa6   : > { %v1384_v11 = vadd.f32 1.4214138, %v1381_v8  ;;  %v1382_v14 = vmul.f32 %v1986_v53, %v1379_v10 }
 0xfa7   : > { %v1389_v13 = vmul.f32 %v1982_v47, %v1386_v9 }
 0xfa8   : > { %v1387_v15 = vmul.f32 %v1984_v49, %v1384_v11  ;;  %v1385_v17 = vadd.f32 1.4214138, %v1382_v14 }
 0xfa9   : > { %v1392_v16 = vadd.f32 -0.28449672, %v1389_v13 }
 0xfaa   : > { %v1390_v18 = vadd.f32 -0.28449672, %v1387_v15  ;;  %v1388_v20 = vmul.f32 %v1986_v53, %v1385_v17 }
 0xfab   : > { %v1395_v19 = vmul.f32 %v1982_v47, %v1392_v16 }
 0xfac   : > { %v1393_v23 = vmul.f32 %v1984_v49, %v1390_v18  ;;  %v1391_v25 = vadd.f32 -0.28449672, %v1388_v20 }
 0xfad   : > { %v1398_v24 = vadd.f32 0.2548296, %v1395_v19 }
 0xfae   : > { %v1396_v26 = vadd.f32 0.2548296, %v1393_v23  ;;  %v1394_v27 = vmul.f32 %v1986_v53, %v1391_v25 }
 0xfaf   : > { %v1401_v4 = vmul.f32 %v1982_v47, %v1398_v24 }
 0xfb0   : > { %v1399_v28 = vmul.f32 %v1984_v49, %v1396_v26  ;;  %v1397_v32 = vadd.f32 0.2548296, %v1394_v27  ;;  %v1349_v49 = vmul.f32 0.5, %v2334_v44 }
 0xfb1   : > { %v1416_v30 = vmul.f32 %v1988_v62, %v1401_v4 }
 0xfb2   : > { %v1414_v41 = vmul.f32 %v1990_v29, %v1399_v28  ;;  %v1400_v21 = vmul.f32 %v1986_v53, %v1397_v32 }
 0xfb3   : > { %v1419_v59 = vsub.f32 1.0, %v1416_v30 }
 0xfb4   : > { %v1417_v45 = vsub.f32 1.0, %v1414_v41  ;;  %v1415_v3 = vmul.f32 %v1992_v35, %v1400_v21 }
 0xfb5   : > { %v1422_v57 = vmul.f32 %v1419_v59, %v1359_v2  ;;  %v1560_v2 = vrot.slane %v1517_v1, %v330_v34 }
 0xfb6   : > { %v1420_v22 = vmul.f32 %v1417_v45, %v1357_v58  ;;  %v1418_v5 = vsub.f32 1.0, %v1415_v3 }
 0xfb7   : > { %v1425_v46 = vadd.f32 1.0, %v1422_v57  ;;  %v1567_v57 = vrot.slane %v1517_v1, %v337_v39 }
 0xfb8   : > { %v1423_v47 = vadd.f32 1.0, %v1420_v22  ;;  %v1421_v48 = vmul.f32 %v1418_v5, %v1358_v42 }
 0xfb9   : > { %v1428_v61 = vmul.f32 %v1425_v46, %v1350_v0 }
 0xfba   : > { %v1424_v50 = vadd.f32 1.0, %v1421_v48  ;;  %v1426_v51 = vmul.f32 %v1423_v47, %v1348_v43 }
 0xfbb   : > { %v1430_v63 = vpack.c.bf16 %v1428_v61, %v1428_v61 }
 0xfbc   : > { %v1427_v52 = vmul.f32 %v1424_v50, %v1349_v49 }
 0xfbe   : > { %v1429_v53 = vpack.c.bf16 %v1427_v52, %v1426_v51 }
 0xfc0   : > { %1859 = vmatprep.mubr.msk.bf16.mxu1 %vm1459_vm11, %v1429_v53 }
 0xfc1   : > { %1860 = vmatmul.mubr.msk.bf16.vlgmr.msra.gmra.mrb[20].mxu1 %vm1459_vm11, %v1430_v63 }
0x1094   : > { %v1861_v56 = vpop.f32.mrb[20].mxu1 }
0x1095   : > { %v1500_v37 = vpop.f32.mrb[21].mxu1  ;;  %v1509_v60 = vadd.f32 %v1861_v56, %v1434_v31 }
0x1096   : > { %v1501_v44 = vadd.f32 %v1500_v37, %v1434_v31  ;;  %v1862_v6 = vpop.f32.mrb[22].mxu1 }
0x1097   : > { %v1503_v7 = vpop.f32.mrb[23].mxu1  ;;  %v1516_v12 = vadd.f32 %v1509_v60, %v2281_v38 }
0x1098   : > { %v1504_v8 = vadd.f32 %v1503_v7, %v1434_v31  ;;  %v1514_v9 = vadd.f32 %v1501_v44, %v2278_v36 }
0x1099   : > { %v1524_v14 = vsel %vm293_vm1, %v1516_v12, 0.0 }
0x109a   : > { %v1518_v10 = vsel %vm286_vm0, %v1514_v9, 0.0  ;;  %v1515_v11 = vadd.f32 %v1504_v8, %v2284_v40 }
0x109b   : > { %1519 = vadd.xlane.f32.xlu0 %v1518_v10 }
0x109c   : > { %v1521_v13 = vsel %vm286_vm0, %v1515_v11, 0.0 }
0x109d   : > { %1522 = vadd.xlane.f32.xlu1 %v1521_v13 }
0x109f   : > { %1525 = vadd.xlane.f32.xlu0 %v1524_v14 }
0x1128   : > { %v1520_v15 = vpop.xlane.xlu0 %1519 }
0x1129   : > { %v1527_v16 = vmul.f32 0.03125, %v1520_v15 }
0x112a   : > { %v1523_v17 = vpop.xlane.xlu1 %1522 }
0x112b   : > { %v1530_v18 = vsub.f32 %v1514_v9, %v1527_v16  ;;  %v1528_v19 = vmul.f32 0.03125, %v1523_v17 }
0x112c   : > { %v1526_v20 = vpop.xlane.xlu0 %1525 }
0x112d   : > { %v1531_v36 = vsub.f32 %v1515_v11, %v1528_v19  ;;  %v1529_v23 = vmul.f32 0.03125, %v1526_v20  ;;  %v1533_v24 = vmul.f32 %v1530_v18, %v1530_v18 }
0x112f   : > { %v1532_v25 = vsub.f32 %v1516_v12, %v1529_v23  ;;  %v1536_v40 = vsel %vm286_vm0, %v1533_v24, 0.0  ;;  %v1534_v38 = vmul.f32 %v1531_v36, %v1531_v36 }
0x1130   : > { %1537 = vadd.xlane.f32.xlu1 %v1536_v40 }
0x1131   : > { %v1539_v26 = vsel %vm286_vm0, %v1534_v38, 0.0  ;;  %v1535_v4 = vmul.f32 %v1532_v25, %v1532_v25 }
0x1132   : > { %1540 = vadd.xlane.f32.xlu0 %v1539_v26 }
0x1133   : > { %v1542_v27 = vsel %vm293_vm1, %v1535_v4, 0.0 }
0x1134   : > { %1543 = vadd.xlane.f32.xlu1 %v1542_v27 }
0x11bd   : > { %v1538_v62 = vpop.xlane.xlu1 %1537 }
0x11be   : > { %v1545_v28 = vmul.f32 0.03125, %v1538_v62 }
0x11bf   : > { %v1541_v29 = vpop.xlane.xlu0 %1540 }
0x11c0   : > { %v1548_v30 = vadd.f32 1e-06, %v1545_v28  ;;  %v1546_v32 = vmul.f32 0.03125, %v1541_v29 }
0x11c1   : > { %v1544_v41 = vpop.xlane.xlu1 %1543 }
0x11c2   : > { %1993 = vrsqrt.f32 %v1548_v30  ;;  %v1549_v59 = vadd.f32 1e-06, %v1546_v32  ;;  %v1547_v21 = vmul.f32 0.03125, %v1544_v41 }
0x11c4   : > { %1995 = vrsqrt.f32 %v1549_v59  ;;  %v1550_v35 = vadd.f32 1e-06, %v1547_v21 }
0x11c6   : > { %1997 = vrsqrt.f32 %v1550_v35 }
0x11cc   : > { %v1994_v45 = vpop.eup %1993 }
0x11cd   : > { %v1554_v58 = vmul.f32 %v1994_v45, %v1530_v18 }
0x11ce   : > { %v1996_v3 = vpop.eup %1995 }
0x11cf   : > { %v1561_v22 = vmul.f32 %v1560_v2, %v1554_v58  ;;  %v1555_v5 = vmul.f32 %v1996_v3, %v1531_v36 }
0x11d0   : > { %v1998_v46 = vpop.eup %1997 }
0x11d1   : > { %v1568_v42 = vadd.f32 %v1567_v57, %v1561_v22  ;;  %v1562_v47 = vmul.f32 %v1560_v2, %v1555_v5  ;;  %v1556_v48 = vmul.f32 %v1998_v46, %v1532_v25 }
0x11d3   : > { %1571 = vst.msk [vmem:[%s259_s28] sm:$0xff] %vm286_vm0, %v1568_v42  ;;  %v1569_v34 = vadd.f32 %v1567_v57, %v1562_v47  ;;  %v1563_v0 = vmul.f32 %v1560_v2, %v1556_v48 }
0x11d5   : > { %1572 = vst.msk [vmem:[%s259_s28 + $0x8] sm:$0xff] %vm286_vm0, %v1569_v34  ;;  %v1570_v33 = vadd.f32 %v1567_v57, %v1563_v0 }
0x11d7   : > { %1573 = vst.msk [vmem:[%s259_s28 + $0x10] sm:$0x1] %vm293_vm1, %v1570_v33 }
0x11d8 PF: > { %s17_s21 = sadd.s32 1, %s2006_s21  }
0x11d9   : > { %p14_p4 = scmp.ge.s32.totalorder %s17_s21, 4  }
0x11db   :  { %16 = sbr.rel (!%p14_p4) target bundleno = 1 (0x1), region = 85 }

</bundles_post_ra>
